<compile_context>
chip_gen: v7x
topology: tpu7x:2x2x1
jax: 0.10.0
libtpu: 0.0.40
codegen_flags: <defaults>
</compile_context>

<pallas_src>
import functools

import numpy as np
import jax
import jax.numpy as jnp
from jax.experimental import pallas as pl
from jax.experimental.pallas import tpu as pltpu


# ----------------------------------------------------------------------------
# Host-side constant builders.
# ----------------------------------------------------------------------------
def make_tap_masks(h, w, b_tile):
    """Boundary masks for the 9 taps of a 3x3 / pad=1 conv, tiled over the
    batch-merged lane axis.  mask[t, 0, b*h*w + y*w + x] == 1 iff the tap's
    source pixel (y+dy-1, x+dx-1) lies inside the image (this also kills any
    cross-sample values a merged-lane roll drags in)."""
    m = h * w
    masks = np.zeros((9, 1, b_tile * m), np.float32)
    for dy in range(3):
        for dx in range(3):
            t = 3 * dy + dx
            mk = np.zeros((h, w), np.float32)
            ys = slice(max(0, 1 - dy), h - max(0, dy - 1))
            xs = slice(max(0, 1 - dx), w - max(0, dx - 1))
            mk[ys, xs] = 1.0
            masks[t, 0, :] = np.tile(mk.reshape(-1), b_tile)
    return masks


def make_subsample_bd(h, w, b_tile):
    """Block-diagonal stride-2 spatial subsample for the batch-merged lane
    layout: [b_tile*h*w, b_tile*(h//2)*(w//2)].  Only the stride-2 ops
    (conv14 / resconv2) use it; keep b_tile small with this formulation."""
    h2, w2 = h // 2, w // 2
    m1, m2 = h * w, h2 * w2
    s = np.zeros((b_tile * m1, b_tile * m2), np.float32)
    for b in range(b_tile):
        for yo in range(h2):
            for xo in range(w2):
                s[b * m1 + 2 * yo * w + 2 * xo, b * m2 + yo * w2 + xo] = 1.0
    return s


def make_pool_mat(m2, b_tile):
    """Per-sample spatial mean expressed as a matmul: [b_tile*m2, b_tile]."""
    p = np.zeros((b_tile * m2, b_tile), np.float32)
    for b in range(b_tile):
        p[b * m2:(b + 1) * m2, b] = 1.0 / m2
    return p


# ----------------------------------------------------------------------------
# The single fused Pallas kernel (B_TILE samples per grid step).
# ----------------------------------------------------------------------------
def _resnet_tail_kernel(
        x_ref, mk1_ref, mk2_ref, sbd_ref, pool_ref,
        w12_ref, w13_ref, w14_ref, w15_ref, w16_ref, w17_ref, w18_ref,
        w19_ref, wrc_ref, bs1_ref, bs2_ref, wh_ref, bh_ref,
        o_ref,
        patch1_ref, patch2_ref,
        *, w_img1, w_img2):

    def conv3x3(act, mk_ref, patch_ref, w_ref, bias, w_img,
                residual=None, relu=True):
        # Build patches [9*Cin, L] via lane rolls (XLU) + boundary masks,
        # then ONE fused channel-mix matmul with K = 9*Cin (bf16 MXU,
        # f32 accumulation).
        cin = act.shape[0]
        lanes = act.shape[-1]
        for dy in range(3):
            for dx in range(3):
                t = 3 * dy + dx
                off = (dy - 1) * w_img + (dx - 1)
                if off == 0:                       # center tap: no shift/mask
                    piece = act
                else:
                    piece = pltpu.roll(act, (-off) % lanes, 1)
                    piece = piece * mk_ref[t]
                patch_ref[t * cin:(t + 1) * cin, :] = piece
        acc = jnp.dot(w_ref[...], patch_ref[...].astype(jnp.bfloat16),
                      preferred_element_type=jnp.float32)
        acc = acc + bias
        if residual is not None:
            acc = acc + residual
        if relu:
            acc = jnp.maximum(acc, 0.0)
        return acc

    x = x_ref[0]                                   # [C1, B*M1], f32
    # TODO(synk): fq11..fq19 / fqr2 fake-quant stubs treated as identity.

    # --- block: conv12 / conv13 (identity shortcut) ---
    out = conv3x3(x, mk1_ref, patch1_ref, w12_ref, bs1_ref[:, 0:1], w_img1)
    out = conv3x3(out, mk1_ref, patch1_ref, w13_ref, bs1_ref[:, 1:2], w_img1,
                  residual=x)

    # --- block: conv14 (stride-2) / conv15, resconv2 shortcut ---
    res = out
    full14 = conv3x3(res, mk1_ref, patch1_ref, w14_ref, bs2_ref[:, 0:1],
                     w_img1)                        # stride-1 result, [C2, B*M1]
    sbd = sbd_ref[...]
    out = jnp.dot(full14.astype(jnp.bfloat16), sbd,
                  preferred_element_type=jnp.float32)       # [C2, B*M2]
    r2 = jnp.dot(res.astype(jnp.bfloat16), sbd,
                 preferred_element_type=jnp.float32)        # [C1, B*M2]
    r2 = jnp.dot(wrc_ref[...], r2.astype(jnp.bfloat16),
                 preferred_element_type=jnp.float32)        # [C2, B*M2]
    out = conv3x3(out, mk2_ref, patch2_ref, w15_ref, bs2_ref[:, 1:2], w_img2,
                  residual=r2)

    # --- block: conv16 / conv17 (identity shortcut) ---
    res = out
    out = conv3x3(out, mk2_ref, patch2_ref, w16_ref, bs2_ref[:, 2:3], w_img2)
    out = conv3x3(out, mk2_ref, patch2_ref, w17_ref, bs2_ref[:, 3:4], w_img2,
                  residual=res)

    # --- block: conv18 / conv19 (identity shortcut) ---
    res = out
    out = conv3x3(out, mk2_ref, patch2_ref, w18_ref, bs2_ref[:, 4:5], w_img2)
    out = conv3x3(out, mk2_ref, patch2_ref, w19_ref, bs2_ref[:, 5:6], w_img2,
                  residual=res)

    # --- head: per-sample avgpool (as matmul) + folded bn20/fc/bn21 + LSM ---
    pooled = jnp.dot(out, pool_ref[...],
                     preferred_element_type=jnp.float32)    # [C2, B]
    z = jnp.dot(wh_ref[...], pooled,
                preferred_element_type=jnp.float32) + bh_ref[...]  # [NC, B]
    # log-softmax strictly over the class axis (axis 0), per sample column.
    m = jnp.max(z, axis=0, keepdims=True)
    zz = z - m
    lse = jnp.log(jnp.sum(jnp.exp(zz), axis=0, keepdims=True))
    o_ref[0] = zz - lse


# ----------------------------------------------------------------------------
# Folding helpers and the fused-forward wrapper.
# ----------------------------------------------------------------------------
def bn_fold(gamma, beta, mean, var, eps=1e-5):
    scale = gamma / jnp.sqrt(var + eps)
    bias = beta - mean * scale
    return scale, bias


def _fold_conv3x3(w, bn):
    """[Cout,Cin,3,3] conv + BN -> (W_fold [Cout, 9*Cin] bf16, bias [Cout])."""
    s, b = bn
    cout, cin = w.shape[0], w.shape[1]
    wt = w * s[:, None, None, None]
    wfold = jnp.transpose(wt, (0, 2, 3, 1)).reshape(cout, 9 * cin)
    return wfold.astype(jnp.bfloat16), b


def resnet_tail_forward(x_nchw, p, *, b_tile=2):
    n, c1, h, w = x_nchw.shape
    assert n % b_tile == 0, "batch must be a multiple of b_tile"
    h2, w2 = h // 2, w // 2
    m1, m2 = h * w, h2 * w2
    n_steps = n // b_tile
    c2 = p["conv14"].shape[0]

    # Batch-merged lane layout: [n_steps, C1, B_TILE*M1].
    x = x_nchw.astype(jnp.float32).reshape(n_steps, b_tile, c1, m1)
    x = jnp.transpose(x, (0, 2, 1, 3)).reshape(n_steps, c1, b_tile * m1)

    # Trace-time numpy constants (small: masks + one subsample + pool matrix).
    mk1 = jnp.asarray(make_tap_masks(h, w, b_tile))
    mk2 = jnp.asarray(make_tap_masks(h2, w2, b_tile))
    sbd = jnp.asarray(make_subsample_bd(h, w, b_tile)).astype(jnp.bfloat16)
    pool = jnp.asarray(make_pool_mat(m2, b_tile))

    # Fold BN into conv weights (bf16) and pack biases per stage.
    w12, b12 = _fold_conv3x3(p["conv12"], p["bn12"])
    w13, b13 = _fold_conv3x3(p["conv13"], p["bn13"])
    w14, b14 = _fold_conv3x3(p["conv14"], p["bn14"])
    w15, b15 = _fold_conv3x3(p["conv15"], p["bn15"])
    w16, b16 = _fold_conv3x3(p["conv16"], p["bn16"])
    w17, b17 = _fold_conv3x3(p["conv17"], p["bn17"])
    w18, b18 = _fold_conv3x3(p["conv18"], p["bn18"])
    w19, b19 = _fold_conv3x3(p["conv19"], p["bn19"])
    wrc = p["resconv2"].reshape(c2, c1).astype(jnp.bfloat16)
    bs1 = jnp.stack([b12, b13], axis=1)                       # [C1, 2]
    bs2 = jnp.stack([b14, b15, b16, b17, b18, b19], axis=1)   # [C2, 6]

    # Fold bn20 + fc + bn21 into a single affine head (f32, tiny).
    s20, b20 = p["bn20"]
    s21, b21 = p["bn21"]
    fc_w, fc_b = p["fc_w"], p["fc_b"]
    nc = fc_w.shape[0]
    whead = fc_w * s21[:, None] * s20[None, :]                 # [NC, C2]
    bhead = (s21 * (fc_w @ b20 + fc_b) + b21).reshape(nc, 1)   # [NC, 1]

    weights = [mk1, mk2, sbd, pool,
               w12, w13, w14, w15, w16, w17, w18, w19,
               wrc, bs1, bs2, whead, bhead]

    def rep_spec(a):
        nd = a.ndim
        return pl.BlockSpec(a.shape, lambda i, _nd=nd: (0,) * _nd)

    kernel = functools.partial(_resnet_tail_kernel, w_img1=w, w_img2=w2)

    out = pl.pallas_call(
        kernel,
        out_shape=jax.ShapeDtypeStruct((n_steps, nc, b_tile), jnp.float32),
        grid=(n_steps,),
        in_specs=[pl.BlockSpec((1, c1, b_tile * m1), lambda i: (i, 0, 0))]
                 + [rep_spec(a) for a in weights],
        out_specs=pl.BlockSpec((1, nc, b_tile), lambda i: (i, 0, 0)),
        scratch_shapes=[pltpu.VMEM((9 * c1, b_tile * m1), jnp.float32),
                        pltpu.VMEM((9 * c2, b_tile * m2), jnp.float32)],
        compiler_params=pltpu.CompilerParams(
            dimension_semantics=("parallel",),
            vmem_limit_bytes=32 * 1024 * 1024),
    )(x, *weights)

    # [n_steps, NC, B_TILE] -> [N, NC]  (layout plumbing in the wrapper).
    return jnp.transpose(out, (0, 2, 1)).reshape(n, nc)


# ----------------------------------------------------------------------------
# Pure-JAX reference (in-script correctness check).
# ----------------------------------------------------------------------------
def reference_forward(x, p):
    hp = jax.lax.Precision.HIGHEST

    def conv_bn(hh, wgt, bn, stride=1, residual=None, relu=True):
        s, b = bn
        y = jax.lax.conv_general_dilated(
            hh, wgt, (stride, stride), ((1, 1), (1, 1)),
            dimension_numbers=("NCHW", "OIHW", "NCHW"), precision=hp)
        y = y * s[None, :, None, None] + b[None, :, None, None]
        if residual is not None:
            y = y + residual
        if relu:
            y = jnp.maximum(y, 0.0)
        return y

    out = conv_bn(x, p["conv12"], p["bn12"])
    out = conv_bn(out, p["conv13"], p["bn13"], residual=x)
    res = out
    out = conv_bn(out, p["conv14"], p["bn14"], stride=2)
    r2 = jax.lax.conv_general_dilated(
        res, p["resconv2"], (2, 2), ((0, 0), (0, 0)),
        dimension_numbers=("NCHW", "OIHW", "NCHW"), precision=hp)
    out = conv_bn(out, p["conv15"], p["bn15"], residual=r2)
    res = out
    out = conv_bn(out, p["conv16"], p["bn16"])
    out = conv_bn(out, p["conv17"], p["bn17"], residual=res)
    res = out
    out = conv_bn(out, p["conv18"], p["bn18"])
    out = conv_bn(out, p["conv19"], p["bn19"], residual=res)

    pooled = jnp.mean(out, axis=(2, 3))
    s20, b20 = p["bn20"]
    s21, b21 = p["bn21"]
    hvec = pooled * s20 + b20
    y = jnp.dot(hvec, p["fc_w"].T, precision=hp) + p["fc_b"]
    y = y * s21 + b21
    return jax.nn.log_softmax(y, axis=-1)


# ----------------------------------------------------------------------------
# Deterministic synthetic parameters.
# ----------------------------------------------------------------------------
def make_params(key, c1, c2, num_classes):
    p = {}
    ks = iter(jax.random.split(key, 64))

    def conv(shape):
        return 0.1 * jax.random.normal(next(ks), shape, jnp.float32)

    def bn(c):
        g = 1.0 + 0.1 * jax.random.normal(next(ks), (c,), jnp.float32)
        b = 0.1 * jax.random.normal(next(ks), (c,), jnp.float32)
        m = 0.05 * jax.random.normal(next(ks), (c,), jnp.float32)
        v = jnp.abs(1.0 + 0.1 * jax.random.normal(next(ks), (c,), jnp.float32))
        return bn_fold(g, b, m, v)

    p["conv12"], p["bn12"] = conv((c1, c1, 3, 3)), bn(c1)
    p["conv13"], p["bn13"] = conv((c1, c1, 3, 3)), bn(c1)
    p["conv14"], p["bn14"] = conv((c2, c1, 3, 3)), bn(c2)
    p["conv15"], p["bn15"] = conv((c2, c2, 3, 3)), bn(c2)
    p["resconv2"] = conv((c2, c1, 1, 1))
    p["conv16"], p["bn16"] = conv((c2, c2, 3, 3)), bn(c2)
    p["conv17"], p["bn17"] = conv((c2, c2, 3, 3)), bn(c2)
    p["conv18"], p["bn18"] = conv((c2, c2, 3, 3)), bn(c2)
    p["conv19"], p["bn19"] = conv((c2, c2, 3, 3)), bn(c2)
    p["bn20"] = bn(c2)
    p["fc_w"] = conv((num_classes, c2))
    p["fc_b"] = 0.1 * jax.random.normal(next(ks), (num_classes,), jnp.float32)
    p["bn21"] = bn(num_classes)
    return p


if __name__ == "__main__":
    # Scaled-down shapes consistent with the ResNet-20 tail segment
    # (real segment: 32ch@16x16 -> 64ch@8x8; here C1=8, C2=16).
    N, C1, H, W = 2, 8, 16, 16
    C2, NUM_CLASSES = 16, 10

    key = jax.random.PRNGKey(0)
    kx, kp = jax.random.split(key)
    x = jax.random.normal(kx, (N, C1, H, W), jnp.float32)   # NCHW like PyTorch
    params = make_params(kp, C1, C2, NUM_CLASSES)

    fwd = jax.jit(lambda xx: resnet_tail_forward(xx, params, b_tile=2))
    logp = jax.block_until_ready(fwd(x))

    ref_fn = jax.jit(lambda xx: reference_forward(xx, params))
    ref = jax.block_until_ready(ref_fn(x))

    assert logp.shape == (N, NUM_CLASSES)
    assert bool(jnp.all(jnp.isfinite(logp)))
    # log-softmax rows must (approximately) exp-sum to 1
    assert bool(jnp.all(jnp.abs(jnp.sum(jnp.exp(logp), axis=-1) - 1.0) < 1e-3))
    # match the pure-JAX f32 reference forward (bf16 weights, f32 accumulation)
    assert bool(jnp.allclose(logp, ref, rtol=0.0, atol=5e-2))
    print("KERNEL_OK")
</pallas_src>

<mosaic_0001>
module attributes {stable_mosaic.version = 11 : i64} {
  func.func @_resnet_tail_kernel(%arg0: i32, %arg1: memref<1x8x512xf32, #tpu.memory_space<vmem>>, %arg2: memref<9x1x512xf32, #tpu.memory_space<vmem>>, %arg3: memref<9x1x128xf32, #tpu.memory_space<vmem>>, %arg4: memref<512x128xbf16, #tpu.memory_space<vmem>>, %arg5: memref<128x2xf32, #tpu.memory_space<vmem>>, %arg6: memref<8x72xbf16, #tpu.memory_space<vmem>>, %arg7: memref<8x72xbf16, #tpu.memory_space<vmem>>, %arg8: memref<16x72xbf16, #tpu.memory_space<vmem>>, %arg9: memref<16x144xbf16, #tpu.memory_space<vmem>>, %arg10: memref<16x144xbf16, #tpu.memory_space<vmem>>, %arg11: memref<16x144xbf16, #tpu.memory_space<vmem>>, %arg12: memref<16x144xbf16, #tpu.memory_space<vmem>>, %arg13: memref<16x144xbf16, #tpu.memory_space<vmem>>, %arg14: memref<16x8xbf16, #tpu.memory_space<vmem>>, %arg15: memref<8x2xf32, #tpu.memory_space<vmem>>, %arg16: memref<16x6xf32, #tpu.memory_space<vmem>>, %arg17: memref<10x16xf32, #tpu.memory_space<vmem>>, %arg18: memref<10x1xf32, #tpu.memory_space<vmem>>, %arg19: memref<1x10x2xf32, #tpu.memory_space<vmem>>, %arg20: memref<72x512xf32, #tpu.memory_space<vmem>>, %arg21: memref<144x128xf32, #tpu.memory_space<vmem>>) attributes {dimension_semantics = [#tpu.dimension_semantics<parallel>], iteration_bounds = array<i64: 1>, scalar_prefetch = 0 : i64, scratch_operands = 2 : i64, tpu.core_type = #tpu.core_type<tc>, window_params = [{transform_indices = @transform_0, window_bounds = array<i64: 1, 8, 512>}, {pipeline_mode = #tpu.pipeline_mode<synchronous>, transform_indices = @transform_1, window_bounds = array<i64: 9, 1, 512>}, {pipeline_mode = #tpu.pipeline_mode<synchronous>, transform_indices = @transform_2, window_bounds = array<i64: 9, 1, 128>}, {pipeline_mode = #tpu.pipeline_mode<synchronous>, transform_indices = @transform_3, window_bounds = array<i64: 512, 128>}, {pipeline_mode = #tpu.pipeline_mode<synchronous>, transform_indices = @transform_4, window_bounds = array<i64: 128, 2>}, {pipeline_mode = #tpu.pipeline_mode<synchronous>, transform_indices = @transform_5, window_bounds = array<i64: 8, 72>}, {pipeline_mode = #tpu.pipeline_mode<synchronous>, transform_indices = @transform_6, window_bounds = array<i64: 8, 72>}, {pipeline_mode = #tpu.pipeline_mode<synchronous>, transform_indices = @transform_7, window_bounds = array<i64: 16, 72>}, {pipeline_mode = #tpu.pipeline_mode<synchronous>, transform_indices = @transform_8, window_bounds = array<i64: 16, 144>}, {pipeline_mode = #tpu.pipeline_mode<synchronous>, transform_indices = @transform_9, window_bounds = array<i64: 16, 144>}, {pipeline_mode = #tpu.pipeline_mode<synchronous>, transform_indices = @transform_10, window_bounds = array<i64: 16, 144>}, {pipeline_mode = #tpu.pipeline_mode<synchronous>, transform_indices = @transform_11, window_bounds = array<i64: 16, 144>}, {pipeline_mode = #tpu.pipeline_mode<synchronous>, transform_indices = @transform_12, window_bounds = array<i64: 16, 144>}, {pipeline_mode = #tpu.pipeline_mode<synchronous>, transform_indices = @transform_13, window_bounds = array<i64: 16, 8>}, {pipeline_mode = #tpu.pipeline_mode<synchronous>, transform_indices = @transform_14, window_bounds = array<i64: 8, 2>}, {pipeline_mode = #tpu.pipeline_mode<synchronous>, transform_indices = @transform_15, window_bounds = array<i64: 16, 6>}, {pipeline_mode = #tpu.pipeline_mode<synchronous>, transform_indices = @transform_16, window_bounds = array<i64: 10, 16>}, {pipeline_mode = #tpu.pipeline_mode<synchronous>, transform_indices = @transform_17, window_bounds = array<i64: 10, 1>}, {transform_indices = @transform_18, window_bounds = array<i64: 1, 10, 2>}]} {
    %c0 = arith.constant 0 : index
    %c0_0 = arith.constant 0 : index
    %c0_1 = arith.constant 0 : index
    %0 = vector.load %arg1[%c0, %c0_0, %c0_1] : memref<1x8x512xf32, #tpu.memory_space<vmem>>, vector<1x8x512xf32>
    %1 = vector.shape_cast %0 : vector<1x8x512xf32> to vector<8x512xf32>
    %c0_2 = arith.constant 0 : index
    %c0_3 = arith.constant 0 : index
    %2 = vector.load %arg15[%c0_2, %c0_3] : memref<8x2xf32, #tpu.memory_space<vmem>>, vector<8x1xf32>
    %c17_i32 = arith.constant 17 : i32
    %3 = tpu.dynamic_rotate %1 by %c17_i32 dim 1 : vector<8x512xf32>, i32 -> vector<8x512xf32>
    %c0_4 = arith.constant 0 : index
    %c0_5 = arith.constant 0 : index
    %c0_6 = arith.constant 0 : index
    %4 = vector.load %arg2[%c0_4, %c0_5, %c0_6] : memref<9x1x512xf32, #tpu.memory_space<vmem>>, vector<1x1x512xf32>
    %5 = vector.shape_cast %4 : vector<1x1x512xf32> to vector<1x512xf32>
    %6 = vector.broadcast %5 : vector<1x512xf32> to vector<8x512xf32>
    %7 = arith.mulf %3, %6 : vector<8x512xf32>
    %c0_7 = arith.constant 0 : index
    %c0_8 = arith.constant 0 : index
    %8 = vector.load %arg20[%c0_7, %c0_8] : memref<72x512xf32, #tpu.memory_space<vmem>>, vector<8x512xf32>
    tpu.vector_store %arg20[%c0_7, %c0_8], %7 {strides = array<i32>} : memref<72x512xf32, #tpu.memory_space<vmem>>, vector<8x512xf32>,
    %c16_i32 = arith.constant 16 : i32
    %9 = tpu.dynamic_rotate %1 by %c16_i32 dim 1 : vector<8x512xf32>, i32 -> vector<8x512xf32>
    %c1 = arith.constant 1 : index
    %c0_9 = arith.constant 0 : index
    %c0_10 = arith.constant 0 : index
    %10 = vector.load %arg2[%c1, %c0_9, %c0_10] : memref<9x1x512xf32, #tpu.memory_space<vmem>>, vector<1x1x512xf32>
    %11 = vector.shape_cast %10 : vector<1x1x512xf32> to vector<1x512xf32>
    %12 = vector.broadcast %11 : vector<1x512xf32> to vector<8x512xf32>
    %13 = arith.mulf %9, %12 : vector<8x512xf32>
    %c8 = arith.constant 8 : index
    %c0_11 = arith.constant 0 : index
    %14 = vector.load %arg20[%c8, %c0_11] : memref<72x512xf32, #tpu.memory_space<vmem>>, vector<8x512xf32>
    tpu.vector_store %arg20[%c8, %c0_11], %13 {strides = array<i32>} : memref<72x512xf32, #tpu.memory_space<vmem>>, vector<8x512xf32>,
    %c15_i32 = arith.constant 15 : i32
    %15 = tpu.dynamic_rotate %1 by %c15_i32 dim 1 : vector<8x512xf32>, i32 -> vector<8x512xf32>
    %c2 = arith.constant 2 : index
    %c0_12 = arith.constant 0 : index
    %c0_13 = arith.constant 0 : index
    %16 = vector.load %arg2[%c2, %c0_12, %c0_13] : memref<9x1x512xf32, #tpu.memory_space<vmem>>, vector<1x1x512xf32>
    %17 = vector.shape_cast %16 : vector<1x1x512xf32> to vector<1x512xf32>
    %18 = vector.broadcast %17 : vector<1x512xf32> to vector<8x512xf32>
    %19 = arith.mulf %15, %18 : vector<8x512xf32>
    %c16 = arith.constant 16 : index
    %c0_14 = arith.constant 0 : index
    %20 = vector.load %arg20[%c16, %c0_14] : memref<72x512xf32, #tpu.memory_space<vmem>>, vector<8x512xf32>
    tpu.vector_store %arg20[%c16, %c0_14], %19 {strides = array<i32>} : memref<72x512xf32, #tpu.memory_space<vmem>>, vector<8x512xf32>,
    %c1_i32 = arith.constant 1 : i32
    %21 = tpu.dynamic_rotate %1 by %c1_i32 dim 1 : vector<8x512xf32>, i32 -> vector<8x512xf32>
    %c3 = arith.constant 3 : index
    %c0_15 = arith.constant 0 : index
    %c0_16 = arith.constant 0 : index
    %22 = vector.load %arg2[%c3, %c0_15, %c0_16] : memref<9x1x512xf32, #tpu.memory_space<vmem>>, vector<1x1x512xf32>
    %23 = vector.shape_cast %22 : vector<1x1x512xf32> to vector<1x512xf32>
    %24 = vector.broadcast %23 : vector<1x512xf32> to vector<8x512xf32>
    %25 = arith.mulf %21, %24 : vector<8x512xf32>
    %c24 = arith.constant 24 : index
    %c0_17 = arith.constant 0 : index
    %26 = vector.load %arg20[%c24, %c0_17] : memref<72x512xf32, #tpu.memory_space<vmem>>, vector<8x512xf32>
    tpu.vector_store %arg20[%c24, %c0_17], %25 {strides = array<i32>} : memref<72x512xf32, #tpu.memory_space<vmem>>, vector<8x512xf32>,
    %c32 = arith.constant 32 : index
    %c0_18 = arith.constant 0 : index
    %27 = vector.load %arg20[%c32, %c0_18] : memref<72x512xf32, #tpu.memory_space<vmem>>, vector<8x512xf32>
    tpu.vector_store %arg20[%c32, %c0_18], %1 {strides = array<i32>} : memref<72x512xf32, #tpu.memory_space<vmem>>, vector<8x512xf32>,
    %c511_i32 = arith.constant 511 : i32
    %28 = tpu.dynamic_rotate %1 by %c511_i32 dim 1 : vector<8x512xf32>, i32 -> vector<8x512xf32>
    %c5 = arith.constant 5 : index
    %c0_19 = arith.constant 0 : index
    %c0_20 = arith.constant 0 : index
    %29 = vector.load %arg2[%c5, %c0_19, %c0_20] : memref<9x1x512xf32, #tpu.memory_space<vmem>>, vector<1x1x512xf32>
    %30 = vector.shape_cast %29 : vector<1x1x512xf32> to vector<1x512xf32>
    %31 = vector.broadcast %30 : vector<1x512xf32> to vector<8x512xf32>
    %32 = arith.mulf %28, %31 : vector<8x512xf32>
    %c40 = arith.constant 40 : index
    %c0_21 = arith.constant 0 : index
    %33 = vector.load %arg20[%c40, %c0_21] : memref<72x512xf32, #tpu.memory_space<vmem>>, vector<8x512xf32>
    tpu.vector_store %arg20[%c40, %c0_21], %32 {strides = array<i32>} : memref<72x512xf32, #tpu.memory_space<vmem>>, vector<8x512xf32>,
    %c497_i32 = arith.constant 497 : i32
    %34 = tpu.dynamic_rotate %1 by %c497_i32 dim 1 : vector<8x512xf32>, i32 -> vector<8x512xf32>
    %c6 = arith.constant 6 : index
    %c0_22 = arith.constant 0 : index
    %c0_23 = arith.constant 0 : index
    %35 = vector.load %arg2[%c6, %c0_22, %c0_23] : memref<9x1x512xf32, #tpu.memory_space<vmem>>, vector<1x1x512xf32>
    %36 = vector.shape_cast %35 : vector<1x1x512xf32> to vector<1x512xf32>
    %37 = vector.broadcast %36 : vector<1x512xf32> to vector<8x512xf32>
    %38 = arith.mulf %34, %37 : vector<8x512xf32>
    %c48 = arith.constant 48 : index
    %c0_24 = arith.constant 0 : index
    %39 = vector.load %arg20[%c48, %c0_24] : memref<72x512xf32, #tpu.memory_space<vmem>>, vector<8x512xf32>
    tpu.vector_store %arg20[%c48, %c0_24], %38 {strides = array<i32>} : memref<72x512xf32, #tpu.memory_space<vmem>>, vector<8x512xf32>,
    %c496_i32 = arith.constant 496 : i32
    %40 = tpu.dynamic_rotate %1 by %c496_i32 dim 1 : vector<8x512xf32>, i32 -> vector<8x512xf32>
    %c7 = arith.constant 7 : index
    %c0_25 = arith.constant 0 : index
    %c0_26 = arith.constant 0 : index
    %41 = vector.load %arg2[%c7, %c0_25, %c0_26] : memref<9x1x512xf32, #tpu.memory_space<vmem>>, vector<1x1x512xf32>
    %42 = vector.shape_cast %41 : vector<1x1x512xf32> to vector<1x512xf32>
    %43 = vector.broadcast %42 : vector<1x512xf32> to vector<8x512xf32>
    %44 = arith.mulf %40, %43 : vector<8x512xf32>
    %c56 = arith.constant 56 : index
    %c0_27 = arith.constant 0 : index
    %45 = vector.load %arg20[%c56, %c0_27] : memref<72x512xf32, #tpu.memory_space<vmem>>, vector<8x512xf32>
    tpu.vector_store %arg20[%c56, %c0_27], %44 {strides = array<i32>} : memref<72x512xf32, #tpu.memory_space<vmem>>, vector<8x512xf32>,
    %c495_i32 = arith.constant 495 : i32
    %46 = tpu.dynamic_rotate %1 by %c495_i32 dim 1 : vector<8x512xf32>, i32 -> vector<8x512xf32>
    %c8_28 = arith.constant 8 : index
    %c0_29 = arith.constant 0 : index
    %c0_30 = arith.constant 0 : index
    %47 = vector.load %arg2[%c8_28, %c0_29, %c0_30] : memref<9x1x512xf32, #tpu.memory_space<vmem>>, vector<1x1x512xf32>
    %48 = vector.shape_cast %47 : vector<1x1x512xf32> to vector<1x512xf32>
    %49 = vector.broadcast %48 : vector<1x512xf32> to vector<8x512xf32>
    %50 = arith.mulf %46, %49 : vector<8x512xf32>
    %c64 = arith.constant 64 : index
    %c0_31 = arith.constant 0 : index
    %51 = vector.load %arg20[%c64, %c0_31] : memref<72x512xf32, #tpu.memory_space<vmem>>, vector<8x512xf32>
    tpu.vector_store %arg20[%c64, %c0_31], %50 {strides = array<i32>} : memref<72x512xf32, #tpu.memory_space<vmem>>, vector<8x512xf32>,
    %c0_32 = arith.constant 0 : index
    %c0_33 = arith.constant 0 : index
    %52 = vector.load %arg6[%c0_32, %c0_33] : memref<8x72xbf16, #tpu.memory_space<vmem>>, vector<8x72xbf16>
    %c0_34 = arith.constant 0 : index
    %c0_35 = arith.constant 0 : index
    %53 = vector.load %arg20[%c0_34, %c0_35] : memref<72x512xf32, #tpu.memory_space<vmem>>, vector<72x512xf32>
    %54 = arith.truncf %53 : vector<72x512xf32> to vector<72x512xbf16>
    %cst = arith.constant dense<0.000000e+00> : vector<8x512xf32>
    %55 = tpu.matmul %52, %54, %cst {dimension_numbers = #tpu.dot_dimension_numbers<[1], [0], [0], [1], [0, 0, 1, 1], [], []>} : vector<8x72xbf16>, vector<72x512xbf16>, vector<8x512xf32> -> vector<8x512xf32>
    %56 = vector.broadcast %2 : vector<8x1xf32> to vector<8x512xf32>
    %57 = arith.addf %55, %56 : vector<8x512xf32>
    %cst_36 = arith.constant 0.000000e+00 : f32
    %58 = vector.broadcast %cst_36 : f32 to vector<8x512xf32>
    %59 = arith.maximumf %57, %58 : vector<8x512xf32>
    %c0_37 = arith.constant 0 : index
    %c1_38 = arith.constant 1 : index
    %60 = vector.load %arg15[%c0_37, %c1_38] : memref<8x2xf32, #tpu.memory_space<vmem>>, vector<8x1xf32>
    %c17_i32_39 = arith.constant 17 : i32
    %61 = tpu.dynamic_rotate %59 by %c17_i32_39 dim 1 : vector<8x512xf32>, i32 -> vector<8x512xf32>
    %c0_40 = arith.constant 0 : index
    %c0_41 = arith.constant 0 : index
    %c0_42 = arith.constant 0 : index
    %62 = vector.load %arg2[%c0_40, %c0_41, %c0_42] : memref<9x1x512xf32, #tpu.memory_space<vmem>>, vector<1x1x512xf32>
    %63 = vector.shape_cast %62 : vector<1x1x512xf32> to vector<1x512xf32>
    %64 = vector.broadcast %63 : vector<1x512xf32> to vector<8x512xf32>
    %65 = arith.mulf %61, %64 : vector<8x512xf32>
    %c0_43 = arith.constant 0 : index
    %c0_44 = arith.constant 0 : index
    %66 = vector.load %arg20[%c0_43, %c0_44] : memref<72x512xf32, #tpu.memory_space<vmem>>, vector<8x512xf32>
    tpu.vector_store %arg20[%c0_43, %c0_44], %65 {strides = array<i32>} : memref<72x512xf32, #tpu.memory_space<vmem>>, vector<8x512xf32>,
    %c16_i32_45 = arith.constant 16 : i32
    %67 = tpu.dynamic_rotate %59 by %c16_i32_45 dim 1 : vector<8x512xf32>, i32 -> vector<8x512xf32>
    %c1_46 = arith.constant 1 : index
    %c0_47 = arith.constant 0 : index
    %c0_48 = arith.constant 0 : index
    %68 = vector.load %arg2[%c1_46, %c0_47, %c0_48] : memref<9x1x512xf32, #tpu.memory_space<vmem>>, vector<1x1x512xf32>
    %69 = vector.shape_cast %68 : vector<1x1x512xf32> to vector<1x512xf32>
    %70 = vector.broadcast %69 : vector<1x512xf32> to vector<8x512xf32>
    %71 = arith.mulf %67, %70 : vector<8x512xf32>
    %c8_49 = arith.constant 8 : index
    %c0_50 = arith.constant 0 : index
    %72 = vector.load %arg20[%c8_49, %c0_50] : memref<72x512xf32, #tpu.memory_space<vmem>>, vector<8x512xf32>
    tpu.vector_store %arg20[%c8_49, %c0_50], %71 {strides = array<i32>} : memref<72x512xf32, #tpu.memory_space<vmem>>, vector<8x512xf32>,
    %c15_i32_51 = arith.constant 15 : i32
    %73 = tpu.dynamic_rotate %59 by %c15_i32_51 dim 1 : vector<8x512xf32>, i32 -> vector<8x512xf32>
    %c2_52 = arith.constant 2 : index
    %c0_53 = arith.constant 0 : index
    %c0_54 = arith.constant 0 : index
    %74 = vector.load %arg2[%c2_52, %c0_53, %c0_54] : memref<9x1x512xf32, #tpu.memory_space<vmem>>, vector<1x1x512xf32>
    %75 = vector.shape_cast %74 : vector<1x1x512xf32> to vector<1x512xf32>
    %76 = vector.broadcast %75 : vector<1x512xf32> to vector<8x512xf32>
    %77 = arith.mulf %73, %76 : vector<8x512xf32>
    %c16_55 = arith.constant 16 : index
    %c0_56 = arith.constant 0 : index
    %78 = vector.load %arg20[%c16_55, %c0_56] : memref<72x512xf32, #tpu.memory_space<vmem>>, vector<8x512xf32>
    tpu.vector_store %arg20[%c16_55, %c0_56], %77 {strides = array<i32>} : memref<72x512xf32, #tpu.memory_space<vmem>>, vector<8x512xf32>,
    %c1_i32_57 = arith.constant 1 : i32
    %79 = tpu.dynamic_rotate %59 by %c1_i32_57 dim 1 : vector<8x512xf32>, i32 -> vector<8x512xf32>
    %c3_58 = arith.constant 3 : index
    %c0_59 = arith.constant 0 : index
    %c0_60 = arith.constant 0 : index
    %80 = vector.load %arg2[%c3_58, %c0_59, %c0_60] : memref<9x1x512xf32, #tpu.memory_space<vmem>>, vector<1x1x512xf32>
    %81 = vector.shape_cast %80 : vector<1x1x512xf32> to vector<1x512xf32>
    %82 = vector.broadcast %81 : vector<1x512xf32> to vector<8x512xf32>
    %83 = arith.mulf %79, %82 : vector<8x512xf32>
    %c24_61 = arith.constant 24 : index
    %c0_62 = arith.constant 0 : index
    %84 = vector.load %arg20[%c24_61, %c0_62] : memref<72x512xf32, #tpu.memory_space<vmem>>, vector<8x512xf32>
    tpu.vector_store %arg20[%c24_61, %c0_62], %83 {strides = array<i32>} : memref<72x512xf32, #tpu.memory_space<vmem>>, vector<8x512xf32>,
    %c32_63 = arith.constant 32 : index
    %c0_64 = arith.constant 0 : index
    %85 = vector.load %arg20[%c32_63, %c0_64] : memref<72x512xf32, #tpu.memory_space<vmem>>, vector<8x512xf32>
    tpu.vector_store %arg20[%c32_63, %c0_64], %59 {strides = array<i32>} : memref<72x512xf32, #tpu.memory_space<vmem>>, vector<8x512xf32>,
    %c511_i32_65 = arith.constant 511 : i32
    %86 = tpu.dynamic_rotate %59 by %c511_i32_65 dim 1 : vector<8x512xf32>, i32 -> vector<8x512xf32>
    %c5_66 = arith.constant 5 : index
    %c0_67 = arith.constant 0 : index
    %c0_68 = arith.constant 0 : index
    %87 = vector.load %arg2[%c5_66, %c0_67, %c0_68] : memref<9x1x512xf32, #tpu.memory_space<vmem>>, vector<1x1x512xf32>
    %88 = vector.shape_cast %87 : vector<1x1x512xf32> to vector<1x512xf32>
    %89 = vector.broadcast %88 : vector<1x512xf32> to vector<8x512xf32>
    %90 = arith.mulf %86, %89 : vector<8x512xf32>
    %c40_69 = arith.constant 40 : index
    %c0_70 = arith.constant 0 : index
    %91 = vector.load %arg20[%c40_69, %c0_70] : memref<72x512xf32, #tpu.memory_space<vmem>>, vector<8x512xf32>
    tpu.vector_store %arg20[%c40_69, %c0_70], %90 {strides = array<i32>} : memref<72x512xf32, #tpu.memory_space<vmem>>, vector<8x512xf32>,
    %c497_i32_71 = arith.constant 497 : i32
    %92 = tpu.dynamic_rotate %59 by %c497_i32_71 dim 1 : vector<8x512xf32>, i32 -> vector<8x512xf32>
    %c6_72 = arith.constant 6 : index
    %c0_73 = arith.constant 0 : index
    %c0_74 = arith.constant 0 : index
    %93 = vector.load %arg2[%c6_72, %c0_73, %c0_74] : memref<9x1x512xf32, #tpu.memory_space<vmem>>, vector<1x1x512xf32>
    %94 = vector.shape_cast %93 : vector<1x1x512xf32> to vector<1x512xf32>
    %95 = vector.broadcast %94 : vector<1x512xf32> to vector<8x512xf32>
    %96 = arith.mulf %92, %95 : vector<8x512xf32>
    %c48_75 = arith.constant 48 : index
    %c0_76 = arith.constant 0 : index
    %97 = vector.load %arg20[%c48_75, %c0_76] : memref<72x512xf32, #tpu.memory_space<vmem>>, vector<8x512xf32>
    tpu.vector_store %arg20[%c48_75, %c0_76], %96 {strides = array<i32>} : memref<72x512xf32, #tpu.memory_space<vmem>>, vector<8x512xf32>,
    %c496_i32_77 = arith.constant 496 : i32
    %98 = tpu.dynamic_rotate %59 by %c496_i32_77 dim 1 : vector<8x512xf32>, i32 -> vector<8x512xf32>
    %c7_78 = arith.constant 7 : index
    %c0_79 = arith.constant 0 : index
    %c0_80 = arith.constant 0 : index
    %99 = vector.load %arg2[%c7_78, %c0_79, %c0_80] : memref<9x1x512xf32, #tpu.memory_space<vmem>>, vector<1x1x512xf32>
    %100 = vector.shape_cast %99 : vector<1x1x512xf32> to vector<1x512xf32>
    %101 = vector.broadcast %100 : vector<1x512xf32> to vector<8x512xf32>
    %102 = arith.mulf %98, %101 : vector<8x512xf32>
    %c56_81 = arith.constant 56 : index
    %c0_82 = arith.constant 0 : index
    %103 = vector.load %arg20[%c56_81, %c0_82] : memref<72x512xf32, #tpu.memory_space<vmem>>, vector<8x512xf32>
    tpu.vector_store %arg20[%c56_81, %c0_82], %102 {strides = array<i32>} : memref<72x512xf32, #tpu.memory_space<vmem>>, vector<8x512xf32>,
    %c495_i32_83 = arith.constant 495 : i32
    %104 = tpu.dynamic_rotate %59 by %c495_i32_83 dim 1 : vector<8x512xf32>, i32 -> vector<8x512xf32>
    %c8_84 = arith.constant 8 : index
    %c0_85 = arith.constant 0 : index
    %c0_86 = arith.constant 0 : index
    %105 = vector.load %arg2[%c8_84, %c0_85, %c0_86] : memref<9x1x512xf32, #tpu.memory_space<vmem>>, vector<1x1x512xf32>
    %106 = vector.shape_cast %105 : vector<1x1x512xf32> to vector<1x512xf32>
    %107 = vector.broadcast %106 : vector<1x512xf32> to vector<8x512xf32>
    %108 = arith.mulf %104, %107 : vector<8x512xf32>
    %c64_87 = arith.constant 64 : index
    %c0_88 = arith.constant 0 : index
    %109 = vector.load %arg20[%c64_87, %c0_88] : memref<72x512xf32, #tpu.memory_space<vmem>>, vector<8x512xf32>
    tpu.vector_store %arg20[%c64_87, %c0_88], %108 {strides = array<i32>} : memref<72x512xf32, #tpu.memory_space<vmem>>, vector<8x512xf32>,
    %c0_89 = arith.constant 0 : index
    %c0_90 = arith.constant 0 : index
    %110 = vector.load %arg7[%c0_89, %c0_90] : memref<8x72xbf16, #tpu.memory_space<vmem>>, vector<8x72xbf16>
    %c0_91 = arith.constant 0 : index
    %c0_92 = arith.constant 0 : index
    %111 = vector.load %arg20[%c0_91, %c0_92] : memref<72x512xf32, #tpu.memory_space<vmem>>, vector<72x512xf32>
    %112 = arith.truncf %111 : vector<72x512xf32> to vector<72x512xbf16>
    %cst_93 = arith.constant dense<0.000000e+00> : vector<8x512xf32>
    %113 = tpu.matmul %110, %112, %cst_93 {dimension_numbers = #tpu.dot_dimension_numbers<[1], [0], [0], [1], [0, 0, 1, 1], [], []>} : vector<8x72xbf16>, vector<72x512xbf16>, vector<8x512xf32> -> vector<8x512xf32>
    %114 = vector.broadcast %60 : vector<8x1xf32> to vector<8x512xf32>
    %115 = arith.addf %113, %114 : vector<8x512xf32>
    %116 = arith.addf %115, %1 : vector<8x512xf32>
    %cst_94 = arith.constant 0.000000e+00 : f32
    %117 = vector.broadcast %cst_94 : f32 to vector<8x512xf32>
    %118 = arith.maximumf %116, %117 : vector<8x512xf32>
    %c0_95 = arith.constant 0 : index
    %c0_96 = arith.constant 0 : index
    %119 = vector.load %arg16[%c0_95, %c0_96] : memref<16x6xf32, #tpu.memory_space<vmem>>, vector<16x1xf32>
    %c17_i32_97 = arith.constant 17 : i32
    %120 = tpu.dynamic_rotate %118 by %c17_i32_97 dim 1 : vector<8x512xf32>, i32 -> vector<8x512xf32>
    %c0_98 = arith.constant 0 : index
    %c0_99 = arith.constant 0 : index
    %c0_100 = arith.constant 0 : index
    %121 = vector.load %arg2[%c0_98, %c0_99, %c0_100] : memref<9x1x512xf32, #tpu.memory_space<vmem>>, vector<1x1x512xf32>
    %122 = vector.shape_cast %121 : vector<1x1x512xf32> to vector<1x512xf32>
    %123 = vector.broadcast %122 : vector<1x512xf32> to vector<8x512xf32>
    %124 = arith.mulf %120, %123 : vector<8x512xf32>
    %c0_101 = arith.constant 0 : index
    %c0_102 = arith.constant 0 : index
    %125 = vector.load %arg20[%c0_101, %c0_102] : memref<72x512xf32, #tpu.memory_space<vmem>>, vector<8x512xf32>
    tpu.vector_store %arg20[%c0_101, %c0_102], %124 {strides = array<i32>} : memref<72x512xf32, #tpu.memory_space<vmem>>, vector<8x512xf32>,
    %c16_i32_103 = arith.constant 16 : i32
    %126 = tpu.dynamic_rotate %118 by %c16_i32_103 dim 1 : vector<8x512xf32>, i32 -> vector<8x512xf32>
    %c1_104 = arith.constant 1 : index
    %c0_105 = arith.constant 0 : index
    %c0_106 = arith.constant 0 : index
    %127 = vector.load %arg2[%c1_104, %c0_105, %c0_106] : memref<9x1x512xf32, #tpu.memory_space<vmem>>, vector<1x1x512xf32>
    %128 = vector.shape_cast %127 : vector<1x1x512xf32> to vector<1x512xf32>
    %129 = vector.broadcast %128 : vector<1x512xf32> to vector<8x512xf32>
    %130 = arith.mulf %126, %129 : vector<8x512xf32>
    %c8_107 = arith.constant 8 : index
    %c0_108 = arith.constant 0 : index
    %131 = vector.load %arg20[%c8_107, %c0_108] : memref<72x512xf32, #tpu.memory_space<vmem>>, vector<8x512xf32>
    tpu.vector_store %arg20[%c8_107, %c0_108], %130 {strides = array<i32>} : memref<72x512xf32, #tpu.memory_space<vmem>>, vector<8x512xf32>,
    %c15_i32_109 = arith.constant 15 : i32
    %132 = tpu.dynamic_rotate %118 by %c15_i32_109 dim 1 : vector<8x512xf32>, i32 -> vector<8x512xf32>
    %c2_110 = arith.constant 2 : index
    %c0_111 = arith.constant 0 : index
    %c0_112 = arith.constant 0 : index
    %133 = vector.load %arg2[%c2_110, %c0_111, %c0_112] : memref<9x1x512xf32, #tpu.memory_space<vmem>>, vector<1x1x512xf32>
    %134 = vector.shape_cast %133 : vector<1x1x512xf32> to vector<1x512xf32>
    %135 = vector.broadcast %134 : vector<1x512xf32> to vector<8x512xf32>
    %136 = arith.mulf %132, %135 : vector<8x512xf32>
    %c16_113 = arith.constant 16 : index
    %c0_114 = arith.constant 0 : index
    %137 = vector.load %arg20[%c16_113, %c0_114] : memref<72x512xf32, #tpu.memory_space<vmem>>, vector<8x512xf32>
    tpu.vector_store %arg20[%c16_113, %c0_114], %136 {strides = array<i32>} : memref<72x512xf32, #tpu.memory_space<vmem>>, vector<8x512xf32>,
    %c1_i32_115 = arith.constant 1 : i32
    %138 = tpu.dynamic_rotate %118 by %c1_i32_115 dim 1 : vector<8x512xf32>, i32 -> vector<8x512xf32>
    %c3_116 = arith.constant 3 : index
    %c0_117 = arith.constant 0 : index
    %c0_118 = arith.constant 0 : index
    %139 = vector.load %arg2[%c3_116, %c0_117, %c0_118] : memref<9x1x512xf32, #tpu.memory_space<vmem>>, vector<1x1x512xf32>
    %140 = vector.shape_cast %139 : vector<1x1x512xf32> to vector<1x512xf32>
    %141 = vector.broadcast %140 : vector<1x512xf32> to vector<8x512xf32>
    %142 = arith.mulf %138, %141 : vector<8x512xf32>
    %c24_119 = arith.constant 24 : index
    %c0_120 = arith.constant 0 : index
    %143 = vector.load %arg20[%c24_119, %c0_120] : memref<72x512xf32, #tpu.memory_space<vmem>>, vector<8x512xf32>
    tpu.vector_store %arg20[%c24_119, %c0_120], %142 {strides = array<i32>} : memref<72x512xf32, #tpu.memory_space<vmem>>, vector<8x512xf32>,
    %c32_121 = arith.constant 32 : index
    %c0_122 = arith.constant 0 : index
    %144 = vector.load %arg20[%c32_121, %c0_122] : memref<72x512xf32, #tpu.memory_space<vmem>>, vector<8x512xf32>
    tpu.vector_store %arg20[%c32_121, %c0_122], %118 {strides = array<i32>} : memref<72x512xf32, #tpu.memory_space<vmem>>, vector<8x512xf32>,
    %c511_i32_123 = arith.constant 511 : i32
    %145 = tpu.dynamic_rotate %118 by %c511_i32_123 dim 1 : vector<8x512xf32>, i32 -> vector<8x512xf32>
    %c5_124 = arith.constant 5 : index
    %c0_125 = arith.constant 0 : index
    %c0_126 = arith.constant 0 : index
    %146 = vector.load %arg2[%c5_124, %c0_125, %c0_126] : memref<9x1x512xf32, #tpu.memory_space<vmem>>, vector<1x1x512xf32>
    %147 = vector.shape_cast %146 : vector<1x1x512xf32> to vector<1x512xf32>
    %148 = vector.broadcast %147 : vector<1x512xf32> to vector<8x512xf32>
    %149 = arith.mulf %145, %148 : vector<8x512xf32>
    %c40_127 = arith.constant 40 : index
    %c0_128 = arith.constant 0 : index
    %150 = vector.load %arg20[%c40_127, %c0_128] : memref<72x512xf32, #tpu.memory_space<vmem>>, vector<8x512xf32>
    tpu.vector_store %arg20[%c40_127, %c0_128], %149 {strides = array<i32>} : memref<72x512xf32, #tpu.memory_space<vmem>>, vector<8x512xf32>,
    %c497_i32_129 = arith.constant 497 : i32
    %151 = tpu.dynamic_rotate %118 by %c497_i32_129 dim 1 : vector<8x512xf32>, i32 -> vector<8x512xf32>
    %c6_130 = arith.constant 6 : index
    %c0_131 = arith.constant 0 : index
    %c0_132 = arith.constant 0 : index
    %152 = vector.load %arg2[%c6_130, %c0_131, %c0_132] : memref<9x1x512xf32, #tpu.memory_space<vmem>>, vector<1x1x512xf32>
    %153 = vector.shape_cast %152 : vector<1x1x512xf32> to vector<1x512xf32>
    %154 = vector.broadcast %153 : vector<1x512xf32> to vector<8x512xf32>
    %155 = arith.mulf %151, %154 : vector<8x512xf32>
    %c48_133 = arith.constant 48 : index
    %c0_134 = arith.constant 0 : index
    %156 = vector.load %arg20[%c48_133, %c0_134] : memref<72x512xf32, #tpu.memory_space<vmem>>, vector<8x512xf32>
    tpu.vector_store %arg20[%c48_133, %c0_134], %155 {strides = array<i32>} : memref<72x512xf32, #tpu.memory_space<vmem>>, vector<8x512xf32>,
    %c496_i32_135 = arith.constant 496 : i32
    %157 = tpu.dynamic_rotate %118 by %c496_i32_135 dim 1 : vector<8x512xf32>, i32 -> vector<8x512xf32>
    %c7_136 = arith.constant 7 : index
    %c0_137 = arith.constant 0 : index
    %c0_138 = arith.constant 0 : index
    %158 = vector.load %arg2[%c7_136, %c0_137, %c0_138] : memref<9x1x512xf32, #tpu.memory_space<vmem>>, vector<1x1x512xf32>
    %159 = vector.shape_cast %158 : vector<1x1x512xf32> to vector<1x512xf32>
    %160 = vector.broadcast %159 : vector<1x512xf32> to vector<8x512xf32>
    %161 = arith.mulf %157, %160 : vector<8x512xf32>
    %c56_139 = arith.constant 56 : index
    %c0_140 = arith.constant 0 : index
    %162 = vector.load %arg20[%c56_139, %c0_140] : memref<72x512xf32, #tpu.memory_space<vmem>>, vector<8x512xf32>
    tpu.vector_store %arg20[%c56_139, %c0_140], %161 {strides = array<i32>} : memref<72x512xf32, #tpu.memory_space<vmem>>, vector<8x512xf32>,
    %c495_i32_141 = arith.constant 495 : i32
    %163 = tpu.dynamic_rotate %118 by %c495_i32_141 dim 1 : vector<8x512xf32>, i32 -> vector<8x512xf32>
    %c8_142 = arith.constant 8 : index
    %c0_143 = arith.constant 0 : index
    %c0_144 = arith.constant 0 : index
    %164 = vector.load %arg2[%c8_142, %c0_143, %c0_144] : memref<9x1x512xf32, #tpu.memory_space<vmem>>, vector<1x1x512xf32>
    %165 = vector.shape_cast %164 : vector<1x1x512xf32> to vector<1x512xf32>
    %166 = vector.broadcast %165 : vector<1x512xf32> to vector<8x512xf32>
    %167 = arith.mulf %163, %166 : vector<8x512xf32>
    %c64_145 = arith.constant 64 : index
    %c0_146 = arith.constant 0 : index
    %168 = vector.load %arg20[%c64_145, %c0_146] : memref<72x512xf32, #tpu.memory_space<vmem>>, vector<8x512xf32>
    tpu.vector_store %arg20[%c64_145, %c0_146], %167 {strides = array<i32>} : memref<72x512xf32, #tpu.memory_space<vmem>>, vector<8x512xf32>,
    %c0_147 = arith.constant 0 : index
    %c0_148 = arith.constant 0 : index
    %169 = vector.load %arg8[%c0_147, %c0_148] : memref<16x72xbf16, #tpu.memory_space<vmem>>, vector<16x72xbf16>
    %c0_149 = arith.constant 0 : index
    %c0_150 = arith.constant 0 : index
    %170 = vector.load %arg20[%c0_149, %c0_150] : memref<72x512xf32, #tpu.memory_space<vmem>>, vector<72x512xf32>
    %171 = arith.truncf %170 : vector<72x512xf32> to vector<72x512xbf16>
    %cst_151 = arith.constant dense<0.000000e+00> : vector<16x512xf32>
    %172 = tpu.matmul %169, %171, %cst_151 {dimension_numbers = #tpu.dot_dimension_numbers<[1], [0], [0], [1], [0, 0, 1, 1], [], []>} : vector<16x72xbf16>, vector<72x512xbf16>, vector<16x512xf32> -> vector<16x512xf32>
    %173 = vector.broadcast %119 : vector<16x1xf32> to vector<16x512xf32>
    %174 = arith.addf %172, %173 : vector<16x512xf32>
    %cst_152 = arith.constant 0.000000e+00 : f32
    %175 = vector.broadcast %cst_152 : f32 to vector<16x512xf32>
    %176 = arith.maximumf %174, %175 : vector<16x512xf32>
    %c0_153 = arith.constant 0 : index
    %c0_154 = arith.constant 0 : index
    %177 = vector.load %arg4[%c0_153, %c0_154] : memref<512x128xbf16, #tpu.memory_space<vmem>>, vector<512x128xbf16>
    %178 = arith.truncf %176 : vector<16x512xf32> to vector<16x512xbf16>
    %cst_155 = arith.constant dense<0.000000e+00> : vector<16x128xf32>
    %179 = tpu.matmul %178, %177, %cst_155 {dimension_numbers = #tpu.dot_dimension_numbers<[1], [0], [0], [1], [0, 0, 1, 1], [], []>} : vector<16x512xbf16>, vector<512x128xbf16>, vector<16x128xf32> -> vector<16x128xf32>
    %180 = arith.truncf %118 : vector<8x512xf32> to vector<8x512xbf16>
    %cst_156 = arith.constant dense<0.000000e+00> : vector<8x128xf32>
    %181 = tpu.matmul %180, %177, %cst_156 {dimension_numbers = #tpu.dot_dimension_numbers<[1], [0], [0], [1], [0, 0, 1, 1], [], []>} : vector<8x512xbf16>, vector<512x128xbf16>, vector<8x128xf32> -> vector<8x128xf32>
    %c0_157 = arith.constant 0 : index
    %c0_158 = arith.constant 0 : index
    %182 = vector.load %arg14[%c0_157, %c0_158] : memref<16x8xbf16, #tpu.memory_space<vmem>>, vector<16x8xbf16>
    %183 = arith.truncf %181 : vector<8x128xf32> to vector<8x128xbf16>
    %cst_159 = arith.constant dense<0.000000e+00> : vector<16x128xf32>
    %184 = tpu.matmul %182, %183, %cst_159 {dimension_numbers = #tpu.dot_dimension_numbers<[1], [0], [0], [1], [0, 0, 1, 1], [], []>} : vector<16x8xbf16>, vector<8x128xbf16>, vector<16x128xf32> -> vector<16x128xf32>
    %c0_160 = arith.constant 0 : index
    %c1_161 = arith.constant 1 : index
    %185 = vector.load %arg16[%c0_160, %c1_161] : memref<16x6xf32, #tpu.memory_space<vmem>>, vector<16x1xf32>
    %c9_i32 = arith.constant 9 : i32
    %186 = tpu.dynamic_rotate %179 by %c9_i32 dim 1 : vector<16x128xf32>, i32 -> vector<16x128xf32>
    %c0_162 = arith.constant 0 : index
    %c0_163 = arith.constant 0 : index
    %c0_164 = arith.constant 0 : index
    %187 = vector.load %arg3[%c0_162, %c0_163, %c0_164] : memref<9x1x128xf32, #tpu.memory_space<vmem>>, vector<1x1x128xf32>
    %188 = vector.shape_cast %187 : vector<1x1x128xf32> to vector<1x128xf32>
    %189 = vector.broadcast %188 : vector<1x128xf32> to vector<16x128xf32>
    %190 = arith.mulf %186, %189 : vector<16x128xf32>
    %c0_165 = arith.constant 0 : index
    %c0_166 = arith.constant 0 : index
    %191 = vector.load %arg21[%c0_165, %c0_166] : memref<144x128xf32, #tpu.memory_space<vmem>>, vector<16x128xf32>
    tpu.vector_store %arg21[%c0_165, %c0_166], %190 {strides = array<i32>} : memref<144x128xf32, #tpu.memory_space<vmem>>, vector<16x128xf32>,
    %c8_i32 = arith.constant 8 : i32
    %192 = tpu.dynamic_rotate %179 by %c8_i32 dim 1 : vector<16x128xf32>, i32 -> vector<16x128xf32>
    %c1_167 = arith.constant 1 : index
    %c0_168 = arith.constant 0 : index
    %c0_169 = arith.constant 0 : index
    %193 = vector.load %arg3[%c1_167, %c0_168, %c0_169] : memref<9x1x128xf32, #tpu.memory_space<vmem>>, vector<1x1x128xf32>
    %194 = vector.shape_cast %193 : vector<1x1x128xf32> to vector<1x128xf32>
    %195 = vector.broadcast %194 : vector<1x128xf32> to vector<16x128xf32>
    %196 = arith.mulf %192, %195 : vector<16x128xf32>
    %c16_170 = arith.constant 16 : index
    %c0_171 = arith.constant 0 : index
    %197 = vector.load %arg21[%c16_170, %c0_171] : memref<144x128xf32, #tpu.memory_space<vmem>>, vector<16x128xf32>
    tpu.vector_store %arg21[%c16_170, %c0_171], %196 {strides = array<i32>} : memref<144x128xf32, #tpu.memory_space<vmem>>, vector<16x128xf32>,
    %c7_i32 = arith.constant 7 : i32
    %198 = tpu.dynamic_rotate %179 by %c7_i32 dim 1 : vector<16x128xf32>, i32 -> vector<16x128xf32>
    %c2_172 = arith.constant 2 : index
    %c0_173 = arith.constant 0 : index
    %c0_174 = arith.constant 0 : index
    %199 = vector.load %arg3[%c2_172, %c0_173, %c0_174] : memref<9x1x128xf32, #tpu.memory_space<vmem>>, vector<1x1x128xf32>
    %200 = vector.shape_cast %199 : vector<1x1x128xf32> to vector<1x128xf32>
    %201 = vector.broadcast %200 : vector<1x128xf32> to vector<16x128xf32>
    %202 = arith.mulf %198, %201 : vector<16x128xf32>
    %c32_175 = arith.constant 32 : index
    %c0_176 = arith.constant 0 : index
    %203 = vector.load %arg21[%c32_175, %c0_176] : memref<144x128xf32, #tpu.memory_space<vmem>>, vector<16x128xf32>
    tpu.vector_store %arg21[%c32_175, %c0_176], %202 {strides = array<i32>} : memref<144x128xf32, #tpu.memory_space<vmem>>, vector<16x128xf32>,
    %c1_i32_177 = arith.constant 1 : i32
    %204 = tpu.dynamic_rotate %179 by %c1_i32_177 dim 1 : vector<16x128xf32>, i32 -> vector<16x128xf32>
    %c3_178 = arith.constant 3 : index
    %c0_179 = arith.constant 0 : index
    %c0_180 = arith.constant 0 : index
    %205 = vector.load %arg3[%c3_178, %c0_179, %c0_180] : memref<9x1x128xf32, #tpu.memory_space<vmem>>, vector<1x1x128xf32>
    %206 = vector.shape_cast %205 : vector<1x1x128xf32> to vector<1x128xf32>
    %207 = vector.broadcast %206 : vector<1x128xf32> to vector<16x128xf32>
    %208 = arith.mulf %204, %207 : vector<16x128xf32>
    %c48_181 = arith.constant 48 : index
    %c0_182 = arith.constant 0 : index
    %209 = vector.load %arg21[%c48_181, %c0_182] : memref<144x128xf32, #tpu.memory_space<vmem>>, vector<16x128xf32>
    tpu.vector_store %arg21[%c48_181, %c0_182], %208 {strides = array<i32>} : memref<144x128xf32, #tpu.memory_space<vmem>>, vector<16x128xf32>,
    %c64_183 = arith.constant 64 : index
    %c0_184 = arith.constant 0 : index
    %210 = vector.load %arg21[%c64_183, %c0_184] : memref<144x128xf32, #tpu.memory_space<vmem>>, vector<16x128xf32>
    tpu.vector_store %arg21[%c64_183, %c0_184], %179 {strides = array<i32>} : memref<144x128xf32, #tpu.memory_space<vmem>>, vector<16x128xf32>,
    %c127_i32 = arith.constant 127 : i32
    %211 = tpu.dynamic_rotate %179 by %c127_i32 dim 1 : vector<16x128xf32>, i32 -> vector<16x128xf32>
    %c5_185 = arith.constant 5 : index
    %c0_186 = arith.constant 0 : index
    %c0_187 = arith.constant 0 : index
    %212 = vector.load %arg3[%c5_185, %c0_186, %c0_187] : memref<9x1x128xf32, #tpu.memory_space<vmem>>, vector<1x1x128xf32>
    %213 = vector.shape_cast %212 : vector<1x1x128xf32> to vector<1x128xf32>
    %214 = vector.broadcast %213 : vector<1x128xf32> to vector<16x128xf32>
    %215 = arith.mulf %211, %214 : vector<16x128xf32>
    %c80 = arith.constant 80 : index
    %c0_188 = arith.constant 0 : index
    %216 = vector.load %arg21[%c80, %c0_188] : memref<144x128xf32, #tpu.memory_space<vmem>>, vector<16x128xf32>
    tpu.vector_store %arg21[%c80, %c0_188], %215 {strides = array<i32>} : memref<144x128xf32, #tpu.memory_space<vmem>>, vector<16x128xf32>,
    %c121_i32 = arith.constant 121 : i32
    %217 = tpu.dynamic_rotate %179 by %c121_i32 dim 1 : vector<16x128xf32>, i32 -> vector<16x128xf32>
    %c6_189 = arith.constant 6 : index
    %c0_190 = arith.constant 0 : index
    %c0_191 = arith.constant 0 : index
    %218 = vector.load %arg3[%c6_189, %c0_190, %c0_191] : memref<9x1x128xf32, #tpu.memory_space<vmem>>, vector<1x1x128xf32>
    %219 = vector.shape_cast %218 : vector<1x1x128xf32> to vector<1x128xf32>
    %220 = vector.broadcast %219 : vector<1x128xf32> to vector<16x128xf32>
    %221 = arith.mulf %217, %220 : vector<16x128xf32>
    %c96 = arith.constant 96 : index
    %c0_192 = arith.constant 0 : index
    %222 = vector.load %arg21[%c96, %c0_192] : memref<144x128xf32, #tpu.memory_space<vmem>>, vector<16x128xf32>
    tpu.vector_store %arg21[%c96, %c0_192], %221 {strides = array<i32>} : memref<144x128xf32, #tpu.memory_space<vmem>>, vector<16x128xf32>,
    %c120_i32 = arith.constant 120 : i32
    %223 = tpu.dynamic_rotate %179 by %c120_i32 dim 1 : vector<16x128xf32>, i32 -> vector<16x128xf32>
    %c7_193 = arith.constant 7 : index
    %c0_194 = arith.constant 0 : index
    %c0_195 = arith.constant 0 : index
    %224 = vector.load %arg3[%c7_193, %c0_194, %c0_195] : memref<9x1x128xf32, #tpu.memory_space<vmem>>, vector<1x1x128xf32>
    %225 = vector.shape_cast %224 : vector<1x1x128xf32> to vector<1x128xf32>
    %226 = vector.broadcast %225 : vector<1x128xf32> to vector<16x128xf32>
    %227 = arith.mulf %223, %226 : vector<16x128xf32>
    %c112 = arith.constant 112 : index
    %c0_196 = arith.constant 0 : index
    %228 = vector.load %arg21[%c112, %c0_196] : memref<144x128xf32, #tpu.memory_space<vmem>>, vector<16x128xf32>
    tpu.vector_store %arg21[%c112, %c0_196], %227 {strides = array<i32>} : memref<144x128xf32, #tpu.memory_space<vmem>>, vector<16x128xf32>,
    %c119_i32 = arith.constant 119 : i32
    %229 = tpu.dynamic_rotate %179 by %c119_i32 dim 1 : vector<16x128xf32>, i32 -> vector<16x128xf32>
    %c8_197 = arith.constant 8 : index
    %c0_198 = arith.constant 0 : index
    %c0_199 = arith.constant 0 : index
    %230 = vector.load %arg3[%c8_197, %c0_198, %c0_199] : memref<9x1x128xf32, #tpu.memory_space<vmem>>, vector<1x1x128xf32>
    %231 = vector.shape_cast %230 : vector<1x1x128xf32> to vector<1x128xf32>
    %232 = vector.broadcast %231 : vector<1x128xf32> to vector<16x128xf32>
    %233 = arith.mulf %229, %232 : vector<16x128xf32>
    %c128 = arith.constant 128 : index
    %c0_200 = arith.constant 0 : index
    %234 = vector.load %arg21[%c128, %c0_200] : memref<144x128xf32, #tpu.memory_space<vmem>>, vector<16x128xf32>
    tpu.vector_store %arg21[%c128, %c0_200], %233 {strides = array<i32>} : memref<144x128xf32, #tpu.memory_space<vmem>>, vector<16x128xf32>,
    %c0_201 = arith.constant 0 : index
    %c0_202 = arith.constant 0 : index
    %235 = vector.load %arg9[%c0_201, %c0_202] : memref<16x144xbf16, #tpu.memory_space<vmem>>, vector<16x144xbf16>
    %c0_203 = arith.constant 0 : index
    %c0_204 = arith.constant 0 : index
    %236 = vector.load %arg21[%c0_203, %c0_204] : memref<144x128xf32, #tpu.memory_space<vmem>>, vector<144x128xf32>
    %237 = arith.truncf %236 : vector<144x128xf32> to vector<144x128xbf16>
    %cst_205 = arith.constant dense<0.000000e+00> : vector<16x128xf32>
    %238 = tpu.matmul %235, %237, %cst_205 {dimension_numbers = #tpu.dot_dimension_numbers<[1], [0], [0], [1], [0, 0, 1, 1], [], []>} : vector<16x144xbf16>, vector<144x128xbf16>, vector<16x128xf32> -> vector<16x128xf32>
    %239 = vector.broadcast %185 : vector<16x1xf32> to vector<16x128xf32>
    %240 = arith.addf %238, %239 : vector<16x128xf32>
    %241 = arith.addf %240, %184 : vector<16x128xf32>
    %cst_206 = arith.constant 0.000000e+00 : f32
    %242 = vector.broadcast %cst_206 : f32 to vector<16x128xf32>
    %243 = arith.maximumf %241, %242 : vector<16x128xf32>
    %c0_207 = arith.constant 0 : index
    %c2_208 = arith.constant 2 : index
    %244 = vector.load %arg16[%c0_207, %c2_208] : memref<16x6xf32, #tpu.memory_space<vmem>>, vector<16x1xf32>
    %c9_i32_209 = arith.constant 9 : i32
    %245 = tpu.dynamic_rotate %243 by %c9_i32_209 dim 1 : vector<16x128xf32>, i32 -> vector<16x128xf32>
    %c0_210 = arith.constant 0 : index
    %c0_211 = arith.constant 0 : index
    %c0_212 = arith.constant 0 : index
    %246 = vector.load %arg3[%c0_210, %c0_211, %c0_212] : memref<9x1x128xf32, #tpu.memory_space<vmem>>, vector<1x1x128xf32>
    %247 = vector.shape_cast %246 : vector<1x1x128xf32> to vector<1x128xf32>
    %248 = vector.broadcast %247 : vector<1x128xf32> to vector<16x128xf32>
    %249 = arith.mulf %245, %248 : vector<16x128xf32>
    %c0_213 = arith.constant 0 : index
    %c0_214 = arith.constant 0 : index
    %250 = vector.load %arg21[%c0_213, %c0_214] : memref<144x128xf32, #tpu.memory_space<vmem>>, vector<16x128xf32>
    tpu.vector_store %arg21[%c0_213, %c0_214], %249 {strides = array<i32>} : memref<144x128xf32, #tpu.memory_space<vmem>>, vector<16x128xf32>,
    %c8_i32_215 = arith.constant 8 : i32
    %251 = tpu.dynamic_rotate %243 by %c8_i32_215 dim 1 : vector<16x128xf32>, i32 -> vector<16x128xf32>
    %c1_216 = arith.constant 1 : index
    %c0_217 = arith.constant 0 : index
    %c0_218 = arith.constant 0 : index
    %252 = vector.load %arg3[%c1_216, %c0_217, %c0_218] : memref<9x1x128xf32, #tpu.memory_space<vmem>>, vector<1x1x128xf32>
    %253 = vector.shape_cast %252 : vector<1x1x128xf32> to vector<1x128xf32>
    %254 = vector.broadcast %253 : vector<1x128xf32> to vector<16x128xf32>
    %255 = arith.mulf %251, %254 : vector<16x128xf32>
    %c16_219 = arith.constant 16 : index
    %c0_220 = arith.constant 0 : index
    %256 = vector.load %arg21[%c16_219, %c0_220] : memref<144x128xf32, #tpu.memory_space<vmem>>, vector<16x128xf32>
    tpu.vector_store %arg21[%c16_219, %c0_220], %255 {strides = array<i32>} : memref<144x128xf32, #tpu.memory_space<vmem>>, vector<16x128xf32>,
    %c7_i32_221 = arith.constant 7 : i32
    %257 = tpu.dynamic_rotate %243 by %c7_i32_221 dim 1 : vector<16x128xf32>, i32 -> vector<16x128xf32>
    %c2_222 = arith.constant 2 : index
    %c0_223 = arith.constant 0 : index
    %c0_224 = arith.constant 0 : index
    %258 = vector.load %arg3[%c2_222, %c0_223, %c0_224] : memref<9x1x128xf32, #tpu.memory_space<vmem>>, vector<1x1x128xf32>
    %259 = vector.shape_cast %258 : vector<1x1x128xf32> to vector<1x128xf32>
    %260 = vector.broadcast %259 : vector<1x128xf32> to vector<16x128xf32>
    %261 = arith.mulf %257, %260 : vector<16x128xf32>
    %c32_225 = arith.constant 32 : index
    %c0_226 = arith.constant 0 : index
    %262 = vector.load %arg21[%c32_225, %c0_226] : memref<144x128xf32, #tpu.memory_space<vmem>>, vector<16x128xf32>
    tpu.vector_store %arg21[%c32_225, %c0_226], %261 {strides = array<i32>} : memref<144x128xf32, #tpu.memory_space<vmem>>, vector<16x128xf32>,
    %c1_i32_227 = arith.constant 1 : i32
    %263 = tpu.dynamic_rotate %243 by %c1_i32_227 dim 1 : vector<16x128xf32>, i32 -> vector<16x128xf32>
    %c3_228 = arith.constant 3 : index
    %c0_229 = arith.constant 0 : index
    %c0_230 = arith.constant 0 : index
    %264 = vector.load %arg3[%c3_228, %c0_229, %c0_230] : memref<9x1x128xf32, #tpu.memory_space<vmem>>, vector<1x1x128xf32>
    %265 = vector.shape_cast %264 : vector<1x1x128xf32> to vector<1x128xf32>
    %266 = vector.broadcast %265 : vector<1x128xf32> to vector<16x128xf32>
    %267 = arith.mulf %263, %266 : vector<16x128xf32>
    %c48_231 = arith.constant 48 : index
    %c0_232 = arith.constant 0 : index
    %268 = vector.load %arg21[%c48_231, %c0_232] : memref<144x128xf32, #tpu.memory_space<vmem>>, vector<16x128xf32>
    tpu.vector_store %arg21[%c48_231, %c0_232], %267 {strides = array<i32>} : memref<144x128xf32, #tpu.memory_space<vmem>>, vector<16x128xf32>,
    %c64_233 = arith.constant 64 : index
    %c0_234 = arith.constant 0 : index
    %269 = vector.load %arg21[%c64_233, %c0_234] : memref<144x128xf32, #tpu.memory_space<vmem>>, vector<16x128xf32>
    tpu.vector_store %arg21[%c64_233, %c0_234], %243 {strides = array<i32>} : memref<144x128xf32, #tpu.memory_space<vmem>>, vector<16x128xf32>,
    %c127_i32_235 = arith.constant 127 : i32
    %270 = tpu.dynamic_rotate %243 by %c127_i32_235 dim 1 : vector<16x128xf32>, i32 -> vector<16x128xf32>
    %c5_236 = arith.constant 5 : index
    %c0_237 = arith.constant 0 : index
    %c0_238 = arith.constant 0 : index
    %271 = vector.load %arg3[%c5_236, %c0_237, %c0_238] : memref<9x1x128xf32, #tpu.memory_space<vmem>>, vector<1x1x128xf32>
    %272 = vector.shape_cast %271 : vector<1x1x128xf32> to vector<1x128xf32>
    %273 = vector.broadcast %272 : vector<1x128xf32> to vector<16x128xf32>
    %274 = arith.mulf %270, %273 : vector<16x128xf32>
    %c80_239 = arith.constant 80 : index
    %c0_240 = arith.constant 0 : index
    %275 = vector.load %arg21[%c80_239, %c0_240] : memref<144x128xf32, #tpu.memory_space<vmem>>, vector<16x128xf32>
    tpu.vector_store %arg21[%c80_239, %c0_240], %274 {strides = array<i32>} : memref<144x128xf32, #tpu.memory_space<vmem>>, vector<16x128xf32>,
    %c121_i32_241 = arith.constant 121 : i32
    %276 = tpu.dynamic_rotate %243 by %c121_i32_241 dim 1 : vector<16x128xf32>, i32 -> vector<16x128xf32>
    %c6_242 = arith.constant 6 : index
    %c0_243 = arith.constant 0 : index
    %c0_244 = arith.constant 0 : index
    %277 = vector.load %arg3[%c6_242, %c0_243, %c0_244] : memref<9x1x128xf32, #tpu.memory_space<vmem>>, vector<1x1x128xf32>
    %278 = vector.shape_cast %277 : vector<1x1x128xf32> to vector<1x128xf32>
    %279 = vector.broadcast %278 : vector<1x128xf32> to vector<16x128xf32>
    %280 = arith.mulf %276, %279 : vector<16x128xf32>
    %c96_245 = arith.constant 96 : index
    %c0_246 = arith.constant 0 : index
    %281 = vector.load %arg21[%c96_245, %c0_246] : memref<144x128xf32, #tpu.memory_space<vmem>>, vector<16x128xf32>
    tpu.vector_store %arg21[%c96_245, %c0_246], %280 {strides = array<i32>} : memref<144x128xf32, #tpu.memory_space<vmem>>, vector<16x128xf32>,
    %c120_i32_247 = arith.constant 120 : i32
    %282 = tpu.dynamic_rotate %243 by %c120_i32_247 dim 1 : vector<16x128xf32>, i32 -> vector<16x128xf32>
    %c7_248 = arith.constant 7 : index
    %c0_249 = arith.constant 0 : index
    %c0_250 = arith.constant 0 : index
    %283 = vector.load %arg3[%c7_248, %c0_249, %c0_250] : memref<9x1x128xf32, #tpu.memory_space<vmem>>, vector<1x1x128xf32>
    %284 = vector.shape_cast %283 : vector<1x1x128xf32> to vector<1x128xf32>
    %285 = vector.broadcast %284 : vector<1x128xf32> to vector<16x128xf32>
    %286 = arith.mulf %282, %285 : vector<16x128xf32>
    %c112_251 = arith.constant 112 : index
    %c0_252 = arith.constant 0 : index
    %287 = vector.load %arg21[%c112_251, %c0_252] : memref<144x128xf32, #tpu.memory_space<vmem>>, vector<16x128xf32>
    tpu.vector_store %arg21[%c112_251, %c0_252], %286 {strides = array<i32>} : memref<144x128xf32, #tpu.memory_space<vmem>>, vector<16x128xf32>,
    %c119_i32_253 = arith.constant 119 : i32
    %288 = tpu.dynamic_rotate %243 by %c119_i32_253 dim 1 : vector<16x128xf32>, i32 -> vector<16x128xf32>
    %c8_254 = arith.constant 8 : index
    %c0_255 = arith.constant 0 : index
    %c0_256 = arith.constant 0 : index
    %289 = vector.load %arg3[%c8_254, %c0_255, %c0_256] : memref<9x1x128xf32, #tpu.memory_space<vmem>>, vector<1x1x128xf32>
    %290 = vector.shape_cast %289 : vector<1x1x128xf32> to vector<1x128xf32>
    %291 = vector.broadcast %290 : vector<1x128xf32> to vector<16x128xf32>
    %292 = arith.mulf %288, %291 : vector<16x128xf32>
    %c128_257 = arith.constant 128 : index
    %c0_258 = arith.constant 0 : index
    %293 = vector.load %arg21[%c128_257, %c0_258] : memref<144x128xf32, #tpu.memory_space<vmem>>, vector<16x128xf32>
    tpu.vector_store %arg21[%c128_257, %c0_258], %292 {strides = array<i32>} : memref<144x128xf32, #tpu.memory_space<vmem>>, vector<16x128xf32>,
    %c0_259 = arith.constant 0 : index
    %c0_260 = arith.constant 0 : index
    %294 = vector.load %arg10[%c0_259, %c0_260] : memref<16x144xbf16, #tpu.memory_space<vmem>>, vector<16x144xbf16>
    %c0_261 = arith.constant 0 : index
    %c0_262 = arith.constant 0 : index
    %295 = vector.load %arg21[%c0_261, %c0_262] : memref<144x128xf32, #tpu.memory_space<vmem>>, vector<144x128xf32>
    %296 = arith.truncf %295 : vector<144x128xf32> to vector<144x128xbf16>
    %cst_263 = arith.constant dense<0.000000e+00> : vector<16x128xf32>
    %297 = tpu.matmul %294, %296, %cst_263 {dimension_numbers = #tpu.dot_dimension_numbers<[1], [0], [0], [1], [0, 0, 1, 1], [], []>} : vector<16x144xbf16>, vector<144x128xbf16>, vector<16x128xf32> -> vector<16x128xf32>
    %298 = vector.broadcast %244 : vector<16x1xf32> to vector<16x128xf32>
    %299 = arith.addf %297, %298 : vector<16x128xf32>
    %cst_264 = arith.constant 0.000000e+00 : f32
    %300 = vector.broadcast %cst_264 : f32 to vector<16x128xf32>
    %301 = arith.maximumf %299, %300 : vector<16x128xf32>
    %c0_265 = arith.constant 0 : index
    %c3_266 = arith.constant 3 : index
    %302 = vector.load %arg16[%c0_265, %c3_266] : memref<16x6xf32, #tpu.memory_space<vmem>>, vector<16x1xf32>
    %c9_i32_267 = arith.constant 9 : i32
    %303 = tpu.dynamic_rotate %301 by %c9_i32_267 dim 1 : vector<16x128xf32>, i32 -> vector<16x128xf32>
    %c0_268 = arith.constant 0 : index
    %c0_269 = arith.constant 0 : index
    %c0_270 = arith.constant 0 : index
    %304 = vector.load %arg3[%c0_268, %c0_269, %c0_270] : memref<9x1x128xf32, #tpu.memory_space<vmem>>, vector<1x1x128xf32>
    %305 = vector.shape_cast %304 : vector<1x1x128xf32> to vector<1x128xf32>
    %306 = vector.broadcast %305 : vector<1x128xf32> to vector<16x128xf32>
    %307 = arith.mulf %303, %306 : vector<16x128xf32>
    %c0_271 = arith.constant 0 : index
    %c0_272 = arith.constant 0 : index
    %308 = vector.load %arg21[%c0_271, %c0_272] : memref<144x128xf32, #tpu.memory_space<vmem>>, vector<16x128xf32>
    tpu.vector_store %arg21[%c0_271, %c0_272], %307 {strides = array<i32>} : memref<144x128xf32, #tpu.memory_space<vmem>>, vector<16x128xf32>,
    %c8_i32_273 = arith.constant 8 : i32
    %309 = tpu.dynamic_rotate %301 by %c8_i32_273 dim 1 : vector<16x128xf32>, i32 -> vector<16x128xf32>
    %c1_274 = arith.constant 1 : index
    %c0_275 = arith.constant 0 : index
    %c0_276 = arith.constant 0 : index
    %310 = vector.load %arg3[%c1_274, %c0_275, %c0_276] : memref<9x1x128xf32, #tpu.memory_space<vmem>>, vector<1x1x128xf32>
    %311 = vector.shape_cast %310 : vector<1x1x128xf32> to vector<1x128xf32>
    %312 = vector.broadcast %311 : vector<1x128xf32> to vector<16x128xf32>
    %313 = arith.mulf %309, %312 : vector<16x128xf32>
    %c16_277 = arith.constant 16 : index
    %c0_278 = arith.constant 0 : index
    %314 = vector.load %arg21[%c16_277, %c0_278] : memref<144x128xf32, #tpu.memory_space<vmem>>, vector<16x128xf32>
    tpu.vector_store %arg21[%c16_277, %c0_278], %313 {strides = array<i32>} : memref<144x128xf32, #tpu.memory_space<vmem>>, vector<16x128xf32>,
    %c7_i32_279 = arith.constant 7 : i32
    %315 = tpu.dynamic_rotate %301 by %c7_i32_279 dim 1 : vector<16x128xf32>, i32 -> vector<16x128xf32>
    %c2_280 = arith.constant 2 : index
    %c0_281 = arith.constant 0 : index
    %c0_282 = arith.constant 0 : index
    %316 = vector.load %arg3[%c2_280, %c0_281, %c0_282] : memref<9x1x128xf32, #tpu.memory_space<vmem>>, vector<1x1x128xf32>
    %317 = vector.shape_cast %316 : vector<1x1x128xf32> to vector<1x128xf32>
    %318 = vector.broadcast %317 : vector<1x128xf32> to vector<16x128xf32>
    %319 = arith.mulf %315, %318 : vector<16x128xf32>
    %c32_283 = arith.constant 32 : index
    %c0_284 = arith.constant 0 : index
    %320 = vector.load %arg21[%c32_283, %c0_284] : memref<144x128xf32, #tpu.memory_space<vmem>>, vector<16x128xf32>
    tpu.vector_store %arg21[%c32_283, %c0_284], %319 {strides = array<i32>} : memref<144x128xf32, #tpu.memory_space<vmem>>, vector<16x128xf32>,
    %c1_i32_285 = arith.constant 1 : i32
    %321 = tpu.dynamic_rotate %301 by %c1_i32_285 dim 1 : vector<16x128xf32>, i32 -> vector<16x128xf32>
    %c3_286 = arith.constant 3 : index
    %c0_287 = arith.constant 0 : index
    %c0_288 = arith.constant 0 : index
    %322 = vector.load %arg3[%c3_286, %c0_287, %c0_288] : memref<9x1x128xf32, #tpu.memory_space<vmem>>, vector<1x1x128xf32>
    %323 = vector.shape_cast %322 : vector<1x1x128xf32> to vector<1x128xf32>
    %324 = vector.broadcast %323 : vector<1x128xf32> to vector<16x128xf32>
    %325 = arith.mulf %321, %324 : vector<16x128xf32>
    %c48_289 = arith.constant 48 : index
    %c0_290 = arith.constant 0 : index
    %326 = vector.load %arg21[%c48_289, %c0_290] : memref<144x128xf32, #tpu.memory_space<vmem>>, vector<16x128xf32>
    tpu.vector_store %arg21[%c48_289, %c0_290], %325 {strides = array<i32>} : memref<144x128xf32, #tpu.memory_space<vmem>>, vector<16x128xf32>,
    %c64_291 = arith.constant 64 : index
    %c0_292 = arith.constant 0 : index
    %327 = vector.load %arg21[%c64_291, %c0_292] : memref<144x128xf32, #tpu.memory_space<vmem>>, vector<16x128xf32>
    tpu.vector_store %arg21[%c64_291, %c0_292], %301 {strides = array<i32>} : memref<144x128xf32, #tpu.memory_space<vmem>>, vector<16x128xf32>,
    %c127_i32_293 = arith.constant 127 : i32
    %328 = tpu.dynamic_rotate %301 by %c127_i32_293 dim 1 : vector<16x128xf32>, i32 -> vector<16x128xf32>
    %c5_294 = arith.constant 5 : index
    %c0_295 = arith.constant 0 : index
    %c0_296 = arith.constant 0 : index
    %329 = vector.load %arg3[%c5_294, %c0_295, %c0_296] : memref<9x1x128xf32, #tpu.memory_space<vmem>>, vector<1x1x128xf32>
    %330 = vector.shape_cast %329 : vector<1x1x128xf32> to vector<1x128xf32>
    %331 = vector.broadcast %330 : vector<1x128xf32> to vector<16x128xf32>
    %332 = arith.mulf %328, %331 : vector<16x128xf32>
    %c80_297 = arith.constant 80 : index
    %c0_298 = arith.constant 0 : index
    %333 = vector.load %arg21[%c80_297, %c0_298] : memref<144x128xf32, #tpu.memory_space<vmem>>, vector<16x128xf32>
    tpu.vector_store %arg21[%c80_297, %c0_298], %332 {strides = array<i32>} : memref<144x128xf32, #tpu.memory_space<vmem>>, vector<16x128xf32>,
    %c121_i32_299 = arith.constant 121 : i32
    %334 = tpu.dynamic_rotate %301 by %c121_i32_299 dim 1 : vector<16x128xf32>, i32 -> vector<16x128xf32>
    %c6_300 = arith.constant 6 : index
    %c0_301 = arith.constant 0 : index
    %c0_302 = arith.constant 0 : index
    %335 = vector.load %arg3[%c6_300, %c0_301, %c0_302] : memref<9x1x128xf32, #tpu.memory_space<vmem>>, vector<1x1x128xf32>
    %336 = vector.shape_cast %335 : vector<1x1x128xf32> to vector<1x128xf32>
    %337 = vector.broadcast %336 : vector<1x128xf32> to vector<16x128xf32>
    %338 = arith.mulf %334, %337 : vector<16x128xf32>
    %c96_303 = arith.constant 96 : index
    %c0_304 = arith.constant 0 : index
    %339 = vector.load %arg21[%c96_303, %c0_304] : memref<144x128xf32, #tpu.memory_space<vmem>>, vector<16x128xf32>
    tpu.vector_store %arg21[%c96_303, %c0_304], %338 {strides = array<i32>} : memref<144x128xf32, #tpu.memory_space<vmem>>, vector<16x128xf32>,
    %c120_i32_305 = arith.constant 120 : i32
    %340 = tpu.dynamic_rotate %301 by %c120_i32_305 dim 1 : vector<16x128xf32>, i32 -> vector<16x128xf32>
    %c7_306 = arith.constant 7 : index
    %c0_307 = arith.constant 0 : index
    %c0_308 = arith.constant 0 : index
    %341 = vector.load %arg3[%c7_306, %c0_307, %c0_308] : memref<9x1x128xf32, #tpu.memory_space<vmem>>, vector<1x1x128xf32>
    %342 = vector.shape_cast %341 : vector<1x1x128xf32> to vector<1x128xf32>
    %343 = vector.broadcast %342 : vector<1x128xf32> to vector<16x128xf32>
    %344 = arith.mulf %340, %343 : vector<16x128xf32>
    %c112_309 = arith.constant 112 : index
    %c0_310 = arith.constant 0 : index
    %345 = vector.load %arg21[%c112_309, %c0_310] : memref<144x128xf32, #tpu.memory_space<vmem>>, vector<16x128xf32>
    tpu.vector_store %arg21[%c112_309, %c0_310], %344 {strides = array<i32>} : memref<144x128xf32, #tpu.memory_space<vmem>>, vector<16x128xf32>,
    %c119_i32_311 = arith.constant 119 : i32
    %346 = tpu.dynamic_rotate %301 by %c119_i32_311 dim 1 : vector<16x128xf32>, i32 -> vector<16x128xf32>
    %c8_312 = arith.constant 8 : index
    %c0_313 = arith.constant 0 : index
    %c0_314 = arith.constant 0 : index
    %347 = vector.load %arg3[%c8_312, %c0_313, %c0_314] : memref<9x1x128xf32, #tpu.memory_space<vmem>>, vector<1x1x128xf32>
    %348 = vector.shape_cast %347 : vector<1x1x128xf32> to vector<1x128xf32>
    %349 = vector.broadcast %348 : vector<1x128xf32> to vector<16x128xf32>
    %350 = arith.mulf %346, %349 : vector<16x128xf32>
    %c128_315 = arith.constant 128 : index
    %c0_316 = arith.constant 0 : index
    %351 = vector.load %arg21[%c128_315, %c0_316] : memref<144x128xf32, #tpu.memory_space<vmem>>, vector<16x128xf32>
    tpu.vector_store %arg21[%c128_315, %c0_316], %350 {strides = array<i32>} : memref<144x128xf32, #tpu.memory_space<vmem>>, vector<16x128xf32>,
    %c0_317 = arith.constant 0 : index
    %c0_318 = arith.constant 0 : index
    %352 = vector.load %arg11[%c0_317, %c0_318] : memref<16x144xbf16, #tpu.memory_space<vmem>>, vector<16x144xbf16>
    %c0_319 = arith.constant 0 : index
    %c0_320 = arith.constant 0 : index
    %353 = vector.load %arg21[%c0_319, %c0_320] : memref<144x128xf32, #tpu.memory_space<vmem>>, vector<144x128xf32>
    %354 = arith.truncf %353 : vector<144x128xf32> to vector<144x128xbf16>
    %cst_321 = arith.constant dense<0.000000e+00> : vector<16x128xf32>
    %355 = tpu.matmul %352, %354, %cst_321 {dimension_numbers = #tpu.dot_dimension_numbers<[1], [0], [0], [1], [0, 0, 1, 1], [], []>} : vector<16x144xbf16>, vector<144x128xbf16>, vector<16x128xf32> -> vector<16x128xf32>
    %356 = vector.broadcast %302 : vector<16x1xf32> to vector<16x128xf32>
    %357 = arith.addf %355, %356 : vector<16x128xf32>
    %358 = arith.addf %357, %243 : vector<16x128xf32>
    %cst_322 = arith.constant 0.000000e+00 : f32
    %359 = vector.broadcast %cst_322 : f32 to vector<16x128xf32>
    %360 = arith.maximumf %358, %359 : vector<16x128xf32>
    %c0_323 = arith.constant 0 : index
    %c4 = arith.constant 4 : index
    %361 = vector.load %arg16[%c0_323, %c4] : memref<16x6xf32, #tpu.memory_space<vmem>>, vector<16x1xf32>
    %c9_i32_324 = arith.constant 9 : i32
    %362 = tpu.dynamic_rotate %360 by %c9_i32_324 dim 1 : vector<16x128xf32>, i32 -> vector<16x128xf32>
    %c0_325 = arith.constant 0 : index
    %c0_326 = arith.constant 0 : index
    %c0_327 = arith.constant 0 : index
    %363 = vector.load %arg3[%c0_325, %c0_326, %c0_327] : memref<9x1x128xf32, #tpu.memory_space<vmem>>, vector<1x1x128xf32>
    %364 = vector.shape_cast %363 : vector<1x1x128xf32> to vector<1x128xf32>
    %365 = vector.broadcast %364 : vector<1x128xf32> to vector<16x128xf32>
    %366 = arith.mulf %362, %365 : vector<16x128xf32>
    %c0_328 = arith.constant 0 : index
    %c0_329 = arith.constant 0 : index
    %367 = vector.load %arg21[%c0_328, %c0_329] : memref<144x128xf32, #tpu.memory_space<vmem>>, vector<16x128xf32>
    tpu.vector_store %arg21[%c0_328, %c0_329], %366 {strides = array<i32>} : memref<144x128xf32, #tpu.memory_space<vmem>>, vector<16x128xf32>,
    %c8_i32_330 = arith.constant 8 : i32
    %368 = tpu.dynamic_rotate %360 by %c8_i32_330 dim 1 : vector<16x128xf32>, i32 -> vector<16x128xf32>
    %c1_331 = arith.constant 1 : index
    %c0_332 = arith.constant 0 : index
    %c0_333 = arith.constant 0 : index
    %369 = vector.load %arg3[%c1_331, %c0_332, %c0_333] : memref<9x1x128xf32, #tpu.memory_space<vmem>>, vector<1x1x128xf32>
    %370 = vector.shape_cast %369 : vector<1x1x128xf32> to vector<1x128xf32>
    %371 = vector.broadcast %370 : vector<1x128xf32> to vector<16x128xf32>
    %372 = arith.mulf %368, %371 : vector<16x128xf32>
    %c16_334 = arith.constant 16 : index
    %c0_335 = arith.constant 0 : index
    %373 = vector.load %arg21[%c16_334, %c0_335] : memref<144x128xf32, #tpu.memory_space<vmem>>, vector<16x128xf32>
    tpu.vector_store %arg21[%c16_334, %c0_335], %372 {strides = array<i32>} : memref<144x128xf32, #tpu.memory_space<vmem>>, vector<16x128xf32>,
    %c7_i32_336 = arith.constant 7 : i32
    %374 = tpu.dynamic_rotate %360 by %c7_i32_336 dim 1 : vector<16x128xf32>, i32 -> vector<16x128xf32>
    %c2_337 = arith.constant 2 : index
    %c0_338 = arith.constant 0 : index
    %c0_339 = arith.constant 0 : index
    %375 = vector.load %arg3[%c2_337, %c0_338, %c0_339] : memref<9x1x128xf32, #tpu.memory_space<vmem>>, vector<1x1x128xf32>
    %376 = vector.shape_cast %375 : vector<1x1x128xf32> to vector<1x128xf32>
    %377 = vector.broadcast %376 : vector<1x128xf32> to vector<16x128xf32>
    %378 = arith.mulf %374, %377 : vector<16x128xf32>
    %c32_340 = arith.constant 32 : index
    %c0_341 = arith.constant 0 : index
    %379 = vector.load %arg21[%c32_340, %c0_341] : memref<144x128xf32, #tpu.memory_space<vmem>>, vector<16x128xf32>
    tpu.vector_store %arg21[%c32_340, %c0_341], %378 {strides = array<i32>} : memref<144x128xf32, #tpu.memory_space<vmem>>, vector<16x128xf32>,
    %c1_i32_342 = arith.constant 1 : i32
    %380 = tpu.dynamic_rotate %360 by %c1_i32_342 dim 1 : vector<16x128xf32>, i32 -> vector<16x128xf32>
    %c3_343 = arith.constant 3 : index
    %c0_344 = arith.constant 0 : index
    %c0_345 = arith.constant 0 : index
    %381 = vector.load %arg3[%c3_343, %c0_344, %c0_345] : memref<9x1x128xf32, #tpu.memory_space<vmem>>, vector<1x1x128xf32>
    %382 = vector.shape_cast %381 : vector<1x1x128xf32> to vector<1x128xf32>
    %383 = vector.broadcast %382 : vector<1x128xf32> to vector<16x128xf32>
    %384 = arith.mulf %380, %383 : vector<16x128xf32>
    %c48_346 = arith.constant 48 : index
    %c0_347 = arith.constant 0 : index
    %385 = vector.load %arg21[%c48_346, %c0_347] : memref<144x128xf32, #tpu.memory_space<vmem>>, vector<16x128xf32>
    tpu.vector_store %arg21[%c48_346, %c0_347], %384 {strides = array<i32>} : memref<144x128xf32, #tpu.memory_space<vmem>>, vector<16x128xf32>,
    %c64_348 = arith.constant 64 : index
    %c0_349 = arith.constant 0 : index
    %386 = vector.load %arg21[%c64_348, %c0_349] : memref<144x128xf32, #tpu.memory_space<vmem>>, vector<16x128xf32>
    tpu.vector_store %arg21[%c64_348, %c0_349], %360 {strides = array<i32>} : memref<144x128xf32, #tpu.memory_space<vmem>>, vector<16x128xf32>,
    %c127_i32_350 = arith.constant 127 : i32
    %387 = tpu.dynamic_rotate %360 by %c127_i32_350 dim 1 : vector<16x128xf32>, i32 -> vector<16x128xf32>
    %c5_351 = arith.constant 5 : index
    %c0_352 = arith.constant 0 : index
    %c0_353 = arith.constant 0 : index
    %388 = vector.load %arg3[%c5_351, %c0_352, %c0_353] : memref<9x1x128xf32, #tpu.memory_space<vmem>>, vector<1x1x128xf32>
    %389 = vector.shape_cast %388 : vector<1x1x128xf32> to vector<1x128xf32>
    %390 = vector.broadcast %389 : vector<1x128xf32> to vector<16x128xf32>
    %391 = arith.mulf %387, %390 : vector<16x128xf32>
    %c80_354 = arith.constant 80 : index
    %c0_355 = arith.constant 0 : index
    %392 = vector.load %arg21[%c80_354, %c0_355] : memref<144x128xf32, #tpu.memory_space<vmem>>, vector<16x128xf32>
    tpu.vector_store %arg21[%c80_354, %c0_355], %391 {strides = array<i32>} : memref<144x128xf32, #tpu.memory_space<vmem>>, vector<16x128xf32>,
    %c121_i32_356 = arith.constant 121 : i32
    %393 = tpu.dynamic_rotate %360 by %c121_i32_356 dim 1 : vector<16x128xf32>, i32 -> vector<16x128xf32>
    %c6_357 = arith.constant 6 : index
    %c0_358 = arith.constant 0 : index
    %c0_359 = arith.constant 0 : index
    %394 = vector.load %arg3[%c6_357, %c0_358, %c0_359] : memref<9x1x128xf32, #tpu.memory_space<vmem>>, vector<1x1x128xf32>
    %395 = vector.shape_cast %394 : vector<1x1x128xf32> to vector<1x128xf32>
    %396 = vector.broadcast %395 : vector<1x128xf32> to vector<16x128xf32>
    %397 = arith.mulf %393, %396 : vector<16x128xf32>
    %c96_360 = arith.constant 96 : index
    %c0_361 = arith.constant 0 : index
    %398 = vector.load %arg21[%c96_360, %c0_361] : memref<144x128xf32, #tpu.memory_space<vmem>>, vector<16x128xf32>
    tpu.vector_store %arg21[%c96_360, %c0_361], %397 {strides = array<i32>} : memref<144x128xf32, #tpu.memory_space<vmem>>, vector<16x128xf32>,
    %c120_i32_362 = arith.constant 120 : i32
    %399 = tpu.dynamic_rotate %360 by %c120_i32_362 dim 1 : vector<16x128xf32>, i32 -> vector<16x128xf32>
    %c7_363 = arith.constant 7 : index
    %c0_364 = arith.constant 0 : index
    %c0_365 = arith.constant 0 : index
    %400 = vector.load %arg3[%c7_363, %c0_364, %c0_365] : memref<9x1x128xf32, #tpu.memory_space<vmem>>, vector<1x1x128xf32>
    %401 = vector.shape_cast %400 : vector<1x1x128xf32> to vector<1x128xf32>
    %402 = vector.broadcast %401 : vector<1x128xf32> to vector<16x128xf32>
    %403 = arith.mulf %399, %402 : vector<16x128xf32>
    %c112_366 = arith.constant 112 : index
    %c0_367 = arith.constant 0 : index
    %404 = vector.load %arg21[%c112_366, %c0_367] : memref<144x128xf32, #tpu.memory_space<vmem>>, vector<16x128xf32>
    tpu.vector_store %arg21[%c112_366, %c0_367], %403 {strides = array<i32>} : memref<144x128xf32, #tpu.memory_space<vmem>>, vector<16x128xf32>,
    %c119_i32_368 = arith.constant 119 : i32
    %405 = tpu.dynamic_rotate %360 by %c119_i32_368 dim 1 : vector<16x128xf32>, i32 -> vector<16x128xf32>
    %c8_369 = arith.constant 8 : index
    %c0_370 = arith.constant 0 : index
    %c0_371 = arith.constant 0 : index
    %406 = vector.load %arg3[%c8_369, %c0_370, %c0_371] : memref<9x1x128xf32, #tpu.memory_space<vmem>>, vector<1x1x128xf32>
    %407 = vector.shape_cast %406 : vector<1x1x128xf32> to vector<1x128xf32>
    %408 = vector.broadcast %407 : vector<1x128xf32> to vector<16x128xf32>
    %409 = arith.mulf %405, %408 : vector<16x128xf32>
    %c128_372 = arith.constant 128 : index
    %c0_373 = arith.constant 0 : index
    %410 = vector.load %arg21[%c128_372, %c0_373] : memref<144x128xf32, #tpu.memory_space<vmem>>, vector<16x128xf32>
    tpu.vector_store %arg21[%c128_372, %c0_373], %409 {strides = array<i32>} : memref<144x128xf32, #tpu.memory_space<vmem>>, vector<16x128xf32>,
    %c0_374 = arith.constant 0 : index
    %c0_375 = arith.constant 0 : index
    %411 = vector.load %arg12[%c0_374, %c0_375] : memref<16x144xbf16, #tpu.memory_space<vmem>>, vector<16x144xbf16>
    %c0_376 = arith.constant 0 : index
    %c0_377 = arith.constant 0 : index
    %412 = vector.load %arg21[%c0_376, %c0_377] : memref<144x128xf32, #tpu.memory_space<vmem>>, vector<144x128xf32>
    %413 = arith.truncf %412 : vector<144x128xf32> to vector<144x128xbf16>
    %cst_378 = arith.constant dense<0.000000e+00> : vector<16x128xf32>
    %414 = tpu.matmul %411, %413, %cst_378 {dimension_numbers = #tpu.dot_dimension_numbers<[1], [0], [0], [1], [0, 0, 1, 1], [], []>} : vector<16x144xbf16>, vector<144x128xbf16>, vector<16x128xf32> -> vector<16x128xf32>
    %415 = vector.broadcast %361 : vector<16x1xf32> to vector<16x128xf32>
    %416 = arith.addf %414, %415 : vector<16x128xf32>
    %cst_379 = arith.constant 0.000000e+00 : f32
    %417 = vector.broadcast %cst_379 : f32 to vector<16x128xf32>
    %418 = arith.maximumf %416, %417 : vector<16x128xf32>
    %c0_380 = arith.constant 0 : index
    %c5_381 = arith.constant 5 : index
    %419 = vector.load %arg16[%c0_380, %c5_381] : memref<16x6xf32, #tpu.memory_space<vmem>>, vector<16x1xf32>
    %c9_i32_382 = arith.constant 9 : i32
    %420 = tpu.dynamic_rotate %418 by %c9_i32_382 dim 1 : vector<16x128xf32>, i32 -> vector<16x128xf32>
    %c0_383 = arith.constant 0 : index
    %c0_384 = arith.constant 0 : index
    %c0_385 = arith.constant 0 : index
    %421 = vector.load %arg3[%c0_383, %c0_384, %c0_385] : memref<9x1x128xf32, #tpu.memory_space<vmem>>, vector<1x1x128xf32>
    %422 = vector.shape_cast %421 : vector<1x1x128xf32> to vector<1x128xf32>
    %423 = vector.broadcast %422 : vector<1x128xf32> to vector<16x128xf32>
    %424 = arith.mulf %420, %423 : vector<16x128xf32>
    %c0_386 = arith.constant 0 : index
    %c0_387 = arith.constant 0 : index
    %425 = vector.load %arg21[%c0_386, %c0_387] : memref<144x128xf32, #tpu.memory_space<vmem>>, vector<16x128xf32>
    tpu.vector_store %arg21[%c0_386, %c0_387], %424 {strides = array<i32>} : memref<144x128xf32, #tpu.memory_space<vmem>>, vector<16x128xf32>,
    %c8_i32_388 = arith.constant 8 : i32
    %426 = tpu.dynamic_rotate %418 by %c8_i32_388 dim 1 : vector<16x128xf32>, i32 -> vector<16x128xf32>
    %c1_389 = arith.constant 1 : index
    %c0_390 = arith.constant 0 : index
    %c0_391 = arith.constant 0 : index
    %427 = vector.load %arg3[%c1_389, %c0_390, %c0_391] : memref<9x1x128xf32, #tpu.memory_space<vmem>>, vector<1x1x128xf32>
    %428 = vector.shape_cast %427 : vector<1x1x128xf32> to vector<1x128xf32>
    %429 = vector.broadcast %428 : vector<1x128xf32> to vector<16x128xf32>
    %430 = arith.mulf %426, %429 : vector<16x128xf32>
    %c16_392 = arith.constant 16 : index
    %c0_393 = arith.constant 0 : index
    %431 = vector.load %arg21[%c16_392, %c0_393] : memref<144x128xf32, #tpu.memory_space<vmem>>, vector<16x128xf32>
    tpu.vector_store %arg21[%c16_392, %c0_393], %430 {strides = array<i32>} : memref<144x128xf32, #tpu.memory_space<vmem>>, vector<16x128xf32>,
    %c7_i32_394 = arith.constant 7 : i32
    %432 = tpu.dynamic_rotate %418 by %c7_i32_394 dim 1 : vector<16x128xf32>, i32 -> vector<16x128xf32>
    %c2_395 = arith.constant 2 : index
    %c0_396 = arith.constant 0 : index
    %c0_397 = arith.constant 0 : index
    %433 = vector.load %arg3[%c2_395, %c0_396, %c0_397] : memref<9x1x128xf32, #tpu.memory_space<vmem>>, vector<1x1x128xf32>
    %434 = vector.shape_cast %433 : vector<1x1x128xf32> to vector<1x128xf32>
    %435 = vector.broadcast %434 : vector<1x128xf32> to vector<16x128xf32>
    %436 = arith.mulf %432, %435 : vector<16x128xf32>
    %c32_398 = arith.constant 32 : index
    %c0_399 = arith.constant 0 : index
    %437 = vector.load %arg21[%c32_398, %c0_399] : memref<144x128xf32, #tpu.memory_space<vmem>>, vector<16x128xf32>
    tpu.vector_store %arg21[%c32_398, %c0_399], %436 {strides = array<i32>} : memref<144x128xf32, #tpu.memory_space<vmem>>, vector<16x128xf32>,
    %c1_i32_400 = arith.constant 1 : i32
    %438 = tpu.dynamic_rotate %418 by %c1_i32_400 dim 1 : vector<16x128xf32>, i32 -> vector<16x128xf32>
    %c3_401 = arith.constant 3 : index
    %c0_402 = arith.constant 0 : index
    %c0_403 = arith.constant 0 : index
    %439 = vector.load %arg3[%c3_401, %c0_402, %c0_403] : memref<9x1x128xf32, #tpu.memory_space<vmem>>, vector<1x1x128xf32>
    %440 = vector.shape_cast %439 : vector<1x1x128xf32> to vector<1x128xf32>
    %441 = vector.broadcast %440 : vector<1x128xf32> to vector<16x128xf32>
    %442 = arith.mulf %438, %441 : vector<16x128xf32>
    %c48_404 = arith.constant 48 : index
    %c0_405 = arith.constant 0 : index
    %443 = vector.load %arg21[%c48_404, %c0_405] : memref<144x128xf32, #tpu.memory_space<vmem>>, vector<16x128xf32>
    tpu.vector_store %arg21[%c48_404, %c0_405], %442 {strides = array<i32>} : memref<144x128xf32, #tpu.memory_space<vmem>>, vector<16x128xf32>,
    %c64_406 = arith.constant 64 : index
    %c0_407 = arith.constant 0 : index
    %444 = vector.load %arg21[%c64_406, %c0_407] : memref<144x128xf32, #tpu.memory_space<vmem>>, vector<16x128xf32>
    tpu.vector_store %arg21[%c64_406, %c0_407], %418 {strides = array<i32>} : memref<144x128xf32, #tpu.memory_space<vmem>>, vector<16x128xf32>,
    %c127_i32_408 = arith.constant 127 : i32
    %445 = tpu.dynamic_rotate %418 by %c127_i32_408 dim 1 : vector<16x128xf32>, i32 -> vector<16x128xf32>
    %c5_409 = arith.constant 5 : index
    %c0_410 = arith.constant 0 : index
    %c0_411 = arith.constant 0 : index
    %446 = vector.load %arg3[%c5_409, %c0_410, %c0_411] : memref<9x1x128xf32, #tpu.memory_space<vmem>>, vector<1x1x128xf32>
    %447 = vector.shape_cast %446 : vector<1x1x128xf32> to vector<1x128xf32>
    %448 = vector.broadcast %447 : vector<1x128xf32> to vector<16x128xf32>
    %449 = arith.mulf %445, %448 : vector<16x128xf32>
    %c80_412 = arith.constant 80 : index
    %c0_413 = arith.constant 0 : index
    %450 = vector.load %arg21[%c80_412, %c0_413] : memref<144x128xf32, #tpu.memory_space<vmem>>, vector<16x128xf32>
    tpu.vector_store %arg21[%c80_412, %c0_413], %449 {strides = array<i32>} : memref<144x128xf32, #tpu.memory_space<vmem>>, vector<16x128xf32>,
    %c121_i32_414 = arith.constant 121 : i32
    %451 = tpu.dynamic_rotate %418 by %c121_i32_414 dim 1 : vector<16x128xf32>, i32 -> vector<16x128xf32>
    %c6_415 = arith.constant 6 : index
    %c0_416 = arith.constant 0 : index
    %c0_417 = arith.constant 0 : index
    %452 = vector.load %arg3[%c6_415, %c0_416, %c0_417] : memref<9x1x128xf32, #tpu.memory_space<vmem>>, vector<1x1x128xf32>
    %453 = vector.shape_cast %452 : vector<1x1x128xf32> to vector<1x128xf32>
    %454 = vector.broadcast %453 : vector<1x128xf32> to vector<16x128xf32>
    %455 = arith.mulf %451, %454 : vector<16x128xf32>
    %c96_418 = arith.constant 96 : index
    %c0_419 = arith.constant 0 : index
    %456 = vector.load %arg21[%c96_418, %c0_419] : memref<144x128xf32, #tpu.memory_space<vmem>>, vector<16x128xf32>
    tpu.vector_store %arg21[%c96_418, %c0_419], %455 {strides = array<i32>} : memref<144x128xf32, #tpu.memory_space<vmem>>, vector<16x128xf32>,
    %c120_i32_420 = arith.constant 120 : i32
    %457 = tpu.dynamic_rotate %418 by %c120_i32_420 dim 1 : vector<16x128xf32>, i32 -> vector<16x128xf32>
    %c7_421 = arith.constant 7 : index
    %c0_422 = arith.constant 0 : index
    %c0_423 = arith.constant 0 : index
    %458 = vector.load %arg3[%c7_421, %c0_422, %c0_423] : memref<9x1x128xf32, #tpu.memory_space<vmem>>, vector<1x1x128xf32>
    %459 = vector.shape_cast %458 : vector<1x1x128xf32> to vector<1x128xf32>
    %460 = vector.broadcast %459 : vector<1x128xf32> to vector<16x128xf32>
    %461 = arith.mulf %457, %460 : vector<16x128xf32>
    %c112_424 = arith.constant 112 : index
    %c0_425 = arith.constant 0 : index
    %462 = vector.load %arg21[%c112_424, %c0_425] : memref<144x128xf32, #tpu.memory_space<vmem>>, vector<16x128xf32>
    tpu.vector_store %arg21[%c112_424, %c0_425], %461 {strides = array<i32>} : memref<144x128xf32, #tpu.memory_space<vmem>>, vector<16x128xf32>,
    %c119_i32_426 = arith.constant 119 : i32
    %463 = tpu.dynamic_rotate %418 by %c119_i32_426 dim 1 : vector<16x128xf32>, i32 -> vector<16x128xf32>
    %c8_427 = arith.constant 8 : index
    %c0_428 = arith.constant 0 : index
    %c0_429 = arith.constant 0 : index
    %464 = vector.load %arg3[%c8_427, %c0_428, %c0_429] : memref<9x1x128xf32, #tpu.memory_space<vmem>>, vector<1x1x128xf32>
    %465 = vector.shape_cast %464 : vector<1x1x128xf32> to vector<1x128xf32>
    %466 = vector.broadcast %465 : vector<1x128xf32> to vector<16x128xf32>
    %467 = arith.mulf %463, %466 : vector<16x128xf32>
    %c128_430 = arith.constant 128 : index
    %c0_431 = arith.constant 0 : index
    %468 = vector.load %arg21[%c128_430, %c0_431] : memref<144x128xf32, #tpu.memory_space<vmem>>, vector<16x128xf32>
    tpu.vector_store %arg21[%c128_430, %c0_431], %467 {strides = array<i32>} : memref<144x128xf32, #tpu.memory_space<vmem>>, vector<16x128xf32>,
    %c0_432 = arith.constant 0 : index
    %c0_433 = arith.constant 0 : index
    %469 = vector.load %arg13[%c0_432, %c0_433] : memref<16x144xbf16, #tpu.memory_space<vmem>>, vector<16x144xbf16>
    %c0_434 = arith.constant 0 : index
    %c0_435 = arith.constant 0 : index
    %470 = vector.load %arg21[%c0_434, %c0_435] : memref<144x128xf32, #tpu.memory_space<vmem>>, vector<144x128xf32>
    %471 = arith.truncf %470 : vector<144x128xf32> to vector<144x128xbf16>
    %cst_436 = arith.constant dense<0.000000e+00> : vector<16x128xf32>
    %472 = tpu.matmul %469, %471, %cst_436 {dimension_numbers = #tpu.dot_dimension_numbers<[1], [0], [0], [1], [0, 0, 1, 1], [], []>} : vector<16x144xbf16>, vector<144x128xbf16>, vector<16x128xf32> -> vector<16x128xf32>
    %473 = vector.broadcast %419 : vector<16x1xf32> to vector<16x128xf32>
    %474 = arith.addf %472, %473 : vector<16x128xf32>
    %475 = arith.addf %474, %360 : vector<16x128xf32>
    %cst_437 = arith.constant 0.000000e+00 : f32
    %476 = vector.broadcast %cst_437 : f32 to vector<16x128xf32>
    %477 = arith.maximumf %475, %476 : vector<16x128xf32>
    %c0_438 = arith.constant 0 : index
    %c0_439 = arith.constant 0 : index
    %478 = vector.load %arg5[%c0_438, %c0_439] : memref<128x2xf32, #tpu.memory_space<vmem>>, vector<128x2xf32>
    %cst_440 = arith.constant dense<0.000000e+00> : vector<16x2xf32>
    %479 = tpu.matmul %477, %478, %cst_440 {dimension_numbers = #tpu.dot_dimension_numbers<[1], [0], [0], [1], [0, 0, 1, 1], [], []>} : vector<16x128xf32>, vector<128x2xf32>, vector<16x2xf32> -> vector<16x2xf32>
    %c0_441 = arith.constant 0 : index
    %c0_442 = arith.constant 0 : index
    %480 = vector.load %arg17[%c0_441, %c0_442] : memref<10x16xf32, #tpu.memory_space<vmem>>, vector<10x16xf32>
    %cst_443 = arith.constant dense<0.000000e+00> : vector<10x2xf32>
    %481 = tpu.matmul %480, %479, %cst_443 {dimension_numbers = #tpu.dot_dimension_numbers<[1], [0], [0], [1], [0, 0, 1, 1], [], []>} : vector<10x16xf32>, vector<16x2xf32>, vector<10x2xf32> -> vector<10x2xf32>
    %c0_444 = arith.constant 0 : index
    %c0_445 = arith.constant 0 : index
    %482 = vector.load %arg18[%c0_444, %c0_445] : memref<10x1xf32, #tpu.memory_space<vmem>>, vector<10x1xf32>
    %483 = vector.broadcast %482 : vector<10x1xf32> to vector<10x2xf32>
    %484 = arith.addf %481, %483 : vector<10x2xf32>
    %cst_446 = arith.constant dense<0xFF800000> : vector<2xf32>
    %485 = vector.multi_reduction <maximumf>, %484, %cst_446 [0] : vector<10x2xf32> to vector<2xf32>
    %486 = vector.shape_cast %485 : vector<2xf32> to vector<1x2xf32>
    %487 = vector.broadcast %486 : vector<1x2xf32> to vector<10x2xf32>
    %488 = arith.subf %484, %487 : vector<10x2xf32>
    %489 = math.exp %488 : vector<10x2xf32>
    %cst_447 = arith.constant dense<0.000000e+00> : vector<2xf32>
    %490 = vector.multi_reduction <add>, %489, %cst_447 [0] : vector<10x2xf32> to vector<2xf32>
    %491 = vector.shape_cast %490 : vector<2xf32> to vector<1x2xf32>
    %492 = math.log %491 : vector<1x2xf32>
    %493 = vector.broadcast %492 : vector<1x2xf32> to vector<10x2xf32>
    %494 = arith.subf %488, %493 : vector<10x2xf32>
    %c0_448 = arith.constant 0 : index
    %c0_449 = arith.constant 0 : index
    %c0_450 = arith.constant 0 : index
    %495 = vector.load %arg19[%c0_448, %c0_449, %c0_450] : memref<1x10x2xf32, #tpu.memory_space<vmem>>, vector<1x10x2xf32>
    %496 = vector.shape_cast %495 : vector<1x10x2xf32> to vector<10x2xf32>
    %497 = vector.shape_cast %494 : vector<10x2xf32> to vector<1x10x2xf32>
    tpu.vector_store %arg19[%c0_448, %c0_449, %c0_450], %497 {strides = array<i32>} : memref<1x10x2xf32, #tpu.memory_space<vmem>>, vector<1x10x2xf32>,
    return
  }
  func.func @transform_0(%arg0: i32) -> (i32, i32, i32) {
    %c0_i32 = arith.constant 0 : i32
    %c0_i32_0 = arith.constant 0 : i32
    %c0_i32_1 = arith.constant 0 : i32
    return %arg0, %c0_i32, %c0_i32_0 : i32, i32, i32
  }
  func.func @transform_1(%arg0: i32) -> (i32, i32, i32) {
    %c0_i32 = arith.constant 0 : i32
    %c0_i32_0 = arith.constant 0 : i32
    %c0_i32_1 = arith.constant 0 : i32
    %c0_i32_2 = arith.constant 0 : i32
    return %c0_i32, %c0_i32_0, %c0_i32_1 : i32, i32, i32
  }
  func.func @transform_2(%arg0: i32) -> (i32, i32, i32) {
    %c0_i32 = arith.constant 0 : i32
    %c0_i32_0 = arith.constant 0 : i32
    %c0_i32_1 = arith.constant 0 : i32
    %c0_i32_2 = arith.constant 0 : i32
    return %c0_i32, %c0_i32_0, %c0_i32_1 : i32, i32, i32
  }
  func.func @transform_3(%arg0: i32) -> (i32, i32) {
    %c0_i32 = arith.constant 0 : i32
    %c0_i32_0 = arith.constant 0 : i32
    %c0_i32_1 = arith.constant 0 : i32
    return %c0_i32, %c0_i32_0 : i32, i32
  }
  func.func @transform_4(%arg0: i32) -> (i32, i32) {
    %c0_i32 = arith.constant 0 : i32
    %c0_i32_0 = arith.constant 0 : i32
    %c0_i32_1 = arith.constant 0 : i32
    return %c0_i32, %c0_i32_0 : i32, i32
  }
  func.func @transform_5(%arg0: i32) -> (i32, i32) {
    %c0_i32 = arith.constant 0 : i32
    %c0_i32_0 = arith.constant 0 : i32
    %c0_i32_1 = arith.constant 0 : i32
    return %c0_i32, %c0_i32_0 : i32, i32
  }
  func.func @transform_6(%arg0: i32) -> (i32, i32) {
    %c0_i32 = arith.constant 0 : i32
    %c0_i32_0 = arith.constant 0 : i32
    %c0_i32_1 = arith.constant 0 : i32
    return %c0_i32, %c0_i32_0 : i32, i32
  }
  func.func @transform_7(%arg0: i32) -> (i32, i32) {
    %c0_i32 = arith.constant 0 : i32
    %c0_i32_0 = arith.constant 0 : i32
    %c0_i32_1 = arith.constant 0 : i32
    return %c0_i32, %c0_i32_0 : i32, i32
  }
  func.func @transform_8(%arg0: i32) -> (i32, i32) {
    %c0_i32 = arith.constant 0 : i32
    %c0_i32_0 = arith.constant 0 : i32
    %c0_i32_1 = arith.constant 0 : i32
    return %c0_i32, %c0_i32_0 : i32, i32
  }
  func.func @transform_9(%arg0: i32) -> (i32, i32) {
    %c0_i32 = arith.constant 0 : i32
    %c0_i32_0 = arith.constant 0 : i32
    %c0_i32_1 = arith.constant 0 : i32
    return %c0_i32, %c0_i32_0 : i32, i32
  }
  func.func @transform_10(%arg0: i32) -> (i32, i32) {
    %c0_i32 = arith.constant 0 : i32
    %c0_i32_0 = arith.constant 0 : i32
    %c0_i32_1 = arith.constant 0 : i32
    return %c0_i32, %c0_i32_0 : i32, i32
  }
  func.func @transform_11(%arg0: i32) -> (i32, i32) {
    %c0_i32 = arith.constant 0 : i32
    %c0_i32_0 = arith.constant 0 : i32
    %c0_i32_1 = arith.constant 0 : i32
    return %c0_i32, %c0_i32_0 : i32, i32
  }
  func.func @transform_12(%arg0: i32) -> (i32, i32) {
    %c0_i32 = arith.constant 0 : i32
    %c0_i32_0 = arith.constant 0 : i32
    %c0_i32_1 = arith.constant 0 : i32
    return %c0_i32, %c0_i32_0 : i32, i32
  }
  func.func @transform_13(%arg0: i32) -> (i32, i32) {
    %c0_i32 = arith.constant 0 : i32
    %c0_i32_0 = arith.constant 0 : i32
    %c0_i32_1 = arith.constant 0 : i32
    return %c0_i32, %c0_i32_0 : i32, i32
  }
  func.func @transform_14(%arg0: i32) -> (i32, i32) {
    %c0_i32 = arith.constant 0 : i32
    %c0_i32_0 = arith.constant 0 : i32
    %c0_i32_1 = arith.constant 0 : i32
    return %c0_i32, %c0_i32_0 : i32, i32
  }
  func.func @transform_15(%arg0: i32) -> (i32, i32) {
    %c0_i32 = arith.constant 0 : i32
    %c0_i32_0 = arith.constant 0 : i32
    %c0_i32_1 = arith.constant 0 : i32
    return %c0_i32, %c0_i32_0 : i32, i32
  }
  func.func @transform_16(%arg0: i32) -> (i32, i32) {
    %c0_i32 = arith.constant 0 : i32
    %c0_i32_0 = arith.constant 0 : i32
    %c0_i32_1 = arith.constant 0 : i32
    return %c0_i32, %c0_i32_0 : i32, i32
  }
  func.func @transform_17(%arg0: i32) -> (i32, i32) {
    %c0_i32 = arith.constant 0 : i32
    %c0_i32_0 = arith.constant 0 : i32
    %c0_i32_1 = arith.constant 0 : i32
    return %c0_i32, %c0_i32_0 : i32, i32
  }
  func.func @transform_18(%arg0: i32) -> (i32, i32, i32) {
    %c0_i32 = arith.constant 0 : i32
    %c0_i32_0 = arith.constant 0 : i32
    %c0_i32_1 = arith.constant 0 : i32
    return %arg0, %c0_i32, %c0_i32_0 : i32, i32, i32
  }
}

</mosaic_0001>

<bundles_post_ra>
// kernel: _lambda_.1
= control target key start
LH: loop header
LB: loop body
LE: loop exit
PB: predicated region body
PF: predicated region fallthrough
CT: control target
= control target key end

     0   :  { %s5508_s0 = inlined_call_operand.vmem [shape: f32[1,8,512], index: 0, kind: input, shape index: {}]   ;;  %s5509_s1 = inlined_call_operand.vmem [shape: f32[9,1,512], index: 1, kind: input, shape index: {}]   ;;  %s5510_s2 = inlined_call_operand.vmem [shape: f32[9,1,128], index: 2, kind: input, shape index: {}]   ;;  %s5511_s3 = inlined_call_operand.vmem [shape: bf16[512,128], index: 3, kind: input, shape index: {}]   ;;  %s5512_s4 = inlined_call_operand.vmem [shape: f32[128,2], index: 4, kind: input, shape index: {}]   ;;  %s5513_s5 = inlined_call_operand.hbm [shape: bf16[8,72], index: 5, kind: input, shape index: {}]   ;;  %s5514_s6 = inlined_call_operand.vmem [shape: bf16[8,72], index: 6, kind: input, shape index: {}]   ;;  %s5515_s7 = inlined_call_operand.vmem [shape: bf16[16,72], index: 7, kind: input, shape index: {}]   ;;  %s5516_s8 = inlined_call_operand.vmem [shape: bf16[16,144], index: 8, kind: input, shape index: {}]   ;;  %s5517_s9 = inlined_call_operand.vmem [shape: bf16[16,144], index: 9, kind: input, shape index: {}]   ;;  %s5518_s10 = inlined_call_operand.vmem [shape: bf16[16,144], index: 10, kind: input, shape index: {}]   ;;  %s5519_s11 = inlined_call_operand.vmem [shape: bf16[16,144], index: 11, kind: input, shape index: {}]   ;;  %s5520_s12 = inlined_call_operand.vmem [shape: bf16[16,144], index: 12, kind: input, shape index: {}]   ;;  %s5521_s13 = inlined_call_operand.vmem [shape: bf16[16,8], index: 13, kind: input, shape index: {}]   ;;  %s5522_s14 = inlined_call_operand.hbm [shape: f32[8,2], index: 14, kind: input, shape index: {}]   ;;  %s5523_s15 = inlined_call_operand.vmem [shape: f32[16,6], index: 15, kind: input, shape index: {}]   ;;  %s5524_s16 = inlined_call_operand.vmem [shape: f32[10,16], index: 16, kind: input, shape index: {}]   ;;  %s5525_s17 = inlined_call_operand.vmem [shape: f32[10,1], index: 17, kind: input, shape index: {}]   ;;  %s5526_s18 = inlined_call_operand.vmem [shape: f32[1,10,2], index: 18, kind: output, shape index: {}]  }
   0x1   :  { %5530 = sst [smem:[#allocation10_spill]] %s5508_s0 }
   0x2   :  { %5531 = sst [smem:[#allocation11_spill]] %s5509_s1 }
   0x3   :  { %5532 = sst [smem:[#allocation12_spill]] %s5510_s2 }
   0x4   :  { %23 = vsyncpa [#allocation5], 0 }
   0x5   :  { %24 = vsyncpa [#allocation7], 0  ;;  %s3962_s27 = smov [#allocation4]   ;;  %s3963_s29 = smov [#allocation6]  }
   0x6   :  { %s41_s28 = sshll.u32 %s3962_s27, 4  ;;  %s67_s30 = sshll.u32 %s3963_s29, 4  ;;  %s42_s28 = int_to_ptr.vmem [resolvable:$true] %s41_s28  ;;  %s68_s30 = int_to_ptr.vmem [resolvable:$true] %s67_s30 }
   0x7   :  { %s3914_s1 = scalar_lea.hbm %s5513_s5, 64 }
   0x8   :  { %p3915_p0 = scmp.ne.s32.totalorder %s5513_s5, %s3914_s1  ;;  %p3918_p1 = scmp.lt.u32.totalorder %s3914_s1, %s5513_s5 }
   0xa   :  { %p3920_p2 = pnand %p3918_p1, %p3915_p0 }
   0xc   :  { %3923 = shalt.err (!%p3920_p2)
}
   0xd   :  { %s3924_s23 = scalar_lea.vmem %s42_s28, 64  ;;  %p3929_p4 = scmp.lt.s32.totalorder %s42_s28, %s42_s28 }
   0xe   :  { %p3925_p3 = scmp.ne.s32.totalorder %s42_s28, %s3924_s23  ;;  %p3930_p5 = scmp.lt.s32.totalorder %s3924_s23, %s3924_s23 }
  0x10   :  { %p3931_p6 = por %p3930_p5, %p3929_p4 }
  0x12   :  { %p3932_p7 = pnand %p3931_p6, %p3925_p3 }
  0x14   :  { %3935 = shalt.err (!%p3932_p7)
}
  0x15   :  { %44 = dma.hbm_to_vmem [thread:$0]  %s5513_s5, 64, %s42_s28, [#allocation5]  }
  0x16   :  { %s3936_s29 = scalar_lea.hbm %s5522_s14, 128 }
  0x17   :  { %p3937_p8 = scmp.ne.s32.totalorder %s5522_s14, %s3936_s29  ;;  %p3940_p9 = scmp.lt.u32.totalorder %s3936_s29, %s5522_s14 }
  0x19   :  { %p3942_p10 = pnand %p3940_p9, %p3937_p8 }
  0x1b   :  { %3945 = shalt.err (!%p3942_p10)
}
  0x1c   :  { %s3946_s21 = scalar_lea.vmem %s68_s30, 128  ;;  %p3951_p12 = scmp.lt.s32.totalorder %s68_s30, %s68_s30 }
  0x1d   :  { %p3947_p11 = scmp.ne.s32.totalorder %s68_s30, %s3946_s21  ;;  %p3952_p13 = scmp.lt.s32.totalorder %s3946_s21, %s3946_s21 }
  0x1f   :  { %p3953_p0 = por %p3952_p13, %p3951_p12 }
  0x21   :  { %p3954_p1 = pnand %p3953_p0, %p3947_p11 }
  0x23   :  { %3957 = shalt.err (!%p3954_p1)
}
  0x24   :  { %70 = dma.hbm_to_vmem [thread:$0]  %s5522_s14, 128, %s68_s30, [#allocation7]  }
  0x25   :  { %3958 = dma.done.wait [#allocation5], 64  }
  0x26   :  { %3959 = vsyncadd [#allocation5], 4294967232 }
  0x27   :  { %3960 = dma.done.wait [#allocation7], 128  }
  0x28   :  { %3961 = vsyncadd [#allocation7], 4294967168  ;;  %s5533_s23 = sld [smem:[#allocation10_spill]]  ;;  %s3964_s26 = smov 17   ;;  %v3971_v4 = vmov 0   ;;  %v4193_v5 = vld [vmem:[#allocation6] sm:$0xff]  ;;  %v97_v6 = vlaneseq }
  0x29   :  { %s3965_s0 = smov 16   ;;  %s3966_s19 = smov 15   ;;  %557 = vmatprep.mubr.bf16.mxu0 %v3971_v4  ;;  %598 = vmatprep.mubr.bf16.mxu1 %v3971_v4  ;;  %vm512_vm8 = vcmask 1043456   ;;  %vm508_vm9 = vcmask 588800   ;;  %vm3975_vm10 = vmmov 0   ;;  %vm2077_vm11 = vcmask 64512  }
  0x2a   :  { %s3967_s1 = smov 1   ;;  %s3968_s20 = smov 127   ;;  %3839 = vset.pattern.permute.xlu0 %v3971_v4  ;;  %3842 = vset.pattern.permute.xlu1 %v3971_v4  ;;  %v107_v7 = vshrl.u32 %v97_v6, 7  ;;  %v4196_v10 = vand.u32 127, %v97_v6  ;;  %vm2304_vm12 = vcmask 130048   ;;  %vm3417_vm13 = vcmask 9216  }
  0x2b   :  { %s3969_s21 = smov 113   ;;  %s3970_s5 = smov 112   ;;  %vm3415_vm14 = vcmask 15360  }
  0x2c   :  { %s3972_s28 = smov 111   ;;  %v4198_v11 = vsub.s32 1, %v107_v7  ;;  %s5534_s24 = sld [smem:[#allocation11_spill]]  ;;  %vm99_vm0 = vcmp.lt.s32.totalorder %v4196_v10, 17  ;;  %v4207_v14 = vsub.s32 0, %v107_v7  ;;  %v4209_v15 = vsub.s32 2, %v107_v7 }
  0x2d   :  { %v4211_v16 = vsub.s32 3, %v107_v7  ;;  %vm142_vm1 = vcmp.lt.s32.totalorder %v4196_v10, 16  ;;  %vm186_vm2 = vcmp.lt.s32.totalorder %v4196_v10, 15  ;;  %vm230_vm3 = vcmp.lt.s32.totalorder %v4196_v10, 1  ;;  %s5535_s30 = sld [smem:[#allocation12_spill]] }
  0x2e   :  { %v4108_v0 = vld [vmem:[%s5533_s23 + $0x10] sm:$0xff]  ;;  %v4113_v1 = vld [vmem:[%s5533_s23] sm:$0xff]  ;;  %v4122_v2 = vld [vmem:[%s5533_s23 + $0x18] sm:$0xff]  ;;  %vm278_vm4 = vcmp.lt.s32.totalorder %v4196_v10, 127  ;;  %vm366_vm5 = vcmp.lt.s32.totalorder %v4196_v10, 112  ;;  %vm322_vm6 = vcmp.lt.s32.totalorder %v4196_v10, 113 }
  0x2f   :  { %93 = vrot.lane.b32.xlu1 %v4108_v0, %s3964_s26  ;;  %89 = vrot.lane.b32.xlu0 %v4113_v1, %s3964_s26  ;;  %v4127_v3 = vld [vmem:[%s5533_s23 + $0x8] sm:$0xff]  ;;  %vm410_vm7 = vcmp.lt.s32.totalorder %v4196_v10, 111 }
  0x30   :  { %v4797_v10 = vld [vmem:[%s5511_s3 + $0x48] sm:$0xff]  }
  0x32   :  { %v104_v12 = vld [vmem:[%s5534_s24] sm:$0xf]  ;;  %v3453_v13 = vld [vmem:[%s5534_s24 + $0x4] sm:$0xf]  ;;  %v3454_v53 = vld [vmem:[%s5534_s24 + $0x8] sm:$0xf] }
  0x33   :  { %95 = vrot.lane.b32.xlu1 %v4122_v2, %s3964_s26  ;;  %91 = vrot.lane.b32.xlu0 %v4127_v3, %s3964_s26  ;;  %v113_v19 = vrot.slane %v104_v12, %v4198_v11  ;;  %v157_v20 = vrot.slane %v3453_v13, %v4198_v11  ;;  %v109_v24 = vrot.slane %v104_v12, %v4207_v14  ;;  %v3455_v54 = vld [vmem:[%s5534_s24 + $0xc] sm:$0xf] }
  0x34   :  { %v121_v25 = vrot.slane %v104_v12, %v4211_v16  ;;  %v117_v26 = vrot.slane %v104_v12, %v4209_v15  ;;  %v153_v29 = vrot.slane %v3453_v13, %v4207_v14  ;;  %v165_v30 = vrot.slane %v3453_v13, %v4211_v16 }
  0x35   :  { %v161_v34 = vrot.slane %v3453_v13, %v4209_v15  ;;  %v201_v57 = vrot.slane %v3454_v53, %v4198_v11  ;;  %v245_v58 = vrot.slane %v3455_v54, %v4198_v11  ;;  %v197_v60 = vrot.slane %v3454_v53, %v4207_v14 }
  0x36   :  { %v205_v61 = vrot.slane %v3454_v53, %v4209_v15  ;;  %v209_v62 = vrot.slane %v3454_v53, %v4211_v16  ;;  %v249_v12 = vrot.slane %v3455_v54, %v4209_v15 }
  0x37   :  { %136 = vrot.lane.b32.xlu1 %v4127_v3, %s3965_s0  ;;  %134 = vrot.lane.b32.xlu0 %v4113_v1, %s3965_s0 }
  0x3b   :  { %140 = vrot.lane.b32.xlu1 %v4122_v2, %s3965_s0  ;;  %138 = vrot.lane.b32.xlu0 %v4108_v0, %s3965_s0 }
  0x3f   :  { %180 = vrot.lane.b32.xlu1 %v4127_v3, %s3966_s19  ;;  %178 = vrot.lane.b32.xlu0 %v4113_v1, %s3966_s19 }
  0x43   :  { %184 = vrot.lane.b32.xlu1 %v4122_v2, %s3966_s19  ;;  %182 = vrot.lane.b32.xlu0 %v4108_v0, %s3966_s19 }
  0x47   :  { %224 = vrot.lane.b32.xlu1 %v4127_v3, %s3967_s1  ;;  %222 = vrot.lane.b32.xlu0 %v4113_v1, %s3967_s1 }
  0x4b   :  { %228 = vrot.lane.b32.xlu1 %v4122_v2, %s3967_s1  ;;  %226 = vrot.lane.b32.xlu0 %v4108_v0, %s3967_s1 }
  0x4f   :  { %272 = vrot.lane.b32.xlu1 %v4127_v3, %s3968_s20  ;;  %270 = vrot.lane.b32.xlu0 %v4113_v1, %s3968_s20 }
  0x53   :  { %276 = vrot.lane.b32.xlu1 %v4122_v2, %s3968_s20  ;;  %274 = vrot.lane.b32.xlu0 %v4108_v0, %s3968_s20 }
  0x57   :  { %316 = vrot.lane.b32.xlu1 %v4127_v3, %s3969_s21  ;;  %314 = vrot.lane.b32.xlu0 %v4113_v1, %s3969_s21 }
  0x5b   :  { %320 = vrot.lane.b32.xlu1 %v4122_v2, %s3969_s21  ;;  %318 = vrot.lane.b32.xlu0 %v4108_v0, %s3969_s21 }
  0x5f   :  { %360 = vrot.lane.b32.xlu1 %v4127_v3, %s3970_s5  ;;  %358 = vrot.lane.b32.xlu0 %v4113_v1, %s3970_s5 }
  0x63   :  { %364 = vrot.lane.b32.xlu1 %v4122_v2, %s3970_s5  ;;  %362 = vrot.lane.b32.xlu0 %v4108_v0, %s3970_s5 }
  0x67   :  { %404 = vrot.lane.b32.xlu1 %v4127_v3, %s3972_s28  ;;  %402 = vrot.lane.b32.xlu0 %v4113_v1, %s3972_s28 }
  0x6b   :  { %408 = vrot.lane.b32.xlu1 %v4122_v2, %s3972_s28  ;;  %406 = vrot.lane.b32.xlu0 %v4108_v0, %s3972_s28 }
  0x6f   :  { %505 = vperm.xlu0 %3839, %v4193_v5  }
  0xa1   :  { %v94_v8 = vpop.permute.xlu1 %93  ;;  %v90_v9 = vpop.permute.xlu0 %89 }
  0xa5   :  { %v96_v17 = vpop.permute.xlu1 %95  ;;  %v92_v18 = vpop.permute.xlu0 %91 }
  0xa6   :  { %v102_v21 = vsel %vm99_vm0, %v90_v9, %v92_v18  ;;  %v103_v27 = vsel %vm99_vm0, %v96_v17, %v90_v9  ;;  %v100_v33 = vsel %vm99_vm0, %v94_v8, %v96_v17  ;;  %v101_v35 = vsel %vm99_vm0, %v92_v18, %v94_v8 }
  0xa7   :  { %v127_v31 = vmul.f32 %v113_v19, %v102_v21  ;;  %v126_v39 = vmul.f32 %v109_v24, %v103_v27  ;;  %v129_v42 = vmul.f32 %v121_v25, %v100_v33  ;;  %v128_v46 = vmul.f32 %v117_v26, %v101_v35  ;;  %v3456_v33 = vld [vmem:[%s5534_s24 + $0x14] sm:$0xf] }
  0xa8   :  { %v241_v9 = vrot.slane %v3455_v54, %v4207_v14  ;;  %v253_v19 = vrot.slane %v3455_v54, %v4211_v16 }
  0xa9   :  { %v137_v22 = vpop.permute.xlu1 %136  ;;  %v135_v23 = vpop.permute.xlu0 %134 }
  0xaa   :  { %v145_v28 = vsel %vm142_vm1, %v135_v23, %v137_v22 }
  0xab   :  { %v171_v32 = vmul.f32 %v157_v20, %v145_v28 }
  0xad   :  { %v141_v36 = vpop.permute.xlu1 %140  ;;  %v139_v37 = vpop.permute.xlu0 %138  ;;  %v484_v38 = vpack.c.bf16 %v171_v32, %v127_v31 }
  0xae   :  { %v146_v40 = vsel %vm142_vm1, %v141_v36, %v135_v23  ;;  %v144_v41 = vsel %vm142_vm1, %v137_v22, %v139_v37  ;;  %v143_v43 = vsel %vm142_vm1, %v139_v37, %v141_v36 }
  0xaf   :  { %525 = vmatprep.subr.bf16.mxu0 %v484_v38  ;;  %v170_v44 = vmul.f32 %v153_v29, %v146_v40  ;;  %v173_v45 = vmul.f32 %v165_v30, %v143_v43  ;;  %v172_v47 = vmul.f32 %v161_v34, %v144_v41  ;;  %v301_v40 = vrot.slane %v3456_v33, %v4211_v16 }
  0xb0   :  { %v297_v43 = vrot.slane %v3456_v33, %v4209_v15 }
  0xb1   :  { %v181_v48 = vpop.permute.xlu1 %180  ;;  %v179_v49 = vpop.permute.xlu0 %178  ;;  %v483_v50 = vpack.c.bf16 %v170_v44, %v126_v39  ;;  %v486_v51 = vpack.c.bf16 %v173_v45, %v129_v42  ;;  %v485_v52 = vpack.c.bf16 %v172_v47, %v128_v46  ;;  %v289_v39 = vrot.slane %v3456_v33, %v4207_v14 }
  0xb2   :  { %v189_v59 = vsel %vm186_vm2, %v179_v49, %v181_v48  ;;  %v293_v42 = vrot.slane %v3456_v33, %v4198_v11 }
  0xb3   :  { %526 = vmatpush1.bf16.msra.mxu0 %v483_v50  ;;  %566 = vmatprep.subr.bf16.mxu1 %v486_v51  ;;  %v215_v13 = vmul.f32 %v201_v57, %v189_v59 }
  0xb4   :  { %567 = vmatpush1.bf16.msra.mxu1 %v485_v52 }
  0xb5   :  { %v185_v55 = vpop.permute.xlu1 %184  ;;  %v183_v56 = vpop.permute.xlu0 %182 }
  0xb6   :  { %v190_v7 = vsel %vm186_vm2, %v185_v55, %v179_v49  ;;  %v188_v17 = vsel %vm186_vm2, %v181_v48, %v183_v56  ;;  %v187_v20 = vsel %vm186_vm2, %v183_v56, %v185_v55 }
  0xb7   :  { %v214_v21 = vmul.f32 %v197_v60, %v190_v7  ;;  %v216_v25 = vmul.f32 %v205_v61, %v188_v17  ;;  %v217_v29 = vmul.f32 %v209_v62, %v187_v20  ;;  %v3458_v61 = vld [vmem:[%s5534_s24 + $0x1c] sm:$0xf] }
  0xb8   :  { %v381_v17 = vrot.slane %v3458_v61, %v4198_v11 }
  0xb9   :  { %v225_v63 = vpop.permute.xlu1 %224  ;;  %v223_v6 = vpop.permute.xlu0 %222 }
  0xba   :  { %v233_v8 = vsel %vm230_vm3, %v223_v6, %v225_v63 }
  0xbb   :  { %v259_v18 = vmul.f32 %v245_v58, %v233_v8  ;;  %v377_v8 = vrot.slane %v3458_v61, %v4207_v14 }
  0xbd   :  { %v229_v22 = vpop.permute.xlu1 %228  ;;  %v227_v23 = vpop.permute.xlu0 %226  ;;  %v488_v24 = vpack.c.bf16 %v259_v18, %v215_v13  ;;  %v389_v13 = vrot.slane %v3458_v61, %v4211_v16  ;;  %v385_v18 = vrot.slane %v3458_v61, %v4209_v15  ;;  %v446_v61 = vld [vmem:[#allocation4] sm:$0xf] }
  0xbe   :  { %v234_v26 = vsel %vm230_vm3, %v229_v22, %v223_v6  ;;  %v231_v27 = vsel %vm230_vm3, %v227_v23, %v229_v22  ;;  %v232_v28 = vsel %vm230_vm3, %v225_v63, %v227_v23 }
  0xbf   :  { %v258_v30 = vmul.f32 %v241_v9, %v234_v26  ;;  %v260_v31 = vmul.f32 %v249_v12, %v232_v28  ;;  %v261_v32 = vmul.f32 %v253_v19, %v231_v27  ;;  %527 = vmatprep.subr.bf16.mxu0 %v488_v24  ;;  %v3459_v9 = vld [vmem:[%s5534_s24 + $0x20] sm:$0xf] }
  0xc0   :  { %v421_v26 = vrot.slane %v3459_v9, %v4207_v14 }
  0xc1   :  { %v273_v34 = vpop.permute.xlu1 %272  ;;  %v271_v35 = vpop.permute.xlu0 %270  ;;  %v487_v36 = vpack.c.bf16 %v258_v30, %v214_v21  ;;  %v490_v37 = vpack.c.bf16 %v261_v32, %v217_v29  ;;  %v489_v38 = vpack.c.bf16 %v260_v31, %v216_v25 }
  0xc2   :  { %v281_v41 = vsel %vm278_vm4, %v271_v35, %v273_v34 }
  0xc3   :  { %528 = vmatpush1.bf16.msra.mxu0 %v487_v36  ;;  %568 = vmatprep.subr.bf16.mxu1 %v490_v37  ;;  %v306_v46 = vmul.f32 %v289_v39, %v281_v41 }
  0xc4   :  { %569 = vmatpush1.bf16.msra.mxu1 %v489_v38 }
  0xc5   :  { %v277_v44 = vpop.permute.xlu1 %276  ;;  %v275_v45 = vpop.permute.xlu0 %274  ;;  %v491_v58 = vpack.c.bf16 %v306_v46, %v4113_v1  ;;  %v429_v46 = vrot.slane %v3459_v9, %v4209_v15 }
  0xc6   :  { %v282_v47 = vsel %vm278_vm4, %v277_v44, %v271_v35  ;;  %v279_v48 = vsel %vm278_vm4, %v275_v45, %v277_v44  ;;  %v280_v49 = vsel %vm278_vm4, %v273_v34, %v275_v45  ;;  %v425_v44 = vrot.slane %v3459_v9, %v4198_v11 }
  0xc7   :  { %v309_v50 = vmul.f32 %v301_v40, %v282_v47  ;;  %v307_v51 = vmul.f32 %v293_v42, %v280_v49  ;;  %v308_v52 = vmul.f32 %v297_v43, %v279_v48  ;;  %v433_v43 = vrot.slane %v3459_v9, %v4211_v16 }
  0xc9   :  { %v317_v53 = vpop.permute.xlu1 %316  ;;  %v315_v54 = vpop.permute.xlu0 %314  ;;  %v492_v55 = vpack.c.bf16 %v307_v51, %v4127_v3  ;;  %v494_v56 = vpack.c.bf16 %v309_v50, %v4122_v2  ;;  %v493_v57 = vpack.c.bf16 %v308_v52, %v4108_v0  ;;  %v3457_v3 = vld [vmem:[%s5534_s24 + $0x18] sm:$0xf] }
  0xca   :  { %v345_v0 = vrot.slane %v3457_v3, %v4211_v16  ;;  %v337_v1 = vrot.slane %v3457_v3, %v4198_v11  ;;  %v341_v6 = vrot.slane %v3457_v3, %v4209_v15  ;;  %v333_v19 = vrot.slane %v3457_v3, %v4207_v14 }
  0xcb   :  { %529 = vmatprep.subr.bf16.mxu0 %v492_v55  ;;  %570 = vmatprep.subr.bf16.mxu1 %v494_v56  ;;  %v325_v21 = vsel %vm322_vm6, %v315_v54, %v317_v53 }
  0xcc   :  { %530 = vmatpush1.bf16.msra.mxu0 %v491_v58  ;;  %571 = vmatpush1.bf16.msra.mxu1 %v493_v57  ;;  %v350_v35 = vmul.f32 %v333_v19, %v325_v21 }
  0xcd   :  { %v321_v59 = vpop.permute.xlu1 %320  ;;  %v319_v60 = vpop.permute.xlu0 %318 }
  0xce   :  { %v326_v63 = vsel %vm322_vm6, %v321_v59, %v315_v54  ;;  %v324_v7 = vsel %vm322_vm6, %v317_v53, %v319_v60  ;;  %v323_v20 = vsel %vm322_vm6, %v319_v60, %v321_v59 }
  0xcf   :  { %v353_v22 = vmul.f32 %v345_v0, %v326_v63  ;;  %v351_v23 = vmul.f32 %v337_v1, %v324_v7  ;;  %v352_v31 = vmul.f32 %v341_v6, %v323_v20 }
  0xd1   :  { %v361_v2 = vpop.permute.xlu1 %360  ;;  %v359_v62 = vpop.permute.xlu0 %358 }
  0xd2   :  { %v369_v12 = vsel %vm366_vm5, %v359_v62, %v361_v2 }
  0xd3   :  { %v394_v27 = vmul.f32 %v377_v8, %v369_v12 }
  0xd5   :  { %v365_v24 = vpop.permute.xlu1 %364  ;;  %v363_v25 = vpop.permute.xlu0 %362  ;;  %v495_v42 = vpack.c.bf16 %v394_v27, %v350_v35  ;;  %v624_v27 = vld [vmem:[%s5534_s24] sm:$0xf] }
  0xd6   :  { %v370_v28 = vsel %vm366_vm5, %v365_v24, %v359_v62  ;;  %v367_v29 = vsel %vm366_vm5, %v363_v25, %v365_v24  ;;  %v368_v30 = vsel %vm366_vm5, %v361_v2, %v363_v25 }
  0xd7   :  { %v397_v32 = vmul.f32 %v389_v13, %v370_v28  ;;  %v395_v33 = vmul.f32 %v381_v17, %v368_v30  ;;  %v396_v34 = vmul.f32 %v385_v18, %v367_v29  ;;  %v3464_v28 = vld [vmem:[%s5534_s24 + $0x4] sm:$0xf] }
  0xd9   :  { %v405_v36 = vpop.permute.xlu1 %404  ;;  %v403_v37 = vpop.permute.xlu0 %402  ;;  %v496_v38 = vpack.c.bf16 %v395_v33, %v351_v23  ;;  %v498_v39 = vpack.c.bf16 %v397_v32, %v353_v22  ;;  %v497_v40 = vpack.c.bf16 %v396_v34, %v352_v31  ;;  %v3973_v22 = vmov 1  }
  0xda   :  { %v413_v41 = vsel %vm410_vm7, %v403_v37, %v405_v36  ;;  %3840 = vset.pattern.permute.xlu0 %v3973_v22  ;;  %v675_v31 = vrot.slane %v3464_v28, %v4198_v11  ;;  %v629_v33 = vrot.slane %v624_v27, %v4207_v14 }
  0xdb   :  { %531 = vmatprep.subr.bf16.mxu0 %v496_v38  ;;  %572 = vmatprep.subr.bf16.mxu1 %v498_v39  ;;  %v438_v45 = vmul.f32 %v421_v26, %v413_v41  ;;  %v671_v39 = vrot.slane %v3464_v28, %v4207_v14 }
  0xdc   :  { %532 = vmatpush1.bf16.msra.mxu0 %v495_v42  ;;  %573 = vmatpush1.bf16.msra.mxu1 %v497_v40 }
  0xdd   :  { %v409_v47 = vpop.permute.xlu1 %408  ;;  %v407_v48 = vpop.permute.xlu0 %406  ;;  %v499_v54 = vpack.c.bf16 %v438_v45, %v438_v45 }
  0xde   :  { %v414_v49 = vsel %vm410_vm7, %v409_v47, %v403_v37  ;;  %v411_v50 = vsel %vm410_vm7, %v407_v48, %v409_v47  ;;  %v412_v51 = vsel %vm410_vm7, %v405_v36, %v407_v48  ;;  %v641_v36 = vrot.slane %v624_v27, %v4211_v16 }
  0xdf   :  { %v441_v52 = vmul.f32 %v433_v43, %v414_v49  ;;  %v439_v53 = vmul.f32 %v425_v44, %v412_v51  ;;  %v440_v55 = vmul.f32 %v429_v46, %v411_v50  ;;  %v514_v59 = vsel %vm512_vm8, %v499_v54, 0 }
  0xe0   :  { %v679_v37 = vrot.slane %v3464_v28, %v4209_v15  ;;  %v683_v43 = vrot.slane %v3464_v28, %v4211_v16  ;;  %v637_v44 = vrot.slane %v624_v27, %v4209_v15 }
  0xe1   :  { %v502_v56 = vpack.c.bf16 %v441_v52, %v441_v52  ;;  %v500_v57 = vpack.c.bf16 %v439_v53, %v439_v53  ;;  %v501_v58 = vpack.c.bf16 %v440_v55, %v440_v55 }
  0xe3   :  { %3460 = vmatprep.subr.msk.bf16.mxu0 %vm512_vm8, %v500_v57  ;;  %3462 = vmatprep.subr.msk.bf16.mxu1 %vm512_vm8, %v502_v56  ;;  %v520_v60 = vsel %vm512_vm8, %v501_v58, 0 }
  0xe4   :  { %534 = vmatpush1.bf16.msra.mxu0 %v514_v59  ;;  %575 = vmatpush1.bf16.msra.mxu1 %v520_v60 }
  0xe7   :  { %3461 = vmatmul.mubr.msk.bf16.vlgmr.msra.gmra.mrb[0].mxu0 %vm508_vm9, %v446_v61  ;;  %3463 = vmatmul.mubr.msk.bf16.vlgmr.msra.gmra.mrb[0].mxu1 %vm508_vm9, %v446_v61 }
  0xe8   :  { %1061 = vmatprep.mubr.bf16.mxu0 %v3971_v4  ;;  %1102 = vmatprep.mubr.bf16.mxu1 %v3971_v4 }
  0xee   :  { %v506_v3 = vpop.permute.xlu0 %505 }
 0x1ba   :  { %v559_v0 = vpop.f32.mrb[0].mxu0  ;;  %v600_v1 = vpop.f32.mrb[0].mxu1 }
 0x1bb   :  { %v560_v2 = vadd.f32 %v559_v0, %v506_v3  ;;  %v601_v62 = vadd.f32 %v600_v1, %v506_v3  ;;  %v561_v63 = vpop.f32.mrb[1].mxu0  ;;  %v602_v6 = vpop.f32.mrb[1].mxu1  ;;  %v3465_v1 = vld [vmem:[%s5534_s24 + $0x8] sm:$0xf] }
 0x1bc   :  { %v563_v7 = vpop.f32.mrb[2].mxu0  ;;  %v604_v8 = vpop.f32.mrb[2].mxu1  ;;  %v562_v13 = vadd.f32 %v561_v63, %v506_v3  ;;  %v603_v20 = vadd.f32 %v602_v6, %v506_v3  ;;  %v717_v6 = vrot.slane %v3465_v1, %v4198_v11 }
 0x1bd   :  { %v4346_v9 = vmax.f32 %v560_v2, 0.0  ;;  %v4348_v12 = vmax.f32 %v601_v62, 0.0  ;;  %v564_v17 = vpop.f32.mrb[3].mxu0  ;;  %v605_v18 = vpop.f32.mrb[3].mxu1  ;;  %v3466_v2 = vld [vmem:[%s5534_s24 + $0xc] sm:$0xf] }
 0x1be   :  { %v4354_v19 = vmax.f32 %v562_v13, 0.0  ;;  %v4360_v21 = vmax.f32 %v603_v20, 0.0  ;;  %v759_v7 = vrot.slane %v3466_v2, %v4198_v11  ;;  %v713_v13 = vrot.slane %v3465_v1, %v4207_v14 }
 0x1bf   :  { %616 = vrot.lane.b32.xlu0 %v4348_v12, %s3964_s26  ;;  %612 = vrot.lane.b32.xlu1 %v4346_v9, %s3964_s26  ;;  %v725_v20 = vrot.slane %v3465_v1, %v4211_v16 }
 0x1c3   :  { %654 = vrot.lane.b32.xlu0 %v4346_v9, %s3965_s0  ;;  %614 = vrot.lane.b32.xlu1 %v4354_v19, %s3964_s26 }
 0x1c7   :  { %658 = vrot.lane.b32.xlu0 %v4348_v12, %s3965_s0  ;;  %618 = vrot.lane.b32.xlu1 %v4360_v21, %s3964_s26 }
 0x1cb   :  { %696 = vrot.lane.b32.xlu0 %v4346_v9, %s3966_s19  ;;  %656 = vrot.lane.b32.xlu1 %v4354_v19, %s3965_s0 }
 0x1cf   :  { %700 = vrot.lane.b32.xlu0 %v4348_v12, %s3966_s19  ;;  %660 = vrot.lane.b32.xlu1 %v4360_v21, %s3965_s0 }
 0x1d3   :  { %738 = vrot.lane.b32.xlu0 %v4346_v9, %s3967_s1  ;;  %698 = vrot.lane.b32.xlu1 %v4354_v19, %s3966_s19 }
 0x1d7   :  { %742 = vrot.lane.b32.xlu0 %v4348_v12, %s3967_s1  ;;  %702 = vrot.lane.b32.xlu1 %v4360_v21, %s3966_s19 }
 0x1db   :  { %784 = vrot.lane.b32.xlu0 %v4346_v9, %s3968_s20  ;;  %740 = vrot.lane.b32.xlu1 %v4354_v19, %s3967_s1 }
 0x1df   :  { %788 = vrot.lane.b32.xlu0 %v4348_v12, %s3968_s20  ;;  %744 = vrot.lane.b32.xlu1 %v4360_v21, %s3967_s1 }
 0x1e3   :  { %826 = vrot.lane.b32.xlu0 %v4346_v9, %s3969_s21  ;;  %786 = vrot.lane.b32.xlu1 %v4354_v19, %s3968_s20 }
 0x1e7   :  { %830 = vrot.lane.b32.xlu0 %v4348_v12, %s3969_s21  ;;  %790 = vrot.lane.b32.xlu1 %v4360_v21, %s3968_s20 }
 0x1eb   :  { %868 = vrot.lane.b32.xlu0 %v4346_v9, %s3970_s5  ;;  %828 = vrot.lane.b32.xlu1 %v4354_v19, %s3969_s21 }
 0x1ef   :  { %872 = vrot.lane.b32.xlu0 %v4348_v12, %s3970_s5  ;;  %832 = vrot.lane.b32.xlu1 %v4360_v21, %s3969_s21 }
 0x1f3   :  { %910 = vrot.lane.b32.xlu0 %v4346_v9, %s3972_s28  ;;  %870 = vrot.lane.b32.xlu1 %v4354_v19, %s3970_s5 }
 0x1f7   :  { %914 = vrot.lane.b32.xlu0 %v4348_v12, %s3972_s28  ;;  %874 = vrot.lane.b32.xlu1 %v4360_v21, %s3970_s5 }
 0x1fb   :  { %912 = vrot.lane.b32.xlu1 %v4354_v19, %s3972_s28  ;;  %1011 = vperm.xlu0 %3840, %v4193_v5   ;;  %v633_v5 = vrot.slane %v624_v27, %v4198_v11 }
 0x1ff   :  { %916 = vrot.lane.b32.xlu1 %v4360_v21, %s3972_s28  ;;  %3841 = vset.pattern.permute.xlu0 %v3971_v4 }
 0x231   :  { %v617_v23 = vpop.permute.xlu0 %616  ;;  %v613_v24 = vpop.permute.xlu1 %612 }
 0x235   :  { %v655_v25 = vpop.permute.xlu0 %654  ;;  %v615_v26 = vpop.permute.xlu1 %614 }
 0x236   :  { %v622_v32 = vsel %vm99_vm0, %v613_v24, %v615_v26  ;;  %v621_v47 = vsel %vm99_vm0, %v615_v26, %v617_v23  ;;  %v3467_v26 = vld [vmem:[%s5534_s24 + $0x14] sm:$0xf] }
 0x237   :  { %v647_v40 = vmul.f32 %v633_v5, %v622_v32  ;;  %v648_v58 = vmul.f32 %v637_v44, %v621_v47  ;;  %v721_v5 = vrot.slane %v3465_v1, %v4209_v15 }
 0x239   :  { %v659_v29 = vpop.permute.xlu0 %658  ;;  %v619_v30 = vpop.permute.xlu1 %618 }
 0x23a   :  { %v620_v45 = vsel %vm99_vm0, %v617_v23, %v619_v30  ;;  %v623_v46 = vsel %vm99_vm0, %v619_v30, %v613_v24  ;;  %v763_v23 = vrot.slane %v3466_v2, %v4209_v15  ;;  %v767_v30 = vrot.slane %v3466_v2, %v4211_v16 }
 0x23b   :  { %v646_v54 = vmul.f32 %v629_v33, %v623_v46  ;;  %v649_v55 = vmul.f32 %v641_v36, %v620_v45 }
 0x23d   :  { %v697_v34 = vpop.permute.xlu0 %696  ;;  %v657_v35 = vpop.permute.xlu1 %656 }
 0x23e   :  { %v664_v38 = vsel %vm142_vm1, %v655_v25, %v657_v35  ;;  %v663_v41 = vsel %vm142_vm1, %v657_v35, %v659_v29 }
 0x23f   :  { %v689_v42 = vmul.f32 %v675_v31, %v664_v38  ;;  %v690_v51 = vmul.f32 %v679_v37, %v663_v41  ;;  %v801_v38 = vrot.slane %v3467_v26, %v4207_v14 }
 0x241   :  { %v701_v48 = vpop.permute.xlu0 %700  ;;  %v661_v49 = vpop.permute.xlu1 %660  ;;  %v990_v50 = vpack.c.bf16 %v689_v42, %v647_v40  ;;  %v991_v0 = vpack.c.bf16 %v690_v51, %v648_v58  ;;  %v805_v42 = vrot.slane %v3467_v26, %v4198_v11 }
 0x242   :  { %v662_v52 = vsel %vm142_vm1, %v659_v29, %v661_v49  ;;  %v665_v53 = vsel %vm142_vm1, %v661_v49, %v655_v25  ;;  %v755_v25 = vrot.slane %v3466_v2, %v4207_v14 }
 0x243   :  { %v688_v56 = vmul.f32 %v671_v39, %v665_v53  ;;  %v691_v57 = vmul.f32 %v683_v43, %v662_v52  ;;  %1029 = vmatprep.subr.bf16.mxu0 %v990_v50 }
 0x245   :  { %v989_v59 = vpack.c.bf16 %v688_v56, %v646_v54  ;;  %v739_v60 = vpop.permute.xlu0 %738  ;;  %v699_v61 = vpop.permute.xlu1 %698  ;;  %v992_v3 = vpack.c.bf16 %v691_v57, %v649_v55  ;;  %v809_v54 = vrot.slane %v3467_v26, %v4209_v15  ;;  %v813_v57 = vrot.slane %v3467_v26, %v4211_v16 }
 0x246   :  { %v706_v8 = vsel %vm186_vm2, %v697_v34, %v699_v61  ;;  %v705_v33 = vsel %vm186_vm2, %v699_v61, %v701_v48 }
 0x247   :  { %1030 = vmatpush1.bf16.msra.mxu0 %v989_v59  ;;  %1070 = vmatprep.subr.bf16.mxu1 %v992_v3  ;;  %v731_v27 = vmul.f32 %v717_v6, %v706_v8  ;;  %v732_v46 = vmul.f32 %v721_v5, %v705_v33 }
 0x248   :  { %1071 = vmatpush1.bf16.msra.mxu1 %v991_v0 }
 0x249   :  { %v743_v62 = vpop.permute.xlu0 %742  ;;  %v703_v63 = vpop.permute.xlu1 %702 }
 0x24a   :  { %v704_v31 = vsel %vm186_vm2, %v701_v48, %v703_v63  ;;  %v707_v32 = vsel %vm186_vm2, %v703_v63, %v697_v34 }
 0x24b   :  { %v730_v43 = vmul.f32 %v713_v13, %v707_v32  ;;  %v733_v44 = vmul.f32 %v725_v20, %v704_v31 }
 0x24d   :  { %v785_v17 = vpop.permute.xlu0 %784  ;;  %v741_v18 = vpop.permute.xlu1 %740 }
 0x24e   :  { %v748_v24 = vsel %vm230_vm3, %v739_v60, %v741_v18  ;;  %v747_v28 = vsel %vm230_vm3, %v741_v18, %v743_v62 }
 0x24f   :  { %v773_v29 = vmul.f32 %v759_v7, %v748_v24  ;;  %v774_v39 = vmul.f32 %v763_v23, %v747_v28  ;;  %v3469_v7 = vld [vmem:[%s5534_s24 + $0x1c] sm:$0xf] }
 0x250   :  { %v885_v18 = vrot.slane %v3469_v7, %v4207_v14 }
 0x251   :  { %v789_v35 = vpop.permute.xlu0 %788  ;;  %v745_v36 = vpop.permute.xlu1 %744  ;;  %v994_v37 = vpack.c.bf16 %v773_v29, %v731_v27  ;;  %v995_v51 = vpack.c.bf16 %v774_v39, %v732_v46  ;;  %v893_v29 = vrot.slane %v3469_v7, %v4209_v15 }
 0x252   :  { %v746_v40 = vsel %vm230_vm3, %v743_v62, %v745_v36  ;;  %v749_v41 = vsel %vm230_vm3, %v745_v36, %v739_v60  ;;  %v3470_v36 = vld [vmem:[%s5534_s24 + $0x20] sm:$0xf] }
 0x253   :  { %v772_v34 = vmul.f32 %v755_v25, %v749_v41  ;;  %v775_v45 = vmul.f32 %v767_v30, %v746_v40  ;;  %1031 = vmatprep.subr.bf16.mxu0 %v994_v37  ;;  %v897_v30 = vrot.slane %v3469_v7, %v4211_v16 }
 0x255   :  { %v993_v47 = vpack.c.bf16 %v772_v34, %v730_v43  ;;  %v827_v48 = vpop.permute.xlu0 %826  ;;  %v787_v49 = vpop.permute.xlu1 %786  ;;  %v996_v50 = vpack.c.bf16 %v775_v45, %v733_v44  ;;  %v927_v44 = vrot.slane %v3470_v36, %v4207_v14  ;;  %v931_v34 = vrot.slane %v3470_v36, %v4198_v11 }
 0x256   :  { %v793_v52 = vsel %vm278_vm4, %v787_v49, %v789_v35  ;;  %v794_v53 = vsel %vm278_vm4, %v785_v17, %v787_v49 }
 0x257   :  { %v818_v55 = vmul.f32 %v801_v38, %v794_v53  ;;  %v819_v56 = vmul.f32 %v805_v42, %v793_v52  ;;  %1032 = vmatpush1.bf16.msra.mxu0 %v993_v47  ;;  %1072 = vmatprep.subr.bf16.mxu1 %v996_v50 }
 0x258   :  { %1073 = vmatpush1.bf16.msra.mxu1 %v995_v51 }
 0x259   :  { %v997_v58 = vpack.c.bf16 %v818_v55, %v4346_v9  ;;  %v831_v59 = vpop.permute.xlu0 %830  ;;  %v791_v60 = vpop.permute.xlu1 %790  ;;  %v998_v61 = vpack.c.bf16 %v819_v56, %v4354_v19  ;;  %v3468_v19 = vld [vmem:[%s5534_s24 + $0x18] sm:$0xf] }
 0x25a   :  { %v792_v3 = vsel %vm278_vm4, %v789_v35, %v791_v60  ;;  %v795_v0 = vsel %vm278_vm4, %v791_v60, %v785_v17  ;;  %v843_v17 = vrot.slane %v3468_v19, %v4207_v14  ;;  %v851_v24 = vrot.slane %v3468_v19, %v4209_v15 }
 0x25b   :  { %v820_v1 = vmul.f32 %v809_v54, %v792_v3  ;;  %v821_v2 = vmul.f32 %v813_v57, %v795_v0  ;;  %1033 = vmatprep.subr.bf16.mxu0 %v998_v61  ;;  %v855_v25 = vrot.slane %v3468_v19, %v4211_v16  ;;  %v935_v57 = vrot.slane %v3470_v36, %v4209_v15 }
 0x25c   :  { %1034 = vmatpush1.bf16.msra.mxu0 %v997_v58  ;;  %v939_v58 = vrot.slane %v3470_v36, %v4211_v16 }
 0x25d   :  { %v999_v62 = vpack.c.bf16 %v820_v1, %v4348_v12  ;;  %v869_v63 = vpop.permute.xlu0 %868  ;;  %v829_v6 = vpop.permute.xlu1 %828  ;;  %v1000_v9 = vpack.c.bf16 %v821_v2, %v4360_v21  ;;  %v847_v12 = vrot.slane %v3468_v19, %v4198_v11  ;;  %v889_v21 = vrot.slane %v3469_v7, %v4198_v11 }
 0x25e   :  { %v835_v20 = vsel %vm322_vm6, %v829_v6, %v831_v59  ;;  %v836_v23 = vsel %vm322_vm6, %v827_v48, %v829_v6 }
 0x25f   :  { %1074 = vmatprep.subr.bf16.mxu1 %v1000_v9  ;;  %v860_v5 = vmul.f32 %v843_v17, %v836_v23  ;;  %v861_v31 = vmul.f32 %v847_v12, %v835_v20 }
 0x260   :  { %1075 = vmatpush1.bf16.msra.mxu1 %v999_v62 }
 0x261   :  { %v873_v8 = vpop.permute.xlu0 %872  ;;  %v833_v13 = vpop.permute.xlu1 %832 }
 0x262   :  { %v834_v37 = vsel %vm322_vm6, %v831_v59, %v833_v13  ;;  %v837_v38 = vsel %vm322_vm6, %v833_v13, %v827_v48 }
 0x263   :  { %v862_v45 = vmul.f32 %v851_v24, %v834_v37  ;;  %v863_v46 = vmul.f32 %v855_v25, %v837_v38  ;;  %v3913_v37 = vld [vmem:[%s5533_s23 + $0x18] sm:$0xff] }
 0x265   :  { %v871_v26 = vpop.permute.xlu1 %870  ;;  %v911_v32 = vpop.permute.xlu0 %910 }
 0x266   :  { %v877_v27 = vsel %vm366_vm5, %v871_v26, %v873_v8  ;;  %v878_v28 = vsel %vm366_vm5, %v869_v63, %v871_v26  ;;  %v3911_v26 = vld [vmem:[%s5533_s23 + $0x8] sm:$0xff] }
 0x267   :  { %v902_v33 = vmul.f32 %v885_v18, %v878_v28  ;;  %v903_v35 = vmul.f32 %v889_v21, %v877_v27  ;;  %v3910_v21 = vld [vmem:[%s5533_s23] sm:$0xff] }
 0x269   :  { %v1001_v39 = vpack.c.bf16 %v902_v33, %v860_v5  ;;  %v875_v40 = vpop.permute.xlu1 %874  ;;  %v1002_v41 = vpack.c.bf16 %v903_v35, %v861_v31  ;;  %v915_v48 = vpop.permute.xlu0 %914  ;;  %v3912_v31 = vld [vmem:[%s5533_s23 + $0x10] sm:$0xff] }
 0x26a   :  { %v876_v42 = vsel %vm366_vm5, %v873_v8, %v875_v40  ;;  %v879_v43 = vsel %vm366_vm5, %v875_v40, %v869_v63  ;;  %v952_v63 = vld [vmem:[%s5514_s6] sm:$0xf] }
 0x26b   :  { %v904_v47 = vmul.f32 %v893_v29, %v876_v42  ;;  %v905_v49 = vmul.f32 %v897_v30, %v879_v43  ;;  %1035 = vmatprep.subr.bf16.mxu0 %v1002_v41  ;;  %v4641_v40 = vld [vmem:[%s5523_s15] sm:$0xff]  ;;  %v4649_v41 = vld [vmem:[%s5523_s15 + $0x8] sm:$0xff] }
 0x26c   :  { %1036 = vmatpush1.bf16.msra.mxu0 %v1001_v39 }
 0x26d   :  { %v1003_v50 = vpack.c.bf16 %v904_v47, %v862_v45  ;;  %v913_v51 = vpop.permute.xlu1 %912  ;;  %v1004_v52 = vpack.c.bf16 %v905_v49, %v863_v46  ;;  %v3475_v45 = vld [vmem:[%s5534_s24 + $0x4] sm:$0xf] }
 0x26e   :  { %v919_v53 = vsel %vm410_vm7, %v913_v51, %v915_v48  ;;  %v920_v54 = vsel %vm410_vm7, %v911_v32, %v913_v51 }
 0x26f   :  { %v944_v55 = vmul.f32 %v927_v44, %v920_v54  ;;  %v945_v56 = vmul.f32 %v931_v34, %v919_v53  ;;  %1076 = vmatprep.subr.bf16.mxu1 %v1004_v52  ;;  %v1133_v34 = vld [vmem:[%s5534_s24] sm:$0xf]  ;;  %v1188_v54 = vrot.slane %v3475_v45, %v4209_v15 }
 0x270   :  { %1077 = vmatpush1.bf16.msra.mxu1 %v1003_v50  ;;  %v1142_v49 = vrot.slane %v1133_v34, %v4198_v11  ;;  %v1138_v50 = vrot.slane %v1133_v34, %v4207_v14  ;;  %v1150_v53 = vrot.slane %v1133_v34, %v4211_v16 }
 0x271   :  { %v1005_v59 = vpack.c.bf16 %v944_v55, %v944_v55  ;;  %v1006_v60 = vpack.c.bf16 %v945_v56, %v945_v56  ;;  %v917_v61 = vpop.permute.xlu1 %916  ;;  %v1180_v56 = vrot.slane %v3475_v45, %v4207_v14 }
 0x272   :  { %v918_v3 = vsel %vm410_vm7, %v915_v48, %v917_v61  ;;  %v921_v0 = vsel %vm410_vm7, %v917_v61, %v911_v32  ;;  %v1184_v48 = vrot.slane %v3475_v45, %v4198_v11  ;;  %v1146_v61 = vrot.slane %v1133_v34, %v4209_v15  ;;  %v3478_v34 = vld [vmem:[%s5534_s24 + $0x14] sm:$0xf] }
 0x273   :  { %v946_v1 = vmul.f32 %v935_v57, %v918_v3  ;;  %v947_v2 = vmul.f32 %v939_v58, %v921_v0  ;;  %3471 = vmatprep.subr.msk.bf16.mxu0 %vm512_vm8, %v1006_v60  ;;  %v1018_v62 = vsel %vm512_vm8, %v1005_v59, 0  ;;  %v1192_v60 = vrot.slane %v3475_v45, %v4211_v16 }
 0x274   :  { %1038 = vmatpush1.bf16.msra.mxu0 %v1018_v62 }
 0x275   :  { %v1007_v6 = vpack.c.bf16 %v946_v1, %v946_v1  ;;  %v1008_v9 = vpack.c.bf16 %v947_v2, %v947_v2 }
 0x277   :  { %3472 = vmatmul.mubr.msk.bf16.vlgmr.msra.gmra.mrb[4].mxu0 %vm508_vm9, %v952_v63  ;;  %3473 = vmatprep.subr.msk.bf16.mxu1 %vm512_vm8, %v1008_v9  ;;  %v1024_v19 = vsel %vm512_vm8, %v1007_v6, 0 }
 0x278   :  { %1079 = vmatpush1.bf16.msra.mxu1 %v1024_v19  ;;  %1581 = vmatprep.mubr.bf16.mxu0 %v3971_v4 }
 0x27a   :  { %v1012_v7 = vpop.permute.xlu0 %1011 }
 0x27b   :  { %3474 = vmatmul.mubr.msk.bf16.vlgmr.msra.gmra.mrb[4].mxu1 %vm508_vm9, %v952_v63 }
 0x27c   :  { %1624 = vmatprep.mubr.bf16.mxu1 %v3971_v4 }
 0x34a   :  { %v1063_v8 = vpop.f32.mrb[4].mxu0 }
 0x34b   :  { %v1064_v13 = vadd.f32 %v1063_v8, %v1012_v7  ;;  %v1065_v17 = vpop.f32.mrb[5].mxu0 }
 0x34c   :  { %v1066_v12 = vadd.f32 %v1065_v17, %v1012_v7  ;;  %v1067_v18 = vpop.f32.mrb[6].mxu0 }
 0x34d   :  { %v1111_v20 = vadd.f32 %v3910_v21, %v1064_v13  ;;  %v1068_v23 = vpop.f32.mrb[7].mxu0 }
 0x34e   :  { %v1104_v24 = vpop.f32.mrb[4].mxu1  ;;  %v1112_v27 = vadd.f32 %v3911_v26, %v1066_v12  ;;  %v3476_v26 = vld [vmem:[%s5534_s24 + $0x8] sm:$0xf] }
 0x34f   :  { %v4559_v25 = vmax.f32 %v1111_v20, 0.0  ;;  %v1105_v28 = vadd.f32 %v1104_v24, %v1012_v7  ;;  %v1106_v29 = vpop.f32.mrb[5].mxu1 }
 0x350   :  { %v1107_v30 = vadd.f32 %v1106_v29, %v1012_v7  ;;  %v1108_v5 = vpop.f32.mrb[6].mxu1  ;;  %v4569_v35 = vmax.f32 %v1112_v27, 0.0  ;;  %v3477_v27 = vld [vmem:[%s5534_s24 + $0xc] sm:$0xf] }
 0x351   :  { %v1113_v32 = vadd.f32 %v3912_v31, %v1105_v28  ;;  %1121 = vrot.lane.b32.xlu1 %v4559_v25, %s3964_s26  ;;  %v1109_v33 = vpop.f32.mrb[7].mxu1  ;;  %v1268_v5 = vrot.slane %v3477_v27, %v4198_v11 }
 0x352   :  { %v1114_v38 = vadd.f32 %v3913_v37, %v1107_v30  ;;  %v1226_v30 = vrot.slane %v3476_v26, %v4198_v11 }
 0x353   :  { %v4571_v36 = vmax.f32 %v1113_v32, 0.0  ;;  %v1222_v32 = vrot.slane %v3476_v26, %v4207_v14 }
 0x354   :  { %v4580_v39 = vmax.f32 %v1114_v38, 0.0  ;;  %v1234_v38 = vrot.slane %v3476_v26, %v4211_v16 }
 0x355   :  { %1123 = vrot.lane.b32.xlu1 %v4569_v35, %s3964_s26  ;;  %1125 = vrot.lane.b32.xlu0 %v4571_v36, %s3964_s26 }
 0x359   :  { %1127 = vrot.lane.b32.xlu1 %v4580_v39, %s3964_s26  ;;  %1163 = vrot.lane.b32.xlu0 %v4559_v25, %s3965_s0 }
 0x35d   :  { %1165 = vrot.lane.b32.xlu1 %v4569_v35, %s3965_s0  ;;  %1167 = vrot.lane.b32.xlu0 %v4571_v36, %s3965_s0 }
 0x361   :  { %1169 = vrot.lane.b32.xlu1 %v4580_v39, %s3965_s0  ;;  %1205 = vrot.lane.b32.xlu0 %v4559_v25, %s3966_s19 }
 0x365   :  { %1207 = vrot.lane.b32.xlu1 %v4569_v35, %s3966_s19  ;;  %1209 = vrot.lane.b32.xlu0 %v4571_v36, %s3966_s19 }
 0x369   :  { %1211 = vrot.lane.b32.xlu1 %v4580_v39, %s3966_s19  ;;  %1247 = vrot.lane.b32.xlu0 %v4559_v25, %s3967_s1  ;;  %s3977_s19 = smov 8  }
 0x36d   :  { %1249 = vrot.lane.b32.xlu1 %v4569_v35, %s3967_s1  ;;  %1251 = vrot.lane.b32.xlu0 %v4571_v36, %s3967_s1 }
 0x371   :  { %1253 = vrot.lane.b32.xlu1 %v4580_v39, %s3967_s1  ;;  %1293 = vrot.lane.b32.xlu0 %v4559_v25, %s3968_s20 }
 0x375   :  { %1295 = vrot.lane.b32.xlu1 %v4569_v35, %s3968_s20  ;;  %1297 = vrot.lane.b32.xlu0 %v4571_v36, %s3968_s20 }
 0x379   :  { %1299 = vrot.lane.b32.xlu1 %v4580_v39, %s3968_s20  ;;  %1335 = vrot.lane.b32.xlu0 %v4559_v25, %s3969_s21 }
 0x37d   :  { %1337 = vrot.lane.b32.xlu1 %v4569_v35, %s3969_s21  ;;  %1339 = vrot.lane.b32.xlu0 %v4571_v36, %s3969_s21 }
 0x381   :  { %1341 = vrot.lane.b32.xlu1 %v4580_v39, %s3969_s21  ;;  %1377 = vrot.lane.b32.xlu0 %v4559_v25, %s3970_s5  ;;  %s3978_s21 = smov 7  }
 0x385   :  { %1379 = vrot.lane.b32.xlu1 %v4569_v35, %s3970_s5  ;;  %1381 = vrot.lane.b32.xlu0 %v4571_v36, %s3970_s5 }
 0x389   :  { %1383 = vrot.lane.b32.xlu1 %v4580_v39, %s3970_s5  ;;  %1419 = vrot.lane.b32.xlu0 %v4559_v25, %s3972_s28  ;;  %s3980_s5 = smov 120  }
 0x38d   :  { %1421 = vrot.lane.b32.xlu1 %v4569_v35, %s3972_s28  ;;  %1423 = vrot.lane.b32.xlu0 %v4571_v36, %s3972_s28 }
 0x391   :  { %1425 = vrot.lane.b32.xlu1 %v4580_v39, %s3972_s28  ;;  %1521 = vperm.xlu0 %3841, %v4641_v40   ;;  %s3981_s28 = smov 119  }
 0x395   :  { %1526 = vperm.xlu1 %3842, %v4649_v41   ;;  %3844 = vset.pattern.permute.xlu0 %v3973_v22 }
 0x399   :  { %3843 = vset.pattern.permute.xlu1 %v3973_v22 }
 0x3c3   :  { %v1122_v42 = vpop.permute.xlu1 %1121 }
 0x3c7   :  { %v1126_v43 = vpop.permute.xlu0 %1125  ;;  %v1124_v44 = vpop.permute.xlu1 %1123 }
 0x3c8   :  { %v1131_v22 = vsel %vm99_vm0, %v1122_v42, %v1124_v44  ;;  %v1130_v1 = vsel %vm99_vm0, %v1124_v44, %v1126_v43  ;;  %v1264_v44 = vrot.slane %v3477_v27, %v4207_v14 }
 0x3c9   :  { %v1156_v57 = vmul.f32 %v1142_v49, %v1131_v22  ;;  %v1157_v12 = vmul.f32 %v1146_v61, %v1130_v1  ;;  %v1276_v49 = vrot.slane %v3477_v27, %v4211_v16 }
 0x3cb   :  { %v1164_v46 = vpop.permute.xlu0 %1163  ;;  %v1128_v47 = vpop.permute.xlu1 %1127 }
 0x3cc   :  { %v1129_v3 = vsel %vm99_vm0, %v1126_v43, %v1128_v47  ;;  %v1132_v0 = vsel %vm99_vm0, %v1128_v47, %v1122_v42  ;;  %v1272_v42 = vrot.slane %v3477_v27, %v4209_v15 }
 0x3cd   :  { %v1155_v7 = vmul.f32 %v1138_v50, %v1132_v0  ;;  %v1158_v8 = vmul.f32 %v1150_v53, %v1129_v3 }
 0x3cf   :  { %v1168_v51 = vpop.permute.xlu0 %1167  ;;  %v1166_v52 = vpop.permute.xlu1 %1165 }
 0x3d0   :  { %v1173_v55 = vsel %vm142_vm1, %v1164_v46, %v1166_v52  ;;  %v1172_v58 = vsel %vm142_vm1, %v1166_v52, %v1168_v51 }
 0x3d1   :  { %v1198_v59 = vmul.f32 %v1184_v48, %v1173_v55  ;;  %v1199_v6 = vmul.f32 %v1188_v54, %v1172_v58  ;;  %v1230_v48 = vrot.slane %v3476_v26, %v4209_v15  ;;  %v1310_v55 = vrot.slane %v3478_v34, %v4207_v14 }
 0x3d3   :  { %v1206_v2 = vpop.permute.xlu0 %1205  ;;  %v1170_v62 = vpop.permute.xlu1 %1169  ;;  %v1500_v63 = vpack.c.bf16 %v1198_v59, %v1156_v57  ;;  %v1501_v24 = vpack.c.bf16 %v1199_v6, %v1157_v12  ;;  %v1314_v59 = vrot.slane %v3478_v34, %v4198_v11  ;;  %v1322_v12 = vrot.slane %v3478_v34, %v4211_v16 }
 0x3d4   :  { %v1171_v9 = vsel %vm142_vm1, %v1168_v51, %v1170_v62  ;;  %v1174_v19 = vsel %vm142_vm1, %v1170_v62, %v1164_v46 }
 0x3d5   :  { %v1197_v13 = vmul.f32 %v1180_v56, %v1174_v19  ;;  %v1200_v17 = vmul.f32 %v1192_v60, %v1171_v9  ;;  %1549 = vmatprep.subr.bf16.mxu0 %v1500_v63 }
 0x3d7   :  { %v1499_v18 = vpack.c.bf16 %v1197_v13, %v1155_v7  ;;  %v1210_v21 = vpop.permute.xlu0 %1209  ;;  %v1208_v20 = vpop.permute.xlu1 %1207  ;;  %v1502_v23 = vpack.c.bf16 %v1200_v17, %v1158_v8  ;;  %v1318_v8 = vrot.slane %v3478_v34, %v4209_v15 }
 0x3d8   :  { %v1215_v31 = vsel %vm186_vm2, %v1206_v2, %v1208_v20  ;;  %v1214_v51 = vsel %vm186_vm2, %v1208_v20, %v1210_v21 }
 0x3d9   :  { %1550 = vmatpush1.bf16.msra.mxu0 %v1499_v18  ;;  %1592 = vmatprep.subr.bf16.mxu1 %v1502_v23  ;;  %v1240_v45 = vmul.f32 %v1226_v30, %v1215_v31  ;;  %v1241_v1 = vmul.f32 %v1230_v48, %v1214_v51 }
 0x3da   :  { %1593 = vmatpush1.bf16.msra.mxu1 %v1501_v24 }
 0x3db   :  { %v1248_v28 = vpop.permute.xlu0 %1247  ;;  %v1212_v29 = vpop.permute.xlu1 %1211 }
 0x3dc   :  { %v1213_v22 = vsel %vm186_vm2, %v1210_v21, %v1212_v29  ;;  %v1216_v50 = vsel %vm186_vm2, %v1212_v29, %v1206_v2 }
 0x3dd   :  { %v1239_v60 = vmul.f32 %v1222_v32, %v1216_v50  ;;  %v1242_v61 = vmul.f32 %v1234_v38, %v1213_v22  ;;  %v3479_v32 = vld [vmem:[%s5534_s24 + $0x18] sm:$0xf] }
 0x3df   :  { %v1252_v33 = vpop.permute.xlu0 %1251  ;;  %v1250_v37 = vpop.permute.xlu1 %1249 }
 0x3e0   :  { %v1257_v43 = vsel %vm230_vm3, %v1248_v28, %v1250_v37  ;;  %v1256_v46 = vsel %vm230_vm3, %v1250_v37, %v1252_v33 }
 0x3e1   :  { %v1282_v47 = vmul.f32 %v1268_v5, %v1257_v43  ;;  %v1283_v56 = vmul.f32 %v1272_v42, %v1256_v46  ;;  %v1352_v42 = vrot.slane %v3479_v32, %v4207_v14  ;;  %v1356_v43 = vrot.slane %v3479_v32, %v4198_v11 }
 0x3e3   :  { %v1294_v52 = vpop.permute.xlu0 %1293  ;;  %v1254_v53 = vpop.permute.xlu1 %1253  ;;  %v1504_v54 = vpack.c.bf16 %v1282_v47, %v1240_v45  ;;  %v1505_v9 = vpack.c.bf16 %v1283_v56, %v1241_v1  ;;  %v1360_v47 = vrot.slane %v3479_v32, %v4209_v15 }
 0x3e4   :  { %v1255_v57 = vsel %vm230_vm3, %v1252_v33, %v1254_v53  ;;  %v1258_v58 = vsel %vm230_vm3, %v1254_v53, %v1248_v28  ;;  %v3480_v33 = vld [vmem:[%s5534_s24 + $0x1c] sm:$0xf] }
 0x3e5   :  { %v1281_v3 = vmul.f32 %v1264_v44, %v1258_v58  ;;  %v1284_v0 = vmul.f32 %v1276_v49, %v1255_v57  ;;  %1551 = vmatprep.subr.bf16.mxu0 %v1504_v54  ;;  %v1394_v44 = vrot.slane %v3480_v33, %v4207_v14  ;;  %v1398_v34 = vrot.slane %v3480_v33, %v4198_v11  ;;  %v3481_v58 = vld [vmem:[%s5534_s24 + $0x20] sm:$0xf]  ;;  %s3979_s24 = smov 121  }
 0x3e6   :  { %v1364_v49 = vrot.slane %v3479_v32, %v4211_v16  ;;  %v1406_v53 = vrot.slane %v3480_v33, %v4211_v16 }
 0x3e7   :  { %v1503_v2 = vpack.c.bf16 %v1281_v3, %v1239_v60  ;;  %v1298_v62 = vpop.permute.xlu0 %1297  ;;  %v1296_v63 = vpop.permute.xlu1 %1295  ;;  %v1506_v6 = vpack.c.bf16 %v1284_v0, %v1242_v61 }
 0x3e8   :  { %v1302_v19 = vsel %vm278_vm4, %v1296_v63, %v1298_v62  ;;  %v1303_v7 = vsel %vm278_vm4, %v1294_v52, %v1296_v63  ;;  %v1436_v63 = vrot.slane %v3481_v58, %v4207_v14 }
 0x3e9   :  { %v1327_v13 = vmul.f32 %v1310_v55, %v1303_v7  ;;  %v1328_v17 = vmul.f32 %v1314_v59, %v1302_v19  ;;  %1552 = vmatpush1.bf16.msra.mxu0 %v1503_v2  ;;  %1594 = vmatprep.subr.bf16.mxu1 %v1506_v6  ;;  %v1440_v6 = vrot.slane %v3481_v58, %v4198_v11 }
 0x3ea   :  { %1595 = vmatpush1.bf16.msra.mxu1 %v1505_v9  ;;  %v1444_v11 = vrot.slane %v3481_v58, %v4209_v15 }
 0x3eb   :  { %v1507_v18 = vpack.c.bf16 %v1327_v13, %v4559_v25  ;;  %v1336_v21 = vpop.permute.xlu0 %1335  ;;  %v1300_v20 = vpop.permute.xlu1 %1299  ;;  %v1508_v23 = vpack.c.bf16 %v1328_v17, %v4569_v35 }
 0x3ec   :  { %v1301_v24 = vsel %vm278_vm4, %v1298_v62, %v1300_v20  ;;  %v1304_v26 = vsel %vm278_vm4, %v1300_v20, %v1294_v52  ;;  %v1402_v52 = vrot.slane %v3480_v33, %v4209_v15  ;;  %v4791_v33 = vld [vmem:[%s5511_s3] sm:$0xff]  }
 0x3ed   :  { %v1329_v27 = vmul.f32 %v1318_v8, %v1301_v24  ;;  %v1330_v28 = vmul.f32 %v1322_v12, %v1304_v26  ;;  %1553 = vmatprep.subr.bf16.mxu0 %v1508_v23  ;;  %v1448_v24 = vrot.slane %v3481_v58, %v4211_v16  ;;  %v3855_v16 = vld [vmem:[%s5515_s7] sm:$0xff]   ;;  %v4908_v58 = vld [vmem:[%s5511_s3 + $0x28] sm:$0xff]  }
 0x3ee   :  { %1554 = vmatpush1.bf16.msra.mxu0 %v1507_v18 }
 0x3ef   :  { %v1509_v29 = vpack.c.bf16 %v1329_v27, %v4571_v36  ;;  %v1340_v30 = vpop.permute.xlu0 %1339  ;;  %v1338_v5 = vpop.permute.xlu1 %1337  ;;  %v1510_v31 = vpack.c.bf16 %v1330_v28, %v4580_v39 }
 0x3f0   :  { %v1344_v45 = vsel %vm322_vm6, %v1338_v5, %v1340_v30  ;;  %v1345_v46 = vsel %vm322_vm6, %v1336_v21, %v1338_v5 }
 0x3f1   :  { %1596 = vmatprep.subr.bf16.mxu1 %v1510_v31  ;;  %v1369_v54 = vmul.f32 %v1352_v42, %v1345_v46  ;;  %v1370_v55 = vmul.f32 %v1356_v43, %v1344_v45  ;;  %v4802_v42 = vld [vmem:[%s5511_s3 + $0xc0] sm:$0xff]   ;;  %v4823_v45 = vld [vmem:[%s5511_s3 + $0x50] sm:$0xff]   ;;  %v4828_v46 = vld [vmem:[%s5511_s3 + $0xc8] sm:$0xff]  }
 0x3f2   :  { %1597 = vmatpush1.bf16.msra.mxu1 %v1509_v29  ;;  %v4777_v29 = vld [vmem:[%s5511_s3 + $0x40] sm:$0xff]  }
 0x3f3   :  { %v1378_v37 = vpop.permute.xlu0 %1377  ;;  %v1342_v38 = vpop.permute.xlu1 %1341 }
 0x3f4   :  { %v1343_v59 = vsel %vm322_vm6, %v1340_v30, %v1342_v38  ;;  %v1346_v60 = vsel %vm322_vm6, %v1342_v38, %v1336_v21 }
 0x3f5   :  { %v1371_v9 = vmul.f32 %v1360_v47, %v1343_v59  ;;  %v1372_v19 = vmul.f32 %v1364_v49, %v1346_v60  ;;  %v4836_v47 = vld [vmem:[%s5511_s3 + $0x10] sm:$0xff]   ;;  %v4841_v49 = vld [vmem:[%s5511_s3 + $0x88] sm:$0xff]   ;;  %v4913_v59 = vld [vmem:[%s5511_s3 + $0xa0] sm:$0xff]  }
 0x3f6   :  { %v4922_v60 = vld [vmem:[%s5511_s3 + $0x70] sm:$0xff]  }
 0x3f7   :  { %v1382_v48 = vpop.permute.xlu0 %1381  ;;  %v1380_v22 = vpop.permute.xlu1 %1379 }
 0x3f8   :  { %v1386_v50 = vsel %vm366_vm5, %v1380_v22, %v1382_v48  ;;  %v1387_v51 = vsel %vm366_vm5, %v1378_v37, %v1380_v22  ;;  %v4853_v22 = vld [vmem:[%s5511_s3 + $0xd0] sm:$0xff]  }
 0x3f9   :  { %v1411_v56 = vmul.f32 %v1394_v44, %v1387_v51  ;;  %v1412_v57 = vmul.f32 %v1398_v34, %v1386_v50  ;;  %v4811_v44 = vld [vmem:[%s5511_s3 + $0x8] sm:$0xff]   ;;  %v4816_v34 = vld [vmem:[%s5511_s3 + $0x80] sm:$0xff]   ;;  %v4860_v50 = vld [vmem:[%s5511_s3 + $0x18] sm:$0xff]  }
 0x3fa   :  { %v4865_v51 = vld [vmem:[%s5511_s3 + $0x90] sm:$0xff]  }
 0x3fb   :  { %v1511_v61 = vpack.c.bf16 %v1411_v56, %v1369_v54  ;;  %v1420_v3 = vpop.permute.xlu0 %1419  ;;  %v1384_v0 = vpop.permute.xlu1 %1383  ;;  %v1512_v1 = vpack.c.bf16 %v1412_v57, %v1370_v55  ;;  %v4884_v54 = vld [vmem:[%s5511_s3 + $0x20] sm:$0xff]   ;;  %v4889_v55 = vld [vmem:[%s5511_s3 + $0x98] sm:$0xff]   ;;  %v4896_v56 = vld [vmem:[%s5511_s3 + $0x68] sm:$0xff]  }
 0x3fc   :  { %v1385_v2 = vsel %vm366_vm5, %v1382_v48, %v1384_v0  ;;  %v1388_v62 = vsel %vm366_vm5, %v1384_v0, %v1378_v37  ;;  %v4848_v48 = vld [vmem:[%s5511_s3 + $0x58] sm:$0xff]   ;;  %v4901_v57 = vld [vmem:[%s5511_s3 + $0xe0] sm:$0xff]   ;;  %v4937_v0 = vld [vmem:[%s5511_s3 + $0xa8] sm:$0xff]  }
 0x3fd   :  { %v1413_v7 = vmul.f32 %v1402_v52, %v1385_v2  ;;  %v1414_v8 = vmul.f32 %v1406_v53, %v1388_v62  ;;  %1555 = vmatprep.subr.bf16.mxu0 %v1512_v1  ;;  %v4872_v52 = vld [vmem:[%s5511_s3 + $0x60] sm:$0xff]   ;;  %v4877_v53 = vld [vmem:[%s5511_s3 + $0xd8] sm:$0xff]   ;;  %v4951_v2 = vld [vmem:[%s5511_s3 + $0xf0] sm:$0xff]  }
 0x3fe   :  { %1556 = vmatpush1.bf16.msra.mxu0 %v1511_v61  ;;  %v4927_v61 = vld [vmem:[%s5511_s3 + $0xe8] sm:$0xff]   ;;  %v4946_v1 = vld [vmem:[%s5511_s3 + $0x78] sm:$0xff]  }
 0x3ff   :  { %v1513_v13 = vpack.c.bf16 %v1413_v7, %v1371_v9  ;;  %v1424_v17 = vpop.permute.xlu0 %1423  ;;  %v1422_v12 = vpop.permute.xlu1 %1421  ;;  %v1514_v18 = vpack.c.bf16 %v1414_v8, %v1372_v19  ;;  %v4956_v62 = vld [vmem:[%s5511_s3 + $0x38] sm:$0xff]  }
 0x400   :  { %v1428_v21 = vsel %vm410_vm7, %v1422_v12, %v1424_v17  ;;  %v1429_v20 = vsel %vm410_vm7, %v1420_v3, %v1422_v12  ;;  %v4976_v9 = vld [vmem:[%s5511_s3 + $0xb8] sm:$0xff]  }
 0x401   :  { %v1453_v23 = vmul.f32 %v1436_v63, %v1429_v20  ;;  %v1454_v14 = vmul.f32 %v1440_v6, %v1428_v21  ;;  %1598 = vmatprep.subr.bf16.mxu1 %v1514_v18  ;;  %v4961_v63 = vld [vmem:[%s5511_s3 + $0xb0] sm:$0xff]   ;;  %v4970_v6 = vld [vmem:[%s5511_s3 + $0xf8] sm:$0xff]  }
 0x402   :  { %1599 = vmatpush1.bf16.msra.mxu1 %v1513_v13 }
 0x403   :  { %v1515_v26 = vpack.c.bf16 %v1453_v23, %v1453_v23  ;;  %v1516_v27 = vpack.c.bf16 %v1454_v14, %v1454_v14  ;;  %v1426_v28 = vpop.permute.xlu1 %1425 }
 0x404   :  { %v1427_v30 = vsel %vm410_vm7, %v1424_v17, %v1426_v28  ;;  %v1430_v5 = vsel %vm410_vm7, %v1426_v28, %v1420_v3  ;;  %v4932_v3 = vld [vmem:[%s5511_s3 + $0x30] sm:$0xff]   ;;  %s3976_s3 = smov 9  }
 0x405   :  { %v1455_v31 = vmul.f32 %v1444_v11, %v1427_v30  ;;  %v1456_v32 = vmul.f32 %v1448_v24, %v1430_v5  ;;  %3483 = vmatprep.subr.msk.bf16.mxu0 %vm512_vm8, %v1516_v27  ;;  %v1538_v15 = vsel %vm512_vm8, %v1515_v26, 0 }
 0x406   :  { %1558 = vmatpush1.bf16.msra.mxu0 %v1538_v15 }
 0x407   :  { %v1517_v37 = vpack.c.bf16 %v1455_v31, %v1455_v31  ;;  %v1518_v38 = vpack.c.bf16 %v1456_v32, %v1456_v32  ;;  %3613 = vmatprep.subr.bf16.mxu0 %v4777_v29 }
 0x409   :  { %3484 = vmatmul.mubr.msk.bf16.vlgmr.msra.gmra.mrb[8].mxu0 %vm508_vm9, %v3855_v16  ;;  %3485 = vmatprep.subr.msk.bf16.mxu1 %vm512_vm8, %v1518_v38  ;;  %v1544_v43 = vsel %vm512_vm8, %v1517_v37, 0 }
 0x40a   :  { %1601 = vmatpush1.bf16.msra.mxu1 %v1544_v43  ;;  %3614 = vmatpush3.bf16.msra.mxu0 %v4791_v33 }
 0x40b   :  { %3615 = vmatprep.subr.bf16.mxu0 %v4797_v10  ;;  %3635 = vmatprep.subr.bf16.mxu1 %v4802_v42 }
 0x40d   :  { %3486 = vmatmul.mubr.msk.bf16.vlgmr.msra.gmra.mrb[8].mxu1 %vm508_vm9, %v3855_v16 }
 0x40e   :  { %3616 = vmatpush3.bf16.msra.mxu0 %v4811_v44  ;;  %3636 = vmatpush3.bf16.msra.mxu1 %v4816_v34 }
 0x40f   :  { %3617 = vmatprep.subr.bf16.mxu0 %v4823_v45  ;;  %3637 = vmatprep.subr.bf16.mxu1 %v4828_v46 }
 0x410   :  { %v1522_v19 = vpop.permute.xlu0 %1521 }
 0x412   :  { %3618 = vmatpush3.bf16.msra.mxu0 %v4836_v47  ;;  %3638 = vmatpush3.bf16.msra.mxu1 %v4841_v49 }
 0x413   :  { %3619 = vmatprep.subr.bf16.mxu0 %v4848_v48  ;;  %3639 = vmatprep.subr.bf16.mxu1 %v4853_v22 }
 0x414   :  { %v1527_v8 = vpop.permute.xlu1 %1526 }
 0x416   :  { %3620 = vmatpush3.bf16.msra.mxu0 %v4860_v50  ;;  %3640 = vmatpush3.bf16.msra.mxu1 %v4865_v51 }
 0x417   :  { %3621 = vmatprep.subr.bf16.mxu0 %v4872_v52  ;;  %3641 = vmatprep.subr.bf16.mxu1 %v4877_v53 }
 0x41a   :  { %3622 = vmatpush3.bf16.msra.mxu0 %v4884_v54  ;;  %3642 = vmatpush3.bf16.msra.mxu1 %v4889_v55 }
 0x41b   :  { %3623 = vmatprep.subr.bf16.mxu0 %v4896_v56  ;;  %3643 = vmatprep.subr.bf16.mxu1 %v4901_v57 }
 0x41e   :  { %3624 = vmatpush3.bf16.msra.mxu0 %v4908_v58  ;;  %3644 = vmatpush3.bf16.msra.mxu1 %v4913_v59 }
 0x41f   :  { %3625 = vmatprep.subr.bf16.mxu0 %v4922_v60  ;;  %3645 = vmatprep.subr.bf16.mxu1 %v4927_v61 }
 0x422   :  { %3626 = vmatpush3.bf16.msra.mxu0 %v4932_v3  ;;  %3646 = vmatpush3.bf16.msra.mxu1 %v4937_v0 }
 0x423   :  { %3627 = vmatprep.subr.bf16.mxu0 %v4946_v1  ;;  %3647 = vmatprep.subr.bf16.mxu1 %v4951_v2 }
 0x426   :  { %3628 = vmatpush3.bf16.msra.mxu0 %v4956_v62  ;;  %3648 = vmatpush3.bf16.msra.mxu1 %v4961_v63 }
 0x427   :  { %3657 = vmatprep.subr.bf16.mxu0 %v4777_v29  ;;  %3649 = vmatprep.subr.bf16.mxu1 %v4970_v6 }
 0x42a   :  { %3650 = vmatpush3.bf16.msra.mxu1 %v4976_v9 }
 0x42b   :  { %3679 = vmatprep.subr.bf16.mxu1 %v4802_v42 }
 0x4dc   :  { %v1583_v7 = vpop.f32.mrb[8].mxu0 }
 0x4dd   :  { %v1585_v13 = vpop.f32.mrb[9].mxu0  ;;  %v1584_v17 = vadd.f32 %v1583_v7, %v1522_v19 }
 0x4de   :  { %v1587_v12 = vpop.f32.mrb[10].mxu0  ;;  %v1586_v18 = vadd.f32 %v1585_v13, %v1522_v19  ;;  %v1986_v13 = vpack.c.bf16 %v4569_v35, %v4569_v35  ;;  %v1985_v35 = vpack.c.bf16 %v4559_v25, %v4559_v25 }
 0x4df   :  { %v1635_v21 = vmax.f32 %v1584_v17, 0.0  ;;  %v1589_v20 = vpop.f32.mrb[11].mxu0  ;;  %v1588_v23 = vadd.f32 %v1587_v12, %v1527_v8 }
 0x4e0   :  { %v1626_v14 = vpop.f32.mrb[8].mxu1  ;;  %v1590_v11 = vadd.f32 %v1589_v20, %v1527_v8  ;;  %v1636_v24 = vmax.f32 %v1586_v18, 0.0 }
 0x4e1   :  { %v1639_v26 = vmax.f32 %v1588_v23, 0.0  ;;  %v1627_v27 = vadd.f32 %v1626_v14, %v1522_v19  ;;  %v1628_v28 = vpop.f32.mrb[9].mxu1  ;;  %v5079_v23 = vld [vmem:[%s5535_s30 + $0x1] ss:$0 sm:$0xff] }
 0x4e2   :  { %v1629_v29 = vadd.f32 %v1628_v28, %v1522_v19  ;;  %v1630_v30 = vpop.f32.mrb[10].mxu1  ;;  %v1640_v5 = vmax.f32 %v1590_v11, 0.0  ;;  %v1988_v19 = vpack.c.bf16 %v4580_v39, %v4580_v39  ;;  %v1987_v39 = vpack.c.bf16 %v4571_v36, %v4571_v36  ;;  %v5086_v28 = vld [vmem:[%s5535_s30 + $0x2] ss:$0 sm:$0xff] }
 0x4e3   :  { %v1631_v31 = vadd.f32 %v1630_v30, %v1527_v8  ;;  %v1632_v32 = vpop.f32.mrb[11].mxu1  ;;  %v1707_v15 = vpack.c.bf16 %v1639_v26, %v1635_v21  ;;  %v1637_v38 = vmax.f32 %v1627_v27, 0.0 }
 0x4e4   :  { %v1633_v16 = vadd.f32 %v1632_v32, %v1527_v8  ;;  %v1708_v37 = vpack.c.bf16 %v1640_v5, %v1636_v24  ;;  %v1638_v43 = vmax.f32 %v1629_v29, 0.0 }
 0x4e5   :  { %v1641_v42 = vmax.f32 %v1631_v31, 0.0 }
 0x4e6   :  { %v1642_v7 = vmax.f32 %v1633_v16, 0.0  ;;  %1935 = vmatprep.mubr.bf16.mxu0 %v1708_v37 }
 0x4e7   :  { %v1709_v17 = vpack.c.bf16 %v1641_v42, %v1637_v38  ;;  %1936 = vmatmul.mubr.bf16.vlgmr.msra.gmra.mrb[12].mxu0 %v1707_v15  ;;  %v5094_v15 = vld [vmem:[%s5535_s30 + $0x3] ss:$0 sm:$0xff] }
 0x4e8   :  { %v1710_v12 = vpack.c.bf16 %v1642_v7, %v1638_v43  ;;  %3658 = vmatpush3.bf16.msra.mxu0 %v4791_v33  ;;  %2021 = vmatprep.mubr.bf16.mxu0 %v1986_v13  ;;  %v3974_v33 = vmov 0.0  }
 0x4e9   :  { %3659 = vmatprep.subr.bf16.mxu0 %v4797_v10 }
 0x4ea   :  { %1976 = vmatprep.mubr.bf16.mxu1 %v1710_v12  ;;  %v5103_v12 = vld [vmem:[%s5535_s30 + $0x5] ss:$0 sm:$0xff] }
 0x4eb   :  { %1977 = vmatmul.mubr.bf16.vlgmr.msra.gmra.mrb[12].mxu1 %v1709_v17 }
 0x4ec   :  { %3660 = vmatpush3.bf16.msra.mxu0 %v4811_v44  ;;  %3680 = vmatpush3.bf16.msra.mxu1 %v4816_v34 }
 0x4ed   :  { %2061 = vmatprep.mubr.bf16.mxu1 %v1988_v19  ;;  %3661 = vmatprep.subr.bf16.mxu0 %v4823_v45 }
 0x4ee   :  { %3681 = vmatprep.subr.bf16.mxu1 %v4828_v46 }
 0x4f0   :  { %3662 = vmatpush3.bf16.msra.mxu0 %v4836_v47  ;;  %3682 = vmatpush3.bf16.msra.mxu1 %v4841_v49 }
 0x4f1   :  { %3663 = vmatprep.subr.bf16.mxu0 %v4848_v48  ;;  %3683 = vmatprep.subr.bf16.mxu1 %v4853_v22 }
 0x4f4   :  { %3664 = vmatpush3.bf16.msra.mxu0 %v4860_v50  ;;  %3684 = vmatpush3.bf16.msra.mxu1 %v4865_v51 }
 0x4f5   :  { %3665 = vmatprep.subr.bf16.mxu0 %v4872_v52  ;;  %3685 = vmatprep.subr.bf16.mxu1 %v4877_v53 }
 0x4f8   :  { %3666 = vmatpush3.bf16.msra.mxu0 %v4884_v54  ;;  %3686 = vmatpush3.bf16.msra.mxu1 %v4889_v55 }
 0x4f9   :  { %3667 = vmatprep.subr.bf16.mxu0 %v4896_v56  ;;  %3687 = vmatprep.subr.bf16.mxu1 %v4901_v57 }
 0x4fc   :  { %3668 = vmatpush3.bf16.msra.mxu0 %v4908_v58  ;;  %3688 = vmatpush3.bf16.msra.mxu1 %v4913_v59 }
 0x4fd   :  { %3669 = vmatprep.subr.bf16.mxu0 %v4922_v60  ;;  %3689 = vmatprep.subr.bf16.mxu1 %v4927_v61 }
 0x500   :  { %3670 = vmatpush3.bf16.msra.mxu0 %v4932_v3  ;;  %3690 = vmatpush3.bf16.msra.mxu1 %v4937_v0 }
 0x501   :  { %3671 = vmatprep.subr.bf16.mxu0 %v4946_v1  ;;  %3691 = vmatprep.subr.bf16.mxu1 %v4951_v2 }
 0x504   :  { %3672 = vmatpush3.bf16.msra.mxu0 %v4956_v62  ;;  %3692 = vmatpush3.bf16.msra.mxu1 %v4961_v63  ;;  %v3888_v63 = vld [vmem:[%s5521_s13] sm:$0xff]  }
 0x505   :  { %3693 = vmatprep.subr.bf16.mxu1 %v4970_v6  ;;  %3725 = vmatprep.subr.bf16.mxu0 %v3974_v33  ;;  %v3889_v6 = vld [vmem:[%s5516_s8 + $0x4] ss:$8 sps:$4 sm:$0xff]  }
 0x507   :  { %2022 = vmatmul.mubr.bf16.vlgmr.msra.gmra.mrb[16].mxu0 %v1985_v35 }
 0x508   :  { %3694 = vmatpush3.bf16.msra.mxu1 %v4976_v9  ;;  %3727 = vmatprep.mubr.msk.bf16.mxu0 %vm3975_vm10, %v3974_v33  ;;  %v5072_v9 = vld [vmem:[%s5535_s30] ss:$0 sm:$0xff] }
 0x509   :  { %2528 = vmatprep.subr.bf16.mxu1 %v3971_v4 }
 0x50b   :  { %2062 = vmatmul.mubr.bf16.vlgmr.msra.gmra.mrb[16].mxu1 %v1987_v39 }
 0x5ba   :  { %v3629_v10 = vpop.f32.mrb[12].mxu0 }
 0x5bb   :  { %v3630_v44 = vpop.f32.mrb[13].mxu0 }
 0x5bc   :  { %v3631_v34 = vadd.f32 %v3630_v44, %v3629_v10  ;;  %v3632_v45 = vpop.f32.mrb[14].mxu0  ;;  %v5114_v10 = vld [vmem:[%s5535_s30 + $0x6] ss:$0 sm:$0xff] }
 0x5bd   :  { %v3633_v25 = vpop.f32.mrb[15].mxu0 }
 0x5be   :  { %v3634_v46 = vadd.f32 %v3633_v25, %v3632_v45  ;;  %v3651_v47 = vpop.f32.mrb[12].mxu1 }
 0x5bf   :  { %v3652_v49 = vpop.f32.mrb[13].mxu1 }
 0x5c0   :  { %v3653_v48 = vadd.f32 %v3652_v49, %v3651_v47  ;;  %v3654_v22 = vpop.f32.mrb[14].mxu1  ;;  %v5122_v47 = vld [vmem:[%s5535_s30 + $0x7] ss:$0 sm:$0xff] }
 0x5c1   :  { %v3655_v50 = vpop.f32.mrb[15].mxu1 }
 0x5c2   :  { %v5020_v51 = vadd.f32 %v3653_v48, %v3631_v34  ;;  %v3656_v36 = vadd.f32 %v3655_v50, %v3654_v22 }
 0x5c4   :  { %v5022_v52 = vadd.f32 %v3656_v36, %v3634_v46  ;;  %2127 = vrot.lane.b32.xlu1 %v5020_v51, %s3976_s3 }
 0x5c6   :  { %2129 = vrot.lane.b32.xlu0 %v5022_v52, %s3976_s3  ;;  %v2280_v53 = vpack.c.bf16 %v5022_v52, %v5020_v51 }
 0x5c8   :  { %2142 = vrot.lane.b32.xlu1 %v5020_v51, %s3977_s19 }
 0x5ca   :  { %2144 = vrot.lane.b32.xlu0 %v5022_v52, %s3977_s19 }
 0x5cc   :  { %2158 = vrot.lane.b32.xlu1 %v5020_v51, %s3978_s21 }
 0x5ce   :  { %2160 = vrot.lane.b32.xlu0 %v5022_v52, %s3978_s21 }
 0x5d0   :  { %2174 = vrot.lane.b32.xlu1 %v5020_v51, %s3967_s1 }
 0x5d2   :  { %2176 = vrot.lane.b32.xlu0 %v5022_v52, %s3967_s1 }
 0x5d4   :  { %2192 = vrot.lane.b32.xlu1 %v5020_v51, %s3968_s20 }
 0x5d6   :  { %2194 = vrot.lane.b32.xlu0 %v5022_v52, %s3968_s20 }
 0x5d8   :  { %2208 = vrot.lane.b32.xlu1 %v5020_v51, %s3979_s24 }
 0x5da   :  { %v3673_v54 = vpop.f32.mrb[16].mxu0  ;;  %2210 = vrot.lane.b32.xlu0 %v5022_v52, %s3979_s24 }
 0x5db   :  { %v3674_v55 = vpop.f32.mrb[17].mxu0 }
 0x5dc   :  { %v3675_v56 = vadd.f32 %v3674_v55, %v3673_v54  ;;  %v3676_v57 = vpop.f32.mrb[18].mxu0  ;;  %2224 = vrot.lane.b32.xlu1 %v5020_v51, %s3980_s5 }
 0x5dd   :  { %v3677_v58 = vpop.f32.mrb[19].mxu0 }
 0x5de   :  { %v3695_v59 = vpop.f32.mrb[16].mxu1  ;;  %2226 = vrot.lane.b32.xlu0 %v5022_v52, %s3980_s5 }
 0x5df   :  { %v3696_v60 = vpop.f32.mrb[17].mxu1 }
 0x5e0   :  { %v3697_v61 = vadd.f32 %v3696_v60, %v3695_v59  ;;  %v3698_v3 = vpop.f32.mrb[18].mxu1  ;;  %2240 = vrot.lane.b32.xlu1 %v5020_v51, %s3981_s28  ;;  %v5130_v51 = vld [vmem:[%s5535_s30 + $0x8] ss:$0 sm:$0xff] }
 0x5e1   :  { %v3699_v0 = vpop.f32.mrb[19].mxu1 }
 0x5e2   :  { %v2064_v1 = vadd.f32 %v3697_v61, %v3675_v56  ;;  %2242 = vrot.lane.b32.xlu0 %v5022_v52, %s3981_s28  ;;  %v3891_v56 = vld [vmem:[%s5516_s8] ss:$8 sps:$4 sm:$0xff]  }
 0x5e4   :  { %v2071_v2 = vpack.c.bf16 %v2064_v1, %v2064_v1  ;;  %2287 = vperm.xlu1 %3843, %v4641_v40  }
 0x5e6   :  { %v2082_v62 = vsel %vm512_vm8, %v2071_v2, 0  ;;  %2292 = vperm.xlu0 %3844, %v4649_v41  }
 0x5e7   :  { %3726 = vmatpush3.bf16.msra.mxu0 %v2082_v62 }
 0x5e8   :  { %2308 = vmatprep.subr.bf16.mxu0 %v3971_v4 }
 0x5ea   :  { %3728 = vmatmul.mubr.msk.bf16.vlgmr.msra.gmra.mrb[20].mxu0 %vm2077_vm11, %v3888_v63  ;;  %v3892_v63 = vld [vmem:[%s5517_s9 + $0x4] ss:$8 sps:$4 sm:$0xff]  }
 0x5eb   :  { %3538 = vmatprep.mubr.msk.bf16.mxu0 %vm2304_vm12, %v3889_v6  ;;  %3556 = vmatprep.mubr.msk.bf16.mxu1 %vm2304_vm12, %v3892_v63  ;;  %v3982_v6 = vmov 2  }
 0x5ec   :  { %3845 = vset.pattern.permute.xlu0 %v3982_v6  ;;  %3846 = vset.pattern.permute.xlu1 %v3982_v6 }
 0x636   :  { %v2128_v8 = vpop.permute.xlu1 %2127 }
 0x637   :  { %v2138_v21 = vmul.f32 %v5072_v9, %v2128_v8 }
 0x638   :  { %v2130_v18 = vpop.permute.xlu0 %2129 }
 0x639   :  { %v2139_v20 = vmul.f32 %v5072_v9, %v2130_v18 }
 0x63a   :  { %v2143_v14 = vpop.permute.xlu1 %2142 }
 0x63b   :  { %v2276_v11 = vpack.c.bf16 %v2139_v20, %v2138_v21  ;;  %v2154_v26 = vmul.f32 %v5079_v23, %v2143_v14 }
 0x63c   :  { %v2145_v24 = vpop.permute.xlu0 %2144 }
 0x63d   :  { %v2155_v27 = vmul.f32 %v5079_v23, %v2145_v24  ;;  %2309 = vmatpush1.bf16.msra.mxu0 %v2276_v11 }
 0x63e   :  { %v2159_v29 = vpop.permute.xlu1 %2158  ;;  %2310 = vmatprep.subr.bf16.mxu0 %v3971_v4 }
 0x63f   :  { %v2277_v30 = vpack.c.bf16 %v2155_v27, %v2154_v26  ;;  %v2170_v31 = vmul.f32 %v5086_v28, %v2159_v29 }
 0x640   :  { %v2161_v5 = vpop.permute.xlu0 %2160 }
 0x641   :  { %v2171_v32 = vmul.f32 %v5086_v28, %v2161_v5  ;;  %2311 = vmatpush1.bf16.msra.mxu0 %v2277_v30 }
 0x642   :  { %v2175_v16 = vpop.permute.xlu1 %2174  ;;  %2312 = vmatprep.subr.bf16.mxu0 %v3971_v4 }
 0x643   :  { %v2278_v37 = vpack.c.bf16 %v2171_v32, %v2170_v31  ;;  %v2186_v42 = vmul.f32 %v5094_v15, %v2175_v16 }
 0x644   :  { %v2177_v38 = vpop.permute.xlu0 %2176 }
 0x645   :  { %v2187_v43 = vmul.f32 %v5094_v15, %v2177_v38  ;;  %2313 = vmatpush1.bf16.msra.mxu0 %v2278_v37 }
 0x646   :  { %v2193_v7 = vpop.permute.xlu1 %2192  ;;  %2314 = vmatprep.subr.bf16.mxu0 %v3971_v4 }
 0x647   :  { %v2279_v13 = vpack.c.bf16 %v2187_v43, %v2186_v42  ;;  %v2204_v33 = vmul.f32 %v5103_v12, %v2193_v7 }
 0x648   :  { %v2195_v17 = vpop.permute.xlu0 %2194 }
 0x649   :  { %2315 = vmatpush1.bf16.msra.mxu0 %v2279_v13  ;;  %v2205_v35 = vmul.f32 %v5103_v12, %v2195_v17 }
 0x64a   :  { %v2209_v19 = vpop.permute.xlu1 %2208  ;;  %2316 = vmatprep.subr.bf16.mxu0 %v3971_v4 }
 0x64b   :  { %v2281_v44 = vpack.c.bf16 %v2205_v35, %v2204_v33  ;;  %v2220_v46 = vmul.f32 %v5114_v10, %v2209_v19 }
 0x64c   :  { %v2211_v39 = vpop.permute.xlu0 %2210 }
 0x64d   :  { %2317 = vmatpush1.bf16.msra.mxu0 %v2280_v53  ;;  %v2221_v34 = vmul.f32 %v5114_v10, %v2211_v39 }
 0x64e   :  { %2318 = vmatprep.subr.bf16.mxu0 %v3971_v4  ;;  %v2225_v45 = vpop.permute.xlu1 %2224 }
 0x64f   :  { %v2282_v49 = vpack.c.bf16 %v2221_v34, %v2220_v46  ;;  %v2236_v50 = vmul.f32 %v5122_v47, %v2225_v45 }
 0x650   :  { %v2227_v25 = vpop.permute.xlu0 %2226 }
 0x651   :  { %2319 = vmatpush1.bf16.msra.mxu0 %v2281_v44  ;;  %v2237_v48 = vmul.f32 %v5122_v47, %v2227_v25 }
 0x652   :  { %2320 = vmatprep.subr.bf16.mxu0 %v3971_v4  ;;  %v2241_v36 = vpop.permute.xlu1 %2240 }
 0x653   :  { %v2283_v52 = vpack.c.bf16 %v2237_v48, %v2236_v50  ;;  %v2252_v54 = vmul.f32 %v5130_v51, %v2241_v36 }
 0x654   :  { %v2243_v22 = vpop.permute.xlu0 %2242 }
 0x655   :  { %2321 = vmatpush1.bf16.msra.mxu0 %v2282_v49  ;;  %v2253_v53 = vmul.f32 %v5130_v51, %v2243_v22 }
 0x656   :  { %2322 = vmatprep.subr.bf16.mxu0 %v3971_v4 }
 0x657   :  { %v2284_v55 = vpack.c.bf16 %v2253_v53, %v2252_v54 }
 0x659   :  { %2323 = vmatpush1.bf16.msra.mxu0 %v2283_v52 }
 0x65a   :  { %2324 = vmatprep.subr.bf16.mxu0 %v3971_v4 }
 0x65d   :  { %2325 = vmatpush1.bf16.msra.mxu0 %v2284_v55  ;;  %v3894_v55 = vld [vmem:[%s5517_s9] ss:$8 sps:$4 sm:$0xff]  }
 0x65e   :  { %2966 = vmatprep.subr.bf16.mxu0 %v3971_v4 }
 0x660   :  { %2341 = vmatmul.mubr.bf16.vlgmr.msra.gmra.mrb[20].mxu0 %v3891_v56 }
 0x663   :  { %v2288_v57 = vpop.permute.xlu1 %2287 }
 0x665   :  { %v2293_v59 = vpop.permute.xlu0 %2292 }
 0x733   :  { %v2342_v58 = vpop.f32.mrb[20].mxu0 }
 0x734   :  { %v2343_v60 = vadd.f32 %v2342_v58, %v2288_v57  ;;  %v2344_v61 = vpop.f32.mrb[21].mxu0 }
 0x735   :  { %v2345_v3 = vpop.f32.mrb[22].mxu0 }
 0x736   :  { %v5140_v0 = vmax.f32 %v2343_v60, 0.0  ;;  %v2346_v1 = vadd.f32 %v2345_v3, %v2293_v59  ;;  %v2347_v2 = vpop.f32.mrb[23].mxu0 }
 0x738   :  { %2370 = vrot.lane.b32.xlu0 %v5140_v0, %s3977_s19  ;;  %2355 = vrot.lane.b32.xlu1 %v5140_v0, %s3976_s3  ;;  %v5146_v62 = vmax.f32 %v2346_v1, 0.0 }
 0x73a   :  { %v2501_v19 = vpack.c.bf16 %v5146_v62, %v5140_v0 }
 0x73c   :  { %2385 = vrot.lane.b32.xlu0 %v5140_v0, %s3978_s21  ;;  %2357 = vrot.lane.b32.xlu1 %v5146_v62, %s3976_s3 }
 0x740   :  { %2400 = vrot.lane.b32.xlu0 %v5140_v0, %s3967_s1  ;;  %2372 = vrot.lane.b32.xlu1 %v5146_v62, %s3977_s19 }
 0x744   :  { %2417 = vrot.lane.b32.xlu0 %v5140_v0, %s3968_s20  ;;  %2387 = vrot.lane.b32.xlu1 %v5146_v62, %s3978_s21 }
 0x748   :  { %2432 = vrot.lane.b32.xlu0 %v5140_v0, %s3979_s24  ;;  %2402 = vrot.lane.b32.xlu1 %v5146_v62, %s3967_s1 }
 0x74c   :  { %2447 = vrot.lane.b32.xlu0 %v5140_v0, %s3980_s5  ;;  %2419 = vrot.lane.b32.xlu1 %v5146_v62, %s3968_s20 }
 0x750   :  { %2462 = vrot.lane.b32.xlu0 %v5140_v0, %s3981_s28  ;;  %2434 = vrot.lane.b32.xlu1 %v5146_v62, %s3979_s24 }
 0x754   :  { %2449 = vrot.lane.b32.xlu1 %v5146_v62, %s3980_s5  ;;  %2508 = vperm.xlu0 %3845, %v4641_v40  }
 0x758   :  { %2464 = vrot.lane.b32.xlu1 %v5146_v62, %s3981_s28 }
 0x75c   :  { %2513 = vperm.xlu1 %3846, %v4649_v41  }
 0x7aa   :  { %v2371_v8 = vpop.permute.xlu0 %2370  ;;  %v2356_v18 = vpop.permute.xlu1 %2355 }
 0x7ab   :  { %v2366_v14 = vmul.f32 %v5072_v9, %v2356_v18  ;;  %v2381_v27 = vmul.f32 %v5079_v23, %v2371_v8  ;;  %v3895_v8 = vld [vmem:[%s5518_s10 + $0x4] ss:$8 sps:$4 sm:$0xff]   ;;  %v3983_v18 = vmov 3  }
 0x7ac   :  { %3847 = vset.pattern.permute.xlu1 %v3983_v18  ;;  %3848 = vset.pattern.permute.xlu0 %v3983_v18 }
 0x7ae   :  { %v2386_v21 = vpop.permute.xlu0 %2385  ;;  %v2358_v20 = vpop.permute.xlu1 %2357 }
 0x7af   :  { %v2367_v11 = vmul.f32 %v5072_v9, %v2358_v20  ;;  %v2396_v5 = vmul.f32 %v5086_v28, %v2386_v21  ;;  %v5245_v21 = vld [vmem:[%s5523_s15] sm:$0xff]  ;;  %v5251_v20 = vld [vmem:[%s5523_s15 + $0x8] sm:$0xff] }
 0x7b1   :  { %v2497_v24 = vpack.c.bf16 %v2367_v11, %v2366_v14 }
 0x7b2   :  { %v2373_v26 = vpop.permute.xlu1 %2372  ;;  %v2401_v30 = vpop.permute.xlu0 %2400 }
 0x7b3   :  { %v2382_v29 = vmul.f32 %v5079_v23, %v2373_v26  ;;  %2529 = vmatpush1.bf16.msra.mxu1 %v2497_v24  ;;  %v2411_v38 = vmul.f32 %v5094_v15, %v2401_v30 }
 0x7b4   :  { %2530 = vmatprep.subr.bf16.mxu1 %v3971_v4 }
 0x7b5   :  { %v2498_v40 = vpack.c.bf16 %v2382_v29, %v2381_v27 }
 0x7b6   :  { %v2388_v41 = vpop.permute.xlu1 %2387  ;;  %v2418_v16 = vpop.permute.xlu0 %2417 }
 0x7b7   :  { %v2397_v31 = vmul.f32 %v5086_v28, %v2388_v41  ;;  %2531 = vmatpush1.bf16.msra.mxu1 %v2498_v40  ;;  %v2428_v39 = vmul.f32 %v5103_v12, %v2418_v16 }
 0x7b8   :  { %2532 = vmatprep.subr.bf16.mxu1 %v3971_v4 }
 0x7b9   :  { %v2499_v32 = vpack.c.bf16 %v2397_v31, %v2396_v5 }
 0x7ba   :  { %v2403_v37 = vpop.permute.xlu1 %2402  ;;  %v2433_v13 = vpop.permute.xlu0 %2432 }
 0x7bb   :  { %v2412_v42 = vmul.f32 %v5094_v15, %v2403_v37  ;;  %2533 = vmatpush1.bf16.msra.mxu1 %v2499_v32  ;;  %v2443_v25 = vmul.f32 %v5114_v10, %v2433_v13 }
 0x7bc   :  { %2534 = vmatprep.subr.bf16.mxu1 %v3971_v4 }
 0x7bd   :  { %v2500_v43 = vpack.c.bf16 %v2412_v42, %v2411_v38 }
 0x7be   :  { %v2420_v7 = vpop.permute.xlu1 %2419  ;;  %v2448_v34 = vpop.permute.xlu0 %2447 }
 0x7bf   :  { %2535 = vmatpush1.bf16.msra.mxu1 %v2500_v43  ;;  %v2429_v17 = vmul.f32 %v5103_v12, %v2420_v7  ;;  %v2458_v22 = vmul.f32 %v5122_v47, %v2448_v34 }
 0x7c0   :  { %2536 = vmatprep.subr.bf16.mxu1 %v3971_v4 }
 0x7c1   :  { %v2502_v33 = vpack.c.bf16 %v2429_v17, %v2428_v39 }
 0x7c2   :  { %v2435_v35 = vpop.permute.xlu1 %2434  ;;  %v2463_v50 = vpop.permute.xlu0 %2462 }
 0x7c3   :  { %2537 = vmatpush1.bf16.msra.mxu1 %v2501_v19  ;;  %v2444_v44 = vmul.f32 %v5114_v10, %v2435_v35  ;;  %v2473_v53 = vmul.f32 %v5130_v51, %v2463_v50 }
 0x7c4   :  { %2538 = vmatprep.subr.bf16.mxu1 %v3971_v4 }
 0x7c5   :  { %v2503_v46 = vpack.c.bf16 %v2444_v44, %v2443_v25 }
 0x7c6   :  { %v2450_v45 = vpop.permute.xlu1 %2449 }
 0x7c7   :  { %2539 = vmatpush1.bf16.msra.mxu1 %v2502_v33  ;;  %v2459_v49 = vmul.f32 %v5122_v47, %v2450_v45 }
 0x7c8   :  { %2540 = vmatprep.subr.bf16.mxu1 %v3971_v4 }
 0x7c9   :  { %v2504_v36 = vpack.c.bf16 %v2459_v49, %v2458_v22 }
 0x7ca   :  { %v2465_v48 = vpop.permute.xlu1 %2464 }
 0x7cb   :  { %2541 = vmatpush1.bf16.msra.mxu1 %v2503_v46  ;;  %v2474_v52 = vmul.f32 %v5130_v51, %v2465_v48 }
 0x7cc   :  { %2542 = vmatprep.subr.bf16.mxu1 %v3971_v4 }
 0x7cd   :  { %v2505_v54 = vpack.c.bf16 %v2474_v52, %v2473_v53 }
 0x7cf   :  { %2543 = vmatpush1.bf16.msra.mxu1 %v2504_v36 }
 0x7d0   :  { %2544 = vmatprep.subr.bf16.mxu1 %v3971_v4 }
 0x7d3   :  { %2545 = vmatpush1.bf16.msra.mxu1 %v2505_v54  ;;  %v2509_v56 = vpop.permute.xlu0 %2508 }
 0x7d4   :  { %2746 = vmatprep.subr.bf16.mxu1 %v3971_v4 }
 0x7d6   :  { %2561 = vmatmul.mubr.bf16.vlgmr.msra.gmra.mrb[20].mxu1 %v3894_v55 }
 0x7d7   :  { %3574 = vmatprep.mubr.msk.bf16.mxu1 %vm2304_vm12, %v3895_v8 }
 0x7db   :  { %v2514_v58 = vpop.permute.xlu1 %2513 }
 0x8a9   :  { %v2562_v57 = vpop.f32.mrb[20].mxu1 }
 0x8aa   :  { %v2563_v59 = vadd.f32 %v2562_v57, %v2509_v56  ;;  %v2564_v60 = vpop.f32.mrb[21].mxu1 }
 0x8ab   :  { %v2565_v61 = vpop.f32.mrb[22].mxu1 }
 0x8ac   :  { %v5212_v3 = vmax.f32 %v2563_v59, 0.0  ;;  %v2566_v1 = vadd.f32 %v2565_v61, %v2514_v58  ;;  %v2567_v2 = vpop.f32.mrb[23].mxu1  ;;  %v3897_v58 = vld [vmem:[%s5518_s10] ss:$8 sps:$4 sm:$0xff]  }
 0x8ae   :  { %v2570_v63 = vmax.f32 %v2566_v1, 0.0  ;;  %2573 = vrot.lane.b32.xlu1 %v5212_v3, %s3976_s3 }
 0x8b0   :  { %2575 = vrot.lane.b32.xlu0 %v2570_v63, %s3976_s3  ;;  %v2719_v6 = vpack.c.bf16 %v2570_v63, %v5212_v3 }
 0x8b2   :  { %2588 = vrot.lane.b32.xlu1 %v5212_v3, %s3977_s19 }
 0x8b4   :  { %2590 = vrot.lane.b32.xlu0 %v2570_v63, %s3977_s19 }
 0x8b6   :  { %2603 = vrot.lane.b32.xlu1 %v5212_v3, %s3978_s21 }
 0x8b8   :  { %2605 = vrot.lane.b32.xlu0 %v2570_v63, %s3978_s21 }
 0x8ba   :  { %2618 = vrot.lane.b32.xlu1 %v5212_v3, %s3967_s1 }
 0x8bc   :  { %2620 = vrot.lane.b32.xlu0 %v2570_v63, %s3967_s1 }
 0x8be   :  { %2635 = vrot.lane.b32.xlu1 %v5212_v3, %s3968_s20 }
 0x8c0   :  { %2637 = vrot.lane.b32.xlu0 %v2570_v63, %s3968_s20 }
 0x8c2   :  { %2650 = vrot.lane.b32.xlu1 %v5212_v3, %s3979_s24 }
 0x8c4   :  { %2652 = vrot.lane.b32.xlu0 %v2570_v63, %s3979_s24 }
 0x8c6   :  { %2665 = vrot.lane.b32.xlu1 %v5212_v3, %s3980_s5 }
 0x8c8   :  { %2667 = vrot.lane.b32.xlu0 %v2570_v63, %s3980_s5 }
 0x8ca   :  { %2680 = vrot.lane.b32.xlu1 %v5212_v3, %s3981_s28 }
 0x8cc   :  { %2682 = vrot.lane.b32.xlu0 %v2570_v63, %s3981_s28 }
 0x8ce   :  { %2726 = vperm.xlu1 %3847, %v5245_v21  }
 0x8d0   :  { %2731 = vperm.xlu0 %3848, %v5251_v20  }
 0x920   :  { %v2574_v14 = vpop.permute.xlu1 %2573 }
 0x921   :  { %v2584_v24 = vmul.f32 %v5072_v9, %v2574_v14 }
 0x922   :  { %v2576_v11 = vpop.permute.xlu0 %2575 }
 0x923   :  { %v2585_v26 = vmul.f32 %v5072_v9, %v2576_v11 }
 0x924   :  { %v2589_v27 = vpop.permute.xlu1 %2588 }
 0x925   :  { %v2715_v29 = vpack.c.bf16 %v2585_v26, %v2584_v24  ;;  %v2599_v40 = vmul.f32 %v5079_v23, %v2589_v27 }
 0x926   :  { %v2591_v30 = vpop.permute.xlu0 %2590 }
 0x927   :  { %v2600_v41 = vmul.f32 %v5079_v23, %v2591_v30  ;;  %2747 = vmatpush1.bf16.msra.mxu1 %v2715_v29 }
 0x928   :  { %v2604_v5 = vpop.permute.xlu1 %2603  ;;  %2748 = vmatprep.subr.bf16.mxu1 %v3971_v4 }
 0x929   :  { %v2716_v31 = vpack.c.bf16 %v2600_v41, %v2599_v40  ;;  %v2614_v16 = vmul.f32 %v5086_v28, %v2604_v5 }
 0x92a   :  { %v2606_v32 = vpop.permute.xlu0 %2605 }
 0x92b   :  { %v2615_v37 = vmul.f32 %v5086_v28, %v2606_v32  ;;  %2749 = vmatpush1.bf16.msra.mxu1 %v2716_v31 }
 0x92c   :  { %v2619_v38 = vpop.permute.xlu1 %2618  ;;  %2750 = vmatprep.subr.bf16.mxu1 %v3971_v4 }
 0x92d   :  { %v2717_v42 = vpack.c.bf16 %v2615_v37, %v2614_v16  ;;  %v2629_v7 = vmul.f32 %v5094_v15, %v2619_v38 }
 0x92e   :  { %v2621_v43 = vpop.permute.xlu0 %2620 }
 0x92f   :  { %v2630_v13 = vmul.f32 %v5094_v15, %v2621_v43  ;;  %2751 = vmatpush1.bf16.msra.mxu1 %v2717_v42 }
 0x930   :  { %v2636_v17 = vpop.permute.xlu1 %2635  ;;  %2752 = vmatprep.subr.bf16.mxu1 %v3971_v4 }
 0x931   :  { %v2718_v19 = vpack.c.bf16 %v2630_v13, %v2629_v7  ;;  %v2646_v34 = vmul.f32 %v5103_v12, %v2636_v17 }
 0x932   :  { %v2638_v35 = vpop.permute.xlu0 %2637 }
 0x933   :  { %2753 = vmatpush1.bf16.msra.mxu1 %v2718_v19  ;;  %v2647_v33 = vmul.f32 %v5103_v12, %v2638_v35 }
 0x934   :  { %v2651_v39 = vpop.permute.xlu1 %2650  ;;  %2754 = vmatprep.subr.bf16.mxu1 %v3971_v4 }
 0x935   :  { %v2720_v45 = vpack.c.bf16 %v2647_v33, %v2646_v34  ;;  %v2661_v48 = vmul.f32 %v5114_v10, %v2651_v39 }
 0x936   :  { %v2653_v44 = vpop.permute.xlu0 %2652 }
 0x937   :  { %2755 = vmatpush1.bf16.msra.mxu1 %v2719_v6  ;;  %v2662_v25 = vmul.f32 %v5114_v10, %v2653_v44 }
 0x938   :  { %2756 = vmatprep.subr.bf16.mxu1 %v3971_v4  ;;  %v2666_v46 = vpop.permute.xlu1 %2665 }
 0x939   :  { %v2721_v22 = vpack.c.bf16 %v2662_v25, %v2661_v48  ;;  %v2676_v52 = vmul.f32 %v5122_v47, %v2666_v46 }
 0x93a   :  { %v2668_v49 = vpop.permute.xlu0 %2667 }
 0x93b   :  { %2757 = vmatpush1.bf16.msra.mxu1 %v2720_v45  ;;  %v2677_v50 = vmul.f32 %v5122_v47, %v2668_v49 }
 0x93c   :  { %2758 = vmatprep.subr.bf16.mxu1 %v3971_v4  ;;  %v2681_v53 = vpop.permute.xlu1 %2680 }
 0x93d   :  { %v2722_v54 = vpack.c.bf16 %v2677_v50, %v2676_v52  ;;  %v2691_v56 = vmul.f32 %v5130_v51, %v2681_v53 }
 0x93e   :  { %v2683_v36 = vpop.permute.xlu0 %2682 }
 0x93f   :  { %2759 = vmatpush1.bf16.msra.mxu1 %v2721_v22  ;;  %v2692_v55 = vmul.f32 %v5130_v51, %v2683_v36 }
 0x940   :  { %2760 = vmatprep.subr.bf16.mxu1 %v3971_v4 }
 0x941   :  { %v2723_v57 = vpack.c.bf16 %v2692_v55, %v2691_v56 }
 0x943   :  { %2761 = vmatpush1.bf16.msra.mxu1 %v2722_v54 }
 0x944   :  { %2762 = vmatprep.subr.bf16.mxu1 %v3971_v4 }
 0x947   :  { %2763 = vmatpush1.bf16.msra.mxu1 %v2723_v57 }
 0x948   :  { %3184 = vmatprep.subr.bf16.mxu1 %v3971_v4 }
 0x94a   :  { %2779 = vmatmul.mubr.bf16.vlgmr.msra.gmra.mrb[24].mxu1 %v3897_v58 }
 0x94d   :  { %v2727_v59 = vpop.permute.xlu1 %2726 }
 0x94f   :  { %v2732_v61 = vpop.permute.xlu0 %2731 }
 0xa1d   :  { %v2780_v60 = vpop.f32.mrb[24].mxu1 }
 0xa1e   :  { %v2781_v3 = vadd.f32 %v2780_v60, %v2727_v59  ;;  %v2782_v1 = vpop.f32.mrb[25].mxu1 }
 0xa1f   :  { %v2783_v2 = vpop.f32.mrb[26].mxu1 }
 0xa20   :  { %v2787_v63 = vadd.f32 %v2781_v3, %v5140_v0  ;;  %v2784_v6 = vadd.f32 %v2783_v2, %v2732_v61  ;;  %v2785_v8 = vpop.f32.mrb[27].mxu1  ;;  %v3898_v0 = vld [vmem:[%s5519_s11 + $0x4] ss:$8 sps:$4 sm:$0xff]   ;;  %v3900_v61 = vld [vmem:[%s5519_s11] ss:$8 sps:$4 sm:$0xff]  }
 0xa21   :  { %3592 = vmatprep.mubr.msk.bf16.mxu0 %vm2304_vm12, %v3898_v0 }
 0xa22   :  { %v5284_v18 = vmax.f32 %v2787_v63, 0.0  ;;  %v2788_v14 = vadd.f32 %v2784_v6, %v5146_v62  ;;  %v3984_v62 = vmov 4  }
 0xa23   :  { %3849 = vset.pattern.permute.xlu0 %v3984_v62  ;;  %3850 = vset.pattern.permute.xlu1 %v3984_v62 }
 0xa24   :  { %2808 = vrot.lane.b32.xlu0 %v5284_v18, %s3977_s19  ;;  %2793 = vrot.lane.b32.xlu1 %v5284_v18, %s3976_s3  ;;  %v5291_v11 = vmax.f32 %v2788_v14, 0.0 }
 0xa26   :  { %v2939_v45 = vpack.c.bf16 %v5291_v11, %v5284_v18 }
 0xa28   :  { %2823 = vrot.lane.b32.xlu0 %v5284_v18, %s3978_s21  ;;  %2795 = vrot.lane.b32.xlu1 %v5291_v11, %s3976_s3 }
 0xa2c   :  { %2838 = vrot.lane.b32.xlu0 %v5284_v18, %s3967_s1  ;;  %2810 = vrot.lane.b32.xlu1 %v5291_v11, %s3977_s19 }
 0xa30   :  { %2855 = vrot.lane.b32.xlu0 %v5284_v18, %s3968_s20  ;;  %2825 = vrot.lane.b32.xlu1 %v5291_v11, %s3978_s21 }
 0xa34   :  { %2870 = vrot.lane.b32.xlu0 %v5284_v18, %s3979_s24  ;;  %2840 = vrot.lane.b32.xlu1 %v5291_v11, %s3967_s1 }
 0xa38   :  { %2885 = vrot.lane.b32.xlu0 %v5284_v18, %s3980_s5  ;;  %2857 = vrot.lane.b32.xlu1 %v5291_v11, %s3968_s20 }
 0xa3c   :  { %2900 = vrot.lane.b32.xlu0 %v5284_v18, %s3981_s28  ;;  %2872 = vrot.lane.b32.xlu1 %v5291_v11, %s3979_s24 }
 0xa40   :  { %2887 = vrot.lane.b32.xlu1 %v5291_v11, %s3980_s5  ;;  %2946 = vperm.xlu0 %3849, %v5245_v21  }
 0xa44   :  { %2902 = vrot.lane.b32.xlu1 %v5291_v11, %s3981_s28 }
 0xa48   :  { %2951 = vperm.xlu1 %3850, %v5251_v20  }
 0xa96   :  { %v2809_v24 = vpop.permute.xlu0 %2808  ;;  %v2794_v26 = vpop.permute.xlu1 %2793 }
 0xa97   :  { %v2804_v30 = vmul.f32 %v5072_v9, %v2794_v26  ;;  %v2819_v31 = vmul.f32 %v5079_v23, %v2809_v24 }
 0xa9a   :  { %v2824_v27 = vpop.permute.xlu0 %2823  ;;  %v2796_v29 = vpop.permute.xlu1 %2795 }
 0xa9b   :  { %v2805_v40 = vmul.f32 %v5072_v9, %v2796_v29  ;;  %v2834_v42 = vmul.f32 %v5086_v28, %v2824_v27  ;;  %v3901_v27 = vld [vmem:[%s5520_s12 + $0x4] ss:$8 sps:$4 sm:$0xff]  }
 0xa9c   :  { %3610 = vmatprep.mubr.msk.bf16.mxu1 %vm2304_vm12, %v3901_v27  ;;  %v3229_v29 = vld [vmem:[%s5512_s4] sm:$0xff] }
 0xa9d   :  { %v2935_v41 = vpack.c.bf16 %v2805_v40, %v2804_v30  ;;  %v3230_v30 = vld [vmem:[%s5512_s4 + $0x8] sm:$0xff]  ;;  %v3231_v40 = vld [vmem:[%s5512_s4 + $0x10] sm:$0xff] }
 0xa9e   :  { %v2811_v5 = vpop.permute.xlu1 %2810  ;;  %v2839_v16 = vpop.permute.xlu0 %2838 }
 0xa9f   :  { %v2820_v32 = vmul.f32 %v5079_v23, %v2811_v5  ;;  %2967 = vmatpush1.bf16.msra.mxu0 %v2935_v41  ;;  %v2849_v19 = vmul.f32 %v5094_v15, %v2839_v16  ;;  %v3985_v41 = vmov 5   ;;  %v3773_v5 = vpack.c.bf16 %v3230_v30, %v3229_v29  ;;  %v3233_v16 = vld [vmem:[%s5512_s4 + $0x20] sm:$0xff]  ;;  %v3242_v30 = vld [vmem:[%s5512_s4 + $0x68] sm:$0xff] }
 0xaa0   :  { %2968 = vmatprep.subr.bf16.mxu0 %v3971_v4  ;;  %3851 = vset.pattern.permute.xlu1 %v3985_v41  ;;  %v3903_v29 = vld [vmem:[%s5520_s12] ss:$8 sps:$4 sm:$0xff]  }
 0xaa1   :  { %v2936_v37 = vpack.c.bf16 %v2820_v32, %v2819_v31  ;;  %3852 = vset.pattern.permute.xlu0 %v3985_v41  ;;  %v3232_v31 = vld [vmem:[%s5512_s4 + $0x18] sm:$0xff] }
 0xaa2   :  { %v2826_v38 = vpop.permute.xlu1 %2825  ;;  %v2856_v13 = vpop.permute.xlu0 %2855  ;;  %v3777_v32 = vpack.c.bf16 %v3232_v31, %v3231_v40 }
 0xaa3   :  { %v2835_v43 = vmul.f32 %v5086_v28, %v2826_v38  ;;  %2969 = vmatpush1.bf16.msra.mxu0 %v2936_v37  ;;  %v2866_v46 = vmul.f32 %v5103_v12, %v2856_v13  ;;  %v3234_v37 = vld [vmem:[%s5512_s4 + $0x28] sm:$0xff] }
 0xaa4   :  { %2970 = vmatprep.subr.bf16.mxu0 %v3971_v4  ;;  %v3781_v38 = vpack.c.bf16 %v3234_v37, %v3233_v16 }
 0xaa5   :  { %v2937_v7 = vpack.c.bf16 %v2835_v43, %v2834_v42  ;;  %v3235_v42 = vld [vmem:[%s5512_s4 + $0x30] sm:$0xff]  ;;  %v3236_v43 = vld [vmem:[%s5512_s4 + $0x38] sm:$0xff] }
 0xaa6   :  { %v2841_v17 = vpop.permute.xlu1 %2840  ;;  %v2871_v44 = vpop.permute.xlu0 %2870 }
 0xaa7   :  { %v2850_v35 = vmul.f32 %v5094_v15, %v2841_v17  ;;  %2971 = vmatpush1.bf16.msra.mxu0 %v2937_v7  ;;  %v2881_v36 = vmul.f32 %v5114_v10, %v2871_v44  ;;  %v3785_v7 = vpack.c.bf16 %v3236_v43, %v3235_v42  ;;  %v3239_v17 = vld [vmem:[%s5512_s4 + $0x50] sm:$0xff] }
 0xaa8   :  { %2972 = vmatprep.subr.bf16.mxu0 %v3971_v4 }
 0xaa9   :  { %v2938_v39 = vpack.c.bf16 %v2850_v35, %v2849_v19  ;;  %v3240_v19 = vld [vmem:[%s5512_s4 + $0x58] sm:$0xff] }
 0xaaa   :  { %v2858_v33 = vpop.permute.xlu1 %2857  ;;  %v2886_v22 = vpop.permute.xlu0 %2885  ;;  %v3793_v35 = vpack.c.bf16 %v3240_v19, %v3239_v17  ;;  %v3320_v17 = vld [vmem:[%s5524_s16] sm:$0xff] }
 0xaab   :  { %2973 = vmatpush1.bf16.msra.mxu0 %v2938_v39  ;;  %v2867_v34 = vmul.f32 %v5103_v12, %v2858_v33  ;;  %v2896_v55 = vmul.f32 %v5122_v47, %v2886_v22  ;;  %v3322_v19 = vld [vmem:[%s5525_s17] sm:$0xff] }
 0xaac   :  { %2974 = vmatprep.subr.bf16.mxu0 %v3971_v4 }
 0xaad   :  { %v2940_v49 = vpack.c.bf16 %v2867_v34, %v2866_v46 }
 0xaae   :  { %v2873_v25 = vpop.permute.xlu1 %2872  ;;  %v2901_v56 = vpop.permute.xlu0 %2900 }
 0xaaf   :  { %2975 = vmatpush1.bf16.msra.mxu0 %v2939_v45  ;;  %v2882_v48 = vmul.f32 %v5114_v10, %v2873_v25  ;;  %v2911_v59 = vmul.f32 %v5130_v51, %v2901_v56 }
 0xab0   :  { %2976 = vmatprep.subr.bf16.mxu0 %v3971_v4 }
 0xab1   :  { %v2941_v52 = vpack.c.bf16 %v2882_v48, %v2881_v36 }
 0xab2   :  { %v2888_v50 = vpop.permute.xlu1 %2887 }
 0xab3   :  { %2977 = vmatpush1.bf16.msra.mxu0 %v2940_v49  ;;  %v2897_v53 = vmul.f32 %v5122_v47, %v2888_v50 }
 0xab4   :  { %2978 = vmatprep.subr.bf16.mxu0 %v3971_v4 }
 0xab5   :  { %v2942_v57 = vpack.c.bf16 %v2897_v53, %v2896_v55 }
 0xab6   :  { %v2903_v54 = vpop.permute.xlu1 %2902 }
 0xab7   :  { %2979 = vmatpush1.bf16.msra.mxu0 %v2941_v52  ;;  %v2912_v58 = vmul.f32 %v5130_v51, %v2903_v54 }
 0xab8   :  { %2980 = vmatprep.subr.bf16.mxu0 %v3971_v4 }
 0xab9   :  { %v2943_v60 = vpack.c.bf16 %v2912_v58, %v2911_v59 }
 0xabb   :  { %2981 = vmatpush1.bf16.msra.mxu0 %v2942_v57 }
 0xabc   :  { %2982 = vmatprep.subr.bf16.mxu0 %v3971_v4 }
 0xabf   :  { %2983 = vmatpush1.bf16.msra.mxu0 %v2943_v60  ;;  %v2947_v3 = vpop.permute.xlu0 %2946 }
 0xac0   :  { %3774 = vmatprep.subr.bf16.mxu0 %v3773_v5 }
 0xac2   :  { %2999 = vmatmul.mubr.bf16.vlgmr.msra.gmra.mrb[24].mxu0 %v3900_v61 }
 0xac3   :  { %3776 = vmatpush3.bf16.msra.mxu0 %v3773_v5 }
 0xac4   :  { %3778 = vmatprep.subr.bf16.mxu0 %v3777_v32 }
 0xac7   :  { %v2952_v2 = vpop.permute.xlu1 %2951  ;;  %3780 = vmatpush3.bf16.msra.mxu0 %v3777_v32 }
 0xac8   :  { %3782 = vmatprep.subr.bf16.mxu0 %v3781_v38 }
 0xacb   :  { %3784 = vmatpush3.bf16.msra.mxu0 %v3781_v38 }
 0xacc   :  { %3786 = vmatprep.subr.bf16.mxu0 %v3785_v7 }
 0xacf   :  { %3788 = vmatpush3.bf16.msra.mxu0 %v3785_v7 }
 0xb95   :  { %v3000_v1 = vpop.f32.mrb[24].mxu0 }
 0xb96   :  { %v3001_v63 = vadd.f32 %v3000_v1, %v2947_v3  ;;  %v3002_v6 = vpop.f32.mrb[25].mxu0 }
 0xb97   :  { %v3003_v8 = vpop.f32.mrb[26].mxu0 }
 0xb98   :  { %v5356_v14 = vmax.f32 %v3001_v63, 0.0  ;;  %v3004_v0 = vadd.f32 %v3003_v8, %v2952_v2  ;;  %v3005_v62 = vpop.f32.mrb[27].mxu0 }
 0xb9a   :  { %v5358_v24 = vmax.f32 %v3004_v0, 0.0  ;;  %3011 = vrot.lane.b32.xlu1 %v5356_v14, %s3976_s3 }
 0xb9c   :  { %3013 = vrot.lane.b32.xlu0 %v5358_v24, %s3976_s3  ;;  %v3157_v26 = vpack.c.bf16 %v5358_v24, %v5356_v14 }
 0xb9e   :  { %3026 = vrot.lane.b32.xlu1 %v5356_v14, %s3977_s19 }
 0xba0   :  { %3028 = vrot.lane.b32.xlu0 %v5358_v24, %s3977_s19 }
 0xba2   :  { %3041 = vrot.lane.b32.xlu1 %v5356_v14, %s3978_s21 }
 0xba4   :  { %3043 = vrot.lane.b32.xlu0 %v5358_v24, %s3978_s21 }
 0xba6   :  { %3056 = vrot.lane.b32.xlu1 %v5356_v14, %s3967_s1 }
 0xba8   :  { %3058 = vrot.lane.b32.xlu0 %v5358_v24, %s3967_s1 }
 0xbaa   :  { %3073 = vrot.lane.b32.xlu1 %v5356_v14, %s3968_s20 }
 0xbac   :  { %3075 = vrot.lane.b32.xlu0 %v5358_v24, %s3968_s20 }
 0xbae   :  { %3088 = vrot.lane.b32.xlu1 %v5356_v14, %s3979_s24 }
 0xbb0   :  { %3090 = vrot.lane.b32.xlu0 %v5358_v24, %s3979_s24 }
 0xbb2   :  { %3103 = vrot.lane.b32.xlu1 %v5356_v14, %s3980_s5 }
 0xbb4   :  { %3105 = vrot.lane.b32.xlu0 %v5358_v24, %s3980_s5 }
 0xbb6   :  { %3118 = vrot.lane.b32.xlu1 %v5356_v14, %s3981_s28 }
 0xbb8   :  { %3120 = vrot.lane.b32.xlu0 %v5358_v24, %s3981_s28 }
 0xbba   :  { %3164 = vperm.xlu1 %3851, %v5245_v21   ;;  %v3237_v21 = vld [vmem:[%s5512_s4 + $0x40] sm:$0xff] }
 0xbbc   :  { %3169 = vperm.xlu0 %3852, %v5251_v20   ;;  %v3238_v20 = vld [vmem:[%s5512_s4 + $0x48] sm:$0xff] }
 0xbbd   :  { %v3789_v13 = vpack.c.bf16 %v3238_v20, %v3237_v21 }
 0xbbe   :  { %3853 = vset.pattern.permute.xlu1 %v3971_v4 }
 0xbbf   :  { %3790 = vmatprep.subr.bf16.mxu0 %v3789_v13  ;;  %3326 = vperm.xlu1 %3853, %v3322_v19  }
 0xbc0   :  { %3854 = vset.pattern.permute.xlu0 %v3971_v4  ;;  %3792 = vmatpush3.bf16.msra.mxu0 %v3789_v13 }
 0xbc1   :  { %3794 = vmatprep.subr.bf16.mxu0 %v3793_v35 }
 0xbc4   :  { %3796 = vmatpush3.bf16.msra.mxu0 %v3793_v35 }
 0xc0c   :  { %v3012_v39 = vpop.permute.xlu1 %3011 }
 0xc0d   :  { %v3022_v44 = vmul.f32 %v5072_v9, %v3012_v39 }
 0xc0e   :  { %v3014_v33 = vpop.permute.xlu0 %3013 }
 0xc0f   :  { %v3023_v34 = vmul.f32 %v5072_v9, %v3014_v33  ;;  %v3321_v33 = vld [vmem:[%s5524_s16 + $0x8] sm:$0x3] }
 0xc10   :  { %v3027_v45 = vpop.permute.xlu1 %3026 }
 0xc11   :  { %v3153_v25 = vpack.c.bf16 %v3023_v34, %v3022_v44  ;;  %v3037_v49 = vmul.f32 %v5079_v23, %v3027_v45 }
 0xc12   :  { %v3029_v46 = vpop.permute.xlu0 %3028 }
 0xc13   :  { %v3038_v48 = vmul.f32 %v5079_v23, %v3029_v46  ;;  %3185 = vmatpush1.bf16.msra.mxu1 %v3153_v25 }
 0xc14   :  { %v3042_v22 = vpop.permute.xlu1 %3041  ;;  %3186 = vmatprep.subr.bf16.mxu1 %v3971_v4 }
 0xc15   :  { %v3154_v50 = vpack.c.bf16 %v3038_v48, %v3037_v49  ;;  %v3052_v52 = vmul.f32 %v5086_v28, %v3042_v22 }
 0xc16   :  { %v3044_v36 = vpop.permute.xlu0 %3043 }
 0xc17   :  { %v3053_v53 = vmul.f32 %v5086_v28, %v3044_v36  ;;  %3187 = vmatpush1.bf16.msra.mxu1 %v3154_v50 }
 0xc18   :  { %v3057_v54 = vpop.permute.xlu1 %3056  ;;  %3188 = vmatprep.subr.bf16.mxu1 %v3971_v4 }
 0xc19   :  { %v3155_v9 = vpack.c.bf16 %v3053_v53, %v3052_v52  ;;  %v3067_v56 = vmul.f32 %v5094_v15, %v3057_v54 }
 0xc1a   :  { %v3059_v55 = vpop.permute.xlu0 %3058 }
 0xc1b   :  { %v3068_v23 = vmul.f32 %v5094_v15, %v3059_v55  ;;  %3189 = vmatpush1.bf16.msra.mxu1 %v3155_v9 }
 0xc1c   :  { %v3074_v57 = vpop.permute.xlu1 %3073  ;;  %3190 = vmatprep.subr.bf16.mxu1 %v3971_v4 }
 0xc1d   :  { %v3156_v58 = vpack.c.bf16 %v3068_v23, %v3067_v56  ;;  %v3084_v3 = vmul.f32 %v5103_v12, %v3074_v57 }
 0xc1e   :  { %v3076_v59 = vpop.permute.xlu0 %3075 }
 0xc1f   :  { %3191 = vmatpush1.bf16.msra.mxu1 %v3156_v58  ;;  %v3085_v28 = vmul.f32 %v5103_v12, %v3076_v59 }
 0xc20   :  { %v3089_v60 = vpop.permute.xlu1 %3088  ;;  %3192 = vmatprep.subr.bf16.mxu1 %v3971_v4 }
 0xc21   :  { %v3158_v15 = vpack.c.bf16 %v3085_v28, %v3084_v3  ;;  %v3099_v6 = vmul.f32 %v5114_v10, %v3089_v60 }
 0xc22   :  { %v3091_v61 = vpop.permute.xlu0 %3090 }
 0xc23   :  { %3193 = vmatpush1.bf16.msra.mxu1 %v3157_v26  ;;  %v3100_v1 = vmul.f32 %v5114_v10, %v3091_v61 }
 0xc24   :  { %3194 = vmatprep.subr.bf16.mxu1 %v3971_v4  ;;  %v3104_v2 = vpop.permute.xlu1 %3103 }
 0xc25   :  { %v3159_v8 = vpack.c.bf16 %v3100_v1, %v3099_v6  ;;  %v3114_v62 = vmul.f32 %v5122_v47, %v3104_v2 }
 0xc26   :  { %v3106_v63 = vpop.permute.xlu0 %3105 }
 0xc27   :  { %3195 = vmatpush1.bf16.msra.mxu1 %v3158_v15  ;;  %v3115_v0 = vmul.f32 %v5122_v47, %v3106_v63  ;;  %v3241_v47 = vld [vmem:[%s5512_s4 + $0x60] sm:$0xff] }
 0xc28   :  { %3196 = vmatprep.subr.bf16.mxu1 %v3971_v4  ;;  %v3119_v14 = vpop.permute.xlu1 %3118  ;;  %v3797_v40 = vpack.c.bf16 %v3242_v30, %v3241_v47 }
 0xc29   :  { %v3160_v24 = vpack.c.bf16 %v3115_v0, %v3114_v62  ;;  %v3129_v27 = vmul.f32 %v5130_v51, %v3119_v14 }
 0xc2a   :  { %v3121_v12 = vpop.permute.xlu0 %3120  ;;  %3798 = vmatprep.subr.bf16.mxu0 %v3797_v40 }
 0xc2b   :  { %3197 = vmatpush1.bf16.msra.mxu1 %v3159_v8  ;;  %v3130_v26 = vmul.f32 %v5130_v51, %v3121_v12  ;;  %3800 = vmatpush3.bf16.msra.mxu0 %v3797_v40  ;;  %v3244_v51 = vld [vmem:[%s5512_s4 + $0x78] sm:$0xff] }
 0xc2c   :  { %3198 = vmatprep.subr.bf16.mxu1 %v3971_v4 }
 0xc2d   :  { %v3161_v10 = vpack.c.bf16 %v3130_v26, %v3129_v27 }
 0xc2f   :  { %3199 = vmatpush1.bf16.msra.mxu1 %v3160_v24 }
 0xc30   :  { %3200 = vmatprep.subr.bf16.mxu1 %v3971_v4  ;;  %v3243_v4 = vld [vmem:[%s5512_s4 + $0x70] sm:$0xff] }
 0xc31   :  { %v3801_v41 = vpack.c.bf16 %v3244_v51, %v3243_v4 }
 0xc33   :  { %3201 = vmatpush1.bf16.msra.mxu1 %v3161_v10  ;;  %3802 = vmatprep.subr.bf16.mxu0 %v3801_v41 }
 0xc34   :  { %3804 = vmatpush3.bf16.msra.mxu0 %v3801_v41 }
 0xc36   :  { %3217 = vmatmul.mubr.bf16.vlgmr.msra.gmra.mrb[28].mxu1 %v3903_v29 }
 0xc39   :  { %v3165_v5 = vpop.permute.xlu1 %3164 }
 0xc3b   :  { %v3170_v32 = vpop.permute.xlu0 %3169 }
 0xc3e   :  { %v3327_v44 = vpop.permute.xlu1 %3326 }
 0xd09   :  { %v3218_v31 = vpop.f32.mrb[28].mxu1 }
 0xd0a   :  { %v3219_v16 = vadd.f32 %v3218_v31, %v3165_v5  ;;  %v3220_v37 = vpop.f32.mrb[29].mxu1 }
 0xd0b   :  { %v3221_v38 = vpop.f32.mrb[30].mxu1 }
 0xd0c   :  { %v3225_v42 = vadd.f32 %v3219_v16, %v5284_v18  ;;  %v3222_v43 = vadd.f32 %v3221_v38, %v3170_v32  ;;  %v3223_v7 = vpop.f32.mrb[31].mxu1  ;;  %v3323_v18 = vld [vmem:[%s5525_s17 + $0x8] sm:$0x3] }
 0xd0d   :  { %3331 = vperm.xlu1 %3853, %v3323_v18  }
 0xd0e   :  { %v3227_v21 = vmax.f32 %v3225_v42, 0.0  ;;  %v3226_v20 = vadd.f32 %v3222_v43, %v5291_v11 }
 0xd10   :  { %v3228_v13 = vmax.f32 %v3226_v20, 0.0  ;;  %3763 = vmatprep.mubr.f32.mxu0 %v3227_v21 }
 0xd12   :  { %3764 = vmatmul.mubr.f32.vlgmr.msra.gmra.mrb[28].mxu0 %v3228_v13 }
 0xd13   :  { %3770 = vmatprep.mubr.msk.f32.mxu0 %vm2304_vm12, %v3320_v17 }
 0xd8c   :  { %v3332_v34 = vpop.permute.xlu1 %3331 }
 0xde5   :  { %v3765_v11 = vpop.f32.mrb[28].mxu0 }
 0xde6   :  { %v3311_v35 = vpop.f32.mrb[29].mxu0 }
 0xde7   :  { %v3805_v39 = vpack.c.bf16 %v3765_v11, %v3311_v35 }
 0xde9   :  { %3806 = vmatprep.subr.bf16.mxu0 %v3805_v39 }
 0xdea   :  { %3808 = vmatpush3.bf16.msra.mxu0 %v3805_v39 }
 0xded   :  { %3771 = vmatmul.mubr.msk.f32.vlgmr.msra.gmra.mrb[30].mxu0 %vm2304_vm12, %v3321_v33 }
 0xec0   :  { %v3772_v45 = vpop.f32.mrb[30].mxu0 }
 0xec1   :  { %v3412_v25 = vadd.f32 %v3772_v45, %v3332_v34  ;;  %v3406_v46 = vpop.f32.mrb[31].mxu0 }
 0xec2   :  { %v3407_v49 = vadd.f32 %v3406_v46, %v3327_v44 }
 0xec3   :  { %v3418_v48 = vsel %vm3417_vm13, %v3412_v25, -inf }
 0xec4   :  { %v3416_v22 = vsel %vm3415_vm14, %v3407_v49, -inf }
 0xec5   :  { %v3419_v50 = vmax.f32 %v3416_v22, %v3418_v48 }
 0xec7   :  { %v3420_v36 = vrot.slane %v3419_v50, 4 }
 0xec9   :  { %v3421_v52 = vmax.f32 %v3419_v50, %v3420_v36 }
 0xecb   :  { %v3422_v53 = vrot.slane %v3421_v52, 2 }
 0xecd   :  { %v3423_v54 = vmax.f32 %v3421_v52, %v3422_v53 }
 0xecf   :  { %v3424_v9 = vrot.slane %v3423_v54, 1 }
 0xed1   :  { %v3425_v55 = vmax.f32 %v3423_v54, %v3424_v9 }
 0xed3   :  { %v3426_v56 = vsub.f32 %v3407_v49, %v3425_v55  ;;  %v3427_v23 = vsub.f32 %v3412_v25, %v3425_v55 }
 0xed5   :  { %v3428_v57 = vmul.f32 1.442695, %v3426_v56  ;;  %v3430_v58 = vmul.f32 1.442695, %v3427_v23 }
 0xed7   :  { %3904 = vpow2.f32 %v3428_v57 }
 0xed8   :  { %3906 = vpow2.f32 %v3430_v58 }
 0xee1   :  { %v3905_v59 = vpop.eup %3904 }
 0xee2   :  { %v3907_v60 = vpop.eup %3906  ;;  %v3432_v28 = vsel %vm3415_vm14, %v3905_v59, 0.0 }
 0xee3   :  { %v3433_v61 = vsel %vm3417_vm13, %v3907_v60, 0.0 }
 0xee4   :  { %v3434_v3 = vadd.f32 %v3433_v61, %v3432_v28 }
 0xee6   :  { %v3435_v15 = vrot.slane %v3434_v3, 4 }
 0xee8   :  { %v3436_v1 = vadd.f32 %v3435_v15, %v3434_v3 }
 0xeea   :  { %v3437_v2 = vrot.slane %v3436_v1, 2 }
 0xeec   :  { %v3438_v63 = vadd.f32 %v3437_v2, %v3436_v1 }
 0xeee   :  { %v3439_v6 = vrot.slane %v3438_v63, 1 }
 0xef0   :  { %v3440_v8 = vadd.f32 %v3439_v6, %v3438_v63 }
 0xef2   :  { %3908 = vlog2.f32 %v3440_v8 }
 0xefc   :  { %v3909_v0 = vpop.eup %3908 }
 0xefd   :  { %v3442_v12 = vmul.f32 0.6931472, %v3909_v0 }
 0xeff   :  { %v3443_v62 = vsub.f32 %v3426_v56, %v3442_v12  ;;  %v3444_v14 = vsub.f32 %v3427_v23, %v3442_v12 }
 0xf01   :  { %3445 = vst.msk [vmem:[%s5526_s18] sm:$0xff] %vm3415_vm14, %v3443_v62 }
 0xf02   :  { %3446 = vst.msk [vmem:[%s5526_s18 + $0x8] sm:$0x3] %vm3417_vm13, %v3444_v14 }
 0xf03   :  { %3451 = vsyncpa [#allocation5], 1 }
 0xf04   :  { %3452 = vsyncpa [#allocation7], 1 }

</bundles_post_ra>
